<compile_context>
chip_gen: v6e
topology: v6e:2x2x1
jax: 0.10.0
libtpu: 0.0.40
codegen_flags: <defaults>
</compile_context>

<pallas_src>
import functools

import jax
import jax.numpy as jnp
from jax.experimental import pallas as pl
from jax.experimental.pallas import tpu as pltpu

BN_EPS = 1e-5


# ----------------------------- Pallas kernels ------------------------------

def _conv_mm_kernel(w_ref, a_ref, b_ref, o_ref, *, relu):
    # out^T = W^T @ A^T  on the MXU, bias add (+ ReLU) on the VPU.
    acc = jnp.dot(w_ref[...], a_ref[...], preferred_element_type=jnp.float32)
    acc = acc + b_ref[...]
    if relu:
        acc = jnp.maximum(acc, 0.0)
    o_ref[...] = acc


def _conv_mm_res_kernel(w_ref, a_ref, b_ref, r_ref, o_ref, *, relu):
    # Same as above with the residual (skip) tensor fused into the epilogue.
    acc = jnp.dot(w_ref[...], a_ref[...], preferred_element_type=jnp.float32)
    acc = acc + b_ref[...] + r_ref[...]
    if relu:
        acc = jnp.maximum(acc, 0.0)
    o_ref[...] = acc


def _final_kernel(w_ref, a_ref, b_ref, wc_ref, bc_ref, wl_ref, sel_ref, bl_ref,
                  o_ref):
    # top_layer2 conv + BN + ReLU           -> (nf, M)
    top2 = jnp.dot(w_ref[...], a_ref[...], preferred_element_type=jnp.float32)
    top2 = jnp.maximum(top2 + b_ref[...], 0.0)
    # flatten_layer Conv1x1 + ReLU          -> (1, M)
    f = jnp.dot(wc_ref[...], top2, preferred_element_type=jnp.float32)
    f = jnp.maximum(f + bc_ref[...], 0.0)
    # linear_regressor: per-batch weighted sum over the H*W positions.
    z = f * wl_ref[...]                                            # (1, M)
    o_ref[...] = jnp.dot(z, sel_ref[...],
                         preferred_element_type=jnp.float32) + bl_ref[...]


# --------------------------- pallas_call wrappers ---------------------------

def _full_block(shape):
    nd = len(shape)
    return pl.BlockSpec(shape, lambda i, _nd=nd: (0,) * _nd)


def fused_matmul_T(wt, a, bias_col, relu, residual=None):
    """out = relu?( wt @ a + bias_col (+ residual) ).

    wt: (Cout, K), a: (K, M), bias_col: (Cout, 1), residual: (Cout, M)|None.
    Whole operands fit VMEM (largest A is ~0.9 MiB) -> single block, grid=(1,).
    """
    Cout, _ = wt.shape
    M = a.shape[1]
    if residual is None:
        kernel = functools.partial(_conv_mm_kernel, relu=relu)
        args = (wt, a, bias_col)
    else:
        kernel = functools.partial(_conv_mm_res_kernel, relu=relu)
        args = (wt, a, bias_col, residual)
    return pl.pallas_call(
        kernel,
        out_shape=jax.ShapeDtypeStruct((Cout, M), jnp.float32),
        grid=(1,),
        in_specs=[_full_block(v.shape) for v in args],
        out_specs=_full_block((Cout, M)),
    )(*args)


# ------------------------------- conv glue ----------------------------------

def _conv_taps(xc):
    """Transposed im2col: (C, N, H, W) -> (9*C, N*H*W) for a 'same' 3x3 conv.

    Pure XLA glue; under jit the pad + 9 slices + stack (and any preceding
    pool / upsample / concat producer) fuse into one patch-building fusion.
    """
    C, N, H, W = xc.shape
    xp = jnp.pad(xc, ((0, 0), (0, 0), (1, 1), (1, 1)))
    taps = [xp[:, :, dy:dy + H, dx:dx + W] for dy in range(3) for dx in range(3)]
    return jnp.stack(taps, axis=0).reshape(9 * C, N * H * W)


def conv3x3_T(xc, w_hwio, bias_vec, relu, residual=None):
    """'same' 3x3 conv in the transposed (channel-major) formulation.

    xc: (Cin, N, H, W);  w_hwio: (3, 3, Cin, Cout) (BN scale pre-folded);
    residual (optional): (Cout, N, H, W) added in the kernel epilogue.
    """
    Cin, N, H, W = xc.shape
    Cout = w_hwio.shape[-1]
    a = _conv_taps(xc)                                             # (9*Cin, M)
    wt = jnp.transpose(w_hwio, (3, 0, 1, 2)).reshape(Cout, 9 * Cin)
    res = None if residual is None else residual.reshape(Cout, N * H * W)
    out = fused_matmul_T(wt, a, bias_vec.reshape(Cout, 1), relu, res)
    return out.reshape(Cout, N, H, W)


def maxpool2x2_T(xc):
    # 2x2/stride-2 max pool on (C, N, H, W).  Glue: fuses with the following
    # conv's patch-building fusion (no separate Pallas kernel, no HBM round
    # trip for the pooled tensor).
    return jnp.maximum(
        jnp.maximum(xc[:, :, 0::2, 0::2], xc[:, :, 0::2, 1::2]),
        jnp.maximum(xc[:, :, 1::2, 0::2], xc[:, :, 1::2, 1::2]))


def upsample2x_T(xc):  # nearest neighbour, scale_factor=(2, 2)
    return jnp.repeat(jnp.repeat(xc, 2, axis=2), 2, axis=3)


def _fold_bn(w, b, bn_params):
    """Fold eval-mode BN (gamma,beta,mean,var) INTO the conv weights (+bias)."""
    gamma, beta, mean, var = bn_params
    scale = gamma / jnp.sqrt(var + BN_EPS)
    w_folded = w * scale                       # broadcast over Cout (last dim)
    bias = beta + (b - mean) * scale
    return w_folded, bias


# ------------------------------ parameters ----------------------------------

def init_params(key, nf, image_size):
    ks = iter(jax.random.split(key, 128))

    def conv(cin, cout, k):
        w = jax.random.normal(next(ks), (k, k, cin, cout), jnp.float32) / jnp.sqrt(k * k * cin)
        b = 0.05 * jax.random.normal(next(ks), (cout,), jnp.float32)
        return w, b

    def bn(c):
        gamma = 0.5 + 0.5 * jax.random.uniform(next(ks), (c,), jnp.float32)
        beta = 0.1 * jax.random.normal(next(ks), (c,), jnp.float32)
        mean = 0.1 * jax.random.normal(next(ks), (c,), jnp.float32)
        var = 0.5 + jax.random.uniform(next(ks), (c,), jnp.float32)
        return gamma, beta, mean, var

    p = {}
    p["top1_c1"] = conv(3, nf, 1)
    p["top1_c3"] = conv(nf, nf, 3);             p["top1_bn"] = bn(nf)
    p["mid1_c3"] = conv(nf, 2 * nf, 3);         p["mid1_bn"] = bn(2 * nf)
    p["bot1_c3"] = conv(2 * nf, 4 * nf, 3);     p["bot1_bn"] = bn(4 * nf)
    p["bn1_c3a"] = conv(4 * nf, 4 * nf, 3);     p["bn1_bna"] = bn(4 * nf)
    p["bn1_c3b"] = conv(4 * nf, 4 * nf, 3);     p["bn1_bnb"] = bn(4 * nf)
    p["bn2_c3a"] = conv(4 * nf, 4 * nf, 3);     p["bn2_bna"] = bn(4 * nf)
    p["bn2_c3b"] = conv(4 * nf, 4 * nf, 3);     p["bn2_bnb"] = bn(4 * nf)
    p["botup_c3"] = conv(4 * nf, 2 * nf, 3)
    p["mid2_c3"] = conv(4 * nf, 2 * nf, 3);     p["mid2_bn"] = bn(2 * nf)
    p["midup_c3"] = conv(2 * nf, nf, 3)
    p["top2_c3"] = conv(2 * nf, nf, 3);         p["top2_bn"] = bn(nf)
    p["flat_c1"] = conv(nf, 1, 1)
    hw = image_size[0] * image_size[0]
    w_lin = jax.random.normal(next(ks), (hw, 1), jnp.float32) / jnp.sqrt(hw)
    b_lin = 0.05 * jax.random.normal(next(ks), (1,), jnp.float32)
    p["linear"] = (w_lin, b_lin)
    return p


# ------------------------------- forward -------------------------------------

def forward(params, x_nchw, nf):
    N, Cin, H, W = x_nchw.shape
    assert H % 4 == 0 and W % 4 == 0, "two 2x2 pools require H, W % 4 == 0"
    x = jnp.transpose(x_nchw, (1, 0, 2, 3))        # channel-major (C, N, H, W)

    # ---- top_layer1: Conv1x1 -> Conv3x3 -> BN -> ReLU  (ONE kernel) --------
    # Compose the 1x1 conv into the 3x3 weights; its bias travels on an extra
    # "ones" input channel so that zero-padding at the borders stays exact.
    w1, b1 = params["top1_c1"]
    w3, b3 = params["top1_c3"]
    w1m = w1.reshape(w1.shape[2], w1.shape[3])                        # (3, nf)
    w_x = jnp.einsum('im,yxmo->yxio', w1m, w3)                        # (3,3,3,nf)
    w_b = jnp.einsum('m,yxmo->yxo', b1, w3)[:, :, None, :]            # (3,3,1,nf)
    w_eff = jnp.concatenate([w_x, w_b], axis=2)                       # (3,3,4,nf)
    w_eff, bias = _fold_bn(w_eff, b3, params["top1_bn"])
    x_aug = jnp.concatenate([x, jnp.ones((1, N, H, W), jnp.float32)], axis=0)
    top1 = conv3x3_T(x_aug, w_eff, bias, relu=True)           # (nf, N, 16, 16)

    # ---- mid_layer1: MaxPool (glue) -> Conv3x3 -> BN -> ReLU ---------------
    w, bias = _fold_bn(*params["mid1_c3"], params["mid1_bn"])
    mid1 = conv3x3_T(maxpool2x2_T(top1), w, bias, relu=True)  # (2nf, N, 8, 8)

    # ---- bot_layer1: MaxPool (glue) -> Conv3x3 -> BN -> ReLU ---------------
    w, bias = _fold_bn(*params["bot1_c3"], params["bot1_bn"])
    bot1 = conv3x3_T(maxpool2x2_T(mid1), w, bias, relu=True)  # (4nf, N, 4, 4)

    # ---- bottleneck1 (residual fused into 2nd conv's epilogue) -------------
    w, bias = _fold_bn(*params["bn1_c3a"], params["bn1_bna"])
    z = conv3x3_T(bot1, w, bias, relu=True)
    w, bias = _fold_bn(*params["bn1_c3b"], params["bn1_bnb"])
    z = conv3x3_T(z, w, bias, relu=False, residual=bot1)

    # ---- bottleneck2 (residual fused) ---------------------------------------
    identity = z
    w, bias = _fold_bn(*params["bn2_c3a"], params["bn2_bna"])
    z2 = conv3x3_T(z, w, bias, relu=True)
    w, bias = _fold_bn(*params["bn2_c3b"], params["bn2_bnb"])
    z2 = conv3x3_T(z2, w, bias, relu=False, residual=identity)

    # ---- bot_upsample: Upsample (glue) -> Conv3x3 ---------------------------
    w, b = params["botup_c3"]
    mid2_pre = conv3x3_T(upsample2x_T(z2), w, b, relu=False)  # (2nf, N, 8, 8)

    # ---- mid_layer2: concat (glue) -> Conv3x3 -> BN -> ReLU -> Dropout(id) --
    w, bias = _fold_bn(*params["mid2_c3"], params["mid2_bn"])
    mid2 = conv3x3_T(jnp.concatenate([mid2_pre, mid1], axis=0), w, bias,
                     relu=True)                               # (2nf, N, 8, 8)

    # ---- mid_upsample: Upsample (glue) -> Conv3x3 ---------------------------
    w, b = params["midup_c3"]
    top2_pre = conv3x3_T(upsample2x_T(mid2), w, b, relu=False)  # (nf, N, 16, 16)

    # ---- top_layer2 + flatten_layer + linear_regressor (ONE kernel) --------
    cat = jnp.concatenate([top2_pre, top1], axis=0)            # (2nf, N, 16, 16)
    a = _conv_taps(cat)                                        # (9*2nf, M)
    w, bias = _fold_bn(*params["top2_c3"], params["top2_bn"])
    wt = jnp.transpose(w, (3, 0, 1, 2)).reshape(nf, 9 * 2 * nf)
    wc, bc = params["flat_c1"]
    wlin, blin = params["linear"]
    HW = H * W
    M = N * HW
    wl_row = jnp.tile(wlin.reshape(-1), N)[None, :]            # (1, M)
    sel = (jnp.arange(M)[:, None] // HW ==
           jnp.arange(N)[None, :]).astype(jnp.float32)         # (M, N)
    args = (wt, a, bias.reshape(nf, 1), wc.reshape(nf)[None, :],
            bc.reshape(1, 1), wl_row, sel, blin.reshape(1, 1))
    out = pl.pallas_call(
        _final_kernel,
        out_shape=jax.ShapeDtypeStruct((1, N), jnp.float32),
        grid=(1,),
        in_specs=[_full_block(v.shape) for v in args],
        out_specs=_full_block((1, N)),
    )(*args)
    return out.T                                               # (N, 1)


# --------------------------------- main --------------------------------------

if __name__ == "__main__":
    NF = 12
    IMAGE_SIZE = (16, 16)       # small but consistent: Linear in_features = 16*16
    key = jax.random.PRNGKey(0)
    k_param, k_x = jax.random.split(key)

    params = init_params(k_param, NF, IMAGE_SIZE)
    x = jax.random.normal(k_x, (2, 3, IMAGE_SIZE[0], IMAGE_SIZE[1]), jnp.float32)

    fwd = jax.jit(functools.partial(forward, nf=NF))
    out = fwd(params, x)
    out = jax.block_until_ready(out)

    assert out.shape == (2, 1), out.shape
    assert jnp.all(jnp.isfinite(out))
    print("KERNEL_OK")
</pallas_src>

<mosaic_0001>
module attributes {stable_mosaic.version = 11 : i64} {
  func.func @_conv_mm_kernel(%arg0: i32, %arg1: memref<12x36xf32, #tpu.memory_space<vmem>>, %arg2: memref<36x512xf32, #tpu.memory_space<vmem>>, %arg3: memref<12x1xf32, #tpu.memory_space<vmem>>, %arg4: memref<12x512xf32, #tpu.memory_space<vmem>>) attributes {dimension_semantics = [#tpu.dimension_semantics<arbitrary>], iteration_bounds = array<i64: 1>, scalar_prefetch = 0 : i64, scratch_operands = 0 : i64, tpu.core_type = #tpu.core_type<tc>, window_params = [{pipeline_mode = #tpu.pipeline_mode<synchronous>, transform_indices = @transform_0, window_bounds = array<i64: 12, 36>}, {pipeline_mode = #tpu.pipeline_mode<synchronous>, transform_indices = @transform_1, window_bounds = array<i64: 36, 512>}, {pipeline_mode = #tpu.pipeline_mode<synchronous>, transform_indices = @transform_2, window_bounds = array<i64: 12, 1>}, {pipeline_mode = #tpu.pipeline_mode<synchronous>, transform_indices = @transform_3, window_bounds = array<i64: 12, 512>}]} {
    %c0 = arith.constant 0 : index
    %c0_0 = arith.constant 0 : index
    %0 = vector.load %arg1[%c0, %c0_0] : memref<12x36xf32, #tpu.memory_space<vmem>>, vector<12x36xf32>
    %c0_1 = arith.constant 0 : index
    %c0_2 = arith.constant 0 : index
    %1 = vector.load %arg2[%c0_1, %c0_2] : memref<36x512xf32, #tpu.memory_space<vmem>>, vector<36x512xf32>
    %cst = arith.constant dense<0.000000e+00> : vector<12x512xf32>
    %2 = tpu.matmul %0, %1, %cst {dimension_numbers = #tpu.dot_dimension_numbers<[1], [0], [0], [1], [0, 0, 1, 1], [], []>} : vector<12x36xf32>, vector<36x512xf32>, vector<12x512xf32> -> vector<12x512xf32>
    %c0_3 = arith.constant 0 : index
    %c0_4 = arith.constant 0 : index
    %3 = vector.load %arg3[%c0_3, %c0_4] : memref<12x1xf32, #tpu.memory_space<vmem>>, vector<12x1xf32>
    %4 = vector.broadcast %3 : vector<12x1xf32> to vector<12x512xf32>
    %5 = arith.addf %2, %4 : vector<12x512xf32>
    %cst_5 = arith.constant 0.000000e+00 : f32
    %6 = vector.broadcast %cst_5 : f32 to vector<12x512xf32>
    %7 = arith.maximumf %5, %6 : vector<12x512xf32>
    %c0_6 = arith.constant 0 : index
    %c0_7 = arith.constant 0 : index
    %8 = vector.load %arg4[%c0_6, %c0_7] : memref<12x512xf32, #tpu.memory_space<vmem>>, vector<12x512xf32>
    tpu.vector_store %arg4[%c0_6, %c0_7], %7 {strides = array<i32>} : memref<12x512xf32, #tpu.memory_space<vmem>>, vector<12x512xf32>,
    return
  }
  func.func @transform_0(%arg0: i32) -> (i32, i32) {
    %c0_i32 = arith.constant 0 : i32
    %c0_i32_0 = arith.constant 0 : i32
    %c0_i32_1 = arith.constant 0 : i32
    return %c0_i32, %c0_i32_0 : i32, i32
  }
  func.func @transform_1(%arg0: i32) -> (i32, i32) {
    %c0_i32 = arith.constant 0 : i32
    %c0_i32_0 = arith.constant 0 : i32
    %c0_i32_1 = arith.constant 0 : i32
    return %c0_i32, %c0_i32_0 : i32, i32
  }
  func.func @transform_2(%arg0: i32) -> (i32, i32) {
    %c0_i32 = arith.constant 0 : i32
    %c0_i32_0 = arith.constant 0 : i32
    %c0_i32_1 = arith.constant 0 : i32
    return %c0_i32, %c0_i32_0 : i32, i32
  }
  func.func @transform_3(%arg0: i32) -> (i32, i32) {
    %c0_i32 = arith.constant 0 : i32
    %c0_i32_0 = arith.constant 0 : i32
    %c0_i32_1 = arith.constant 0 : i32
    return %c0_i32, %c0_i32_0 : i32, i32
  }
}

module attributes {stable_mosaic.version = 11 : i64} {
  func.func @_conv_mm_kernel(%arg0: i32, %arg1: memref<24x108xf32, #tpu.memory_space<vmem>>, %arg2: memref<108x128xf32, #tpu.memory_space<vmem>>, %arg3: memref<24x1xf32, #tpu.memory_space<vmem>>, %arg4: memref<24x128xf32, #tpu.memory_space<vmem>>) attributes {dimension_semantics = [#tpu.dimension_semantics<arbitrary>], iteration_bounds = array<i64: 1>, scalar_prefetch = 0 : i64, scratch_operands = 0 : i64, tpu.core_type = #tpu.core_type<tc>, window_params = [{pipeline_mode = #tpu.pipeline_mode<synchronous>, transform_indices = @transform_0, window_bounds = array<i64: 24, 108>}, {pipeline_mode = #tpu.pipeline_mode<synchronous>, transform_indices = @transform_1, window_bounds = array<i64: 108, 128>}, {pipeline_mode = #tpu.pipeline_mode<synchronous>, transform_indices = @transform_2, window_bounds = array<i64: 24, 1>}, {pipeline_mode = #tpu.pipeline_mode<synchronous>, transform_indices = @transform_3, window_bounds = array<i64: 24, 128>}]} {
    %c0 = arith.constant 0 : index
    %c0_0 = arith.constant 0 : index
    %0 = vector.load %arg1[%c0, %c0_0] : memref<24x108xf32, #tpu.memory_space<vmem>>, vector<24x108xf32>
    %c0_1 = arith.constant 0 : index
    %c0_2 = arith.constant 0 : index
    %1 = vector.load %arg2[%c0_1, %c0_2] : memref<108x128xf32, #tpu.memory_space<vmem>>, vector<108x128xf32>
    %cst = arith.constant dense<0.000000e+00> : vector<24x128xf32>
    %2 = tpu.matmul %0, %1, %cst {dimension_numbers = #tpu.dot_dimension_numbers<[1], [0], [0], [1], [0, 0, 1, 1], [], []>} : vector<24x108xf32>, vector<108x128xf32>, vector<24x128xf32> -> vector<24x128xf32>
    %c0_3 = arith.constant 0 : index
    %c0_4 = arith.constant 0 : index
    %3 = vector.load %arg3[%c0_3, %c0_4] : memref<24x1xf32, #tpu.memory_space<vmem>>, vector<24x1xf32>
    %4 = vector.broadcast %3 : vector<24x1xf32> to vector<24x128xf32>
    %5 = arith.addf %2, %4 : vector<24x128xf32>
    %cst_5 = arith.constant 0.000000e+00 : f32
    %6 = vector.broadcast %cst_5 : f32 to vector<24x128xf32>
    %7 = arith.maximumf %5, %6 : vector<24x128xf32>
    %c0_6 = arith.constant 0 : index
    %c0_7 = arith.constant 0 : index
    %8 = vector.load %arg4[%c0_6, %c0_7] : memref<24x128xf32, #tpu.memory_space<vmem>>, vector<24x128xf32>
    tpu.vector_store %arg4[%c0_6, %c0_7], %7 {strides = array<i32>} : memref<24x128xf32, #tpu.memory_space<vmem>>, vector<24x128xf32>,
    return
  }
  func.func @transform_0(%arg0: i32) -> (i32, i32) {
    %c0_i32 = arith.constant 0 : i32
    %c0_i32_0 = arith.constant 0 : i32
    %c0_i32_1 = arith.constant 0 : i32
    return %c0_i32, %c0_i32_0 : i32, i32
  }
  func.func @transform_1(%arg0: i32) -> (i32, i32) {
    %c0_i32 = arith.constant 0 : i32
    %c0_i32_0 = arith.constant 0 : i32
    %c0_i32_1 = arith.constant 0 : i32
    return %c0_i32, %c0_i32_0 : i32, i32
  }
  func.func @transform_2(%arg0: i32) -> (i32, i32) {
    %c0_i32 = arith.constant 0 : i32
    %c0_i32_0 = arith.constant 0 : i32
    %c0_i32_1 = arith.constant 0 : i32
    return %c0_i32, %c0_i32_0 : i32, i32
  }
  func.func @transform_3(%arg0: i32) -> (i32, i32) {
    %c0_i32 = arith.constant 0 : i32
    %c0_i32_0 = arith.constant 0 : i32
    %c0_i32_1 = arith.constant 0 : i32
    return %c0_i32, %c0_i32_0 : i32, i32
  }
}

module attributes {stable_mosaic.version = 11 : i64} {
  func.func @_conv_mm_kernel(%arg0: i32, %arg1: memref<48x216xf32, #tpu.memory_space<vmem>>, %arg2: memref<216x32xf32, #tpu.memory_space<vmem>>, %arg3: memref<48x1xf32, #tpu.memory_space<vmem>>, %arg4: memref<48x32xf32, #tpu.memory_space<vmem>>) attributes {dimension_semantics = [#tpu.dimension_semantics<arbitrary>], iteration_bounds = array<i64: 1>, scalar_prefetch = 0 : i64, scratch_operands = 0 : i64, tpu.core_type = #tpu.core_type<tc>, window_params = [{pipeline_mode = #tpu.pipeline_mode<synchronous>, transform_indices = @transform_0, window_bounds = array<i64: 48, 216>}, {pipeline_mode = #tpu.pipeline_mode<synchronous>, transform_indices = @transform_1, window_bounds = array<i64: 216, 32>}, {pipeline_mode = #tpu.pipeline_mode<synchronous>, transform_indices = @transform_2, window_bounds = array<i64: 48, 1>}, {pipeline_mode = #tpu.pipeline_mode<synchronous>, transform_indices = @transform_3, window_bounds = array<i64: 48, 32>}]} {
    %c0 = arith.constant 0 : index
    %c0_0 = arith.constant 0 : index
    %0 = vector.load %arg1[%c0, %c0_0] : memref<48x216xf32, #tpu.memory_space<vmem>>, vector<48x216xf32>
    %c0_1 = arith.constant 0 : index
    %c0_2 = arith.constant 0 : index
    %1 = vector.load %arg2[%c0_1, %c0_2] : memref<216x32xf32, #tpu.memory_space<vmem>>, vector<216x32xf32>
    %cst = arith.constant dense<0.000000e+00> : vector<48x32xf32>
    %2 = tpu.matmul %0, %1, %cst {dimension_numbers = #tpu.dot_dimension_numbers<[1], [0], [0], [1], [0, 0, 1, 1], [], []>} : vector<48x216xf32>, vector<216x32xf32>, vector<48x32xf32> -> vector<48x32xf32>
    %c0_3 = arith.constant 0 : index
    %c0_4 = arith.constant 0 : index
    %3 = vector.load %arg3[%c0_3, %c0_4] : memref<48x1xf32, #tpu.memory_space<vmem>>, vector<48x1xf32>
    %4 = vector.broadcast %3 : vector<48x1xf32> to vector<48x32xf32>
    %5 = arith.addf %2, %4 : vector<48x32xf32>
    %cst_5 = arith.constant 0.000000e+00 : f32
    %6 = vector.broadcast %cst_5 : f32 to vector<48x32xf32>
    %7 = arith.maximumf %5, %6 : vector<48x32xf32>
    %c0_6 = arith.constant 0 : index
    %c0_7 = arith.constant 0 : index
    %8 = vector.load %arg4[%c0_6, %c0_7] : memref<48x32xf32, #tpu.memory_space<vmem>>, vector<48x32xf32>
    tpu.vector_store %arg4[%c0_6, %c0_7], %7 {strides = array<i32>} : memref<48x32xf32, #tpu.memory_space<vmem>>, vector<48x32xf32>,
    return
  }
  func.func @transform_0(%arg0: i32) -> (i32, i32) {
    %c0_i32 = arith.constant 0 : i32
    %c0_i32_0 = arith.constant 0 : i32
    %c0_i32_1 = arith.constant 0 : i32
    return %c0_i32, %c0_i32_0 : i32, i32
  }
  func.func @transform_1(%arg0: i32) -> (i32, i32) {
    %c0_i32 = arith.constant 0 : i32
    %c0_i32_0 = arith.constant 0 : i32
    %c0_i32_1 = arith.constant 0 : i32
    return %c0_i32, %c0_i32_0 : i32, i32
  }
  func.func @transform_2(%arg0: i32) -> (i32, i32) {
    %c0_i32 = arith.constant 0 : i32
    %c0_i32_0 = arith.constant 0 : i32
    %c0_i32_1 = arith.constant 0 : i32
    return %c0_i32, %c0_i32_0 : i32, i32
  }
  func.func @transform_3(%arg0: i32) -> (i32, i32) {
    %c0_i32 = arith.constant 0 : i32
    %c0_i32_0 = arith.constant 0 : i32
    %c0_i32_1 = arith.constant 0 : i32
    return %c0_i32, %c0_i32_0 : i32, i32
  }
}

module attributes {stable_mosaic.version = 11 : i64} {
  func.func @_conv_mm_res_kernel(%arg0: i32, %arg1: memref<48x432xf32, #tpu.memory_space<vmem>>, %arg2: memref<432x32xf32, #tpu.memory_space<vmem>>, %arg3: memref<48x1xf32, #tpu.memory_space<vmem>>, %arg4: memref<48x32xf32, #tpu.memory_space<vmem>>, %arg5: memref<48x32xf32, #tpu.memory_space<vmem>>) attributes {dimension_semantics = [#tpu.dimension_semantics<arbitrary>], iteration_bounds = array<i64: 1>, scalar_prefetch = 0 : i64, scratch_operands = 0 : i64, tpu.core_type = #tpu.core_type<tc>, window_params = [{pipeline_mode = #tpu.pipeline_mode<synchronous>, transform_indices = @transform_0, window_bounds = array<i64: 48, 432>}, {pipeline_mode = #tpu.pipeline_mode<synchronous>, transform_indices = @transform_1, window_bounds = array<i64: 432, 32>}, {pipeline_mode = #tpu.pipeline_mode<synchronous>, transform_indices = @transform_2, window_bounds = array<i64: 48, 1>}, {pipeline_mode = #tpu.pipeline_mode<synchronous>, transform_indices = @transform_3, window_bounds = array<i64: 48, 32>}, {pipeline_mode = #tpu.pipeline_mode<synchronous>, transform_indices = @transform_4, window_bounds = array<i64: 48, 32>}]} {
    %c0 = arith.constant 0 : index
    %c0_0 = arith.constant 0 : index
    %0 = vector.load %arg1[%c0, %c0_0] : memref<48x432xf32, #tpu.memory_space<vmem>>, vector<48x432xf32>
    %c0_1 = arith.constant 0 : index
    %c0_2 = arith.constant 0 : index
    %1 = vector.load %arg2[%c0_1, %c0_2] : memref<432x32xf32, #tpu.memory_space<vmem>>, vector<432x32xf32>
    %cst = arith.constant dense<0.000000e+00> : vector<48x32xf32>
    %2 = tpu.matmul %0, %1, %cst {dimension_numbers = #tpu.dot_dimension_numbers<[1], [0], [0], [1], [0, 0, 1, 1], [], []>} : vector<48x432xf32>, vector<432x32xf32>, vector<48x32xf32> -> vector<48x32xf32>
    %c0_3 = arith.constant 0 : index
    %c0_4 = arith.constant 0 : index
    %3 = vector.load %arg3[%c0_3, %c0_4] : memref<48x1xf32, #tpu.memory_space<vmem>>, vector<48x1xf32>
    %4 = vector.broadcast %3 : vector<48x1xf32> to vector<48x32xf32>
    %5 = arith.addf %2, %4 : vector<48x32xf32>
    %c0_5 = arith.constant 0 : index
    %c0_6 = arith.constant 0 : index
    %6 = vector.load %arg4[%c0_5, %c0_6] : memref<48x32xf32, #tpu.memory_space<vmem>>, vector<48x32xf32>
    %7 = arith.addf %5, %6 : vector<48x32xf32>
    %c0_7 = arith.constant 0 : index
    %c0_8 = arith.constant 0 : index
    %8 = vector.load %arg5[%c0_7, %c0_8] : memref<48x32xf32, #tpu.memory_space<vmem>>, vector<48x32xf32>
    tpu.vector_store %arg5[%c0_7, %c0_8], %7 {strides = array<i32>} : memref<48x32xf32, #tpu.memory_space<vmem>>, vector<48x32xf32>,
    return
  }
  func.func @transform_0(%arg0: i32) -> (i32, i32) {
    %c0_i32 = arith.constant 0 : i32
    %c0_i32_0 = arith.constant 0 : i32
    %c0_i32_1 = arith.constant 0 : i32
    return %c0_i32, %c0_i32_0 : i32, i32
  }
  func.func @transform_1(%arg0: i32) -> (i32, i32) {
    %c0_i32 = arith.constant 0 : i32
    %c0_i32_0 = arith.constant 0 : i32
    %c0_i32_1 = arith.constant 0 : i32
    return %c0_i32, %c0_i32_0 : i32, i32
  }
  func.func @transform_2(%arg0: i32) -> (i32, i32) {
    %c0_i32 = arith.constant 0 : i32
    %c0_i32_0 = arith.constant 0 : i32
    %c0_i32_1 = arith.constant 0 : i32
    return %c0_i32, %c0_i32_0 : i32, i32
  }
  func.func @transform_3(%arg0: i32) -> (i32, i32) {
    %c0_i32 = arith.constant 0 : i32
    %c0_i32_0 = arith.constant 0 : i32
    %c0_i32_1 = arith.constant 0 : i32
    return %c0_i32, %c0_i32_0 : i32, i32
  }
  func.func @transform_4(%arg0: i32) -> (i32, i32) {
    %c0_i32 = arith.constant 0 : i32
    %c0_i32_0 = arith.constant 0 : i32
    %c0_i32_1 = arith.constant 0 : i32
    return %c0_i32, %c0_i32_0 : i32, i32
  }
}

module attributes {stable_mosaic.version = 11 : i64} {
  func.func @_conv_mm_kernel(%arg0: i32, %arg1: memref<48x432xf32, #tpu.memory_space<vmem>>, %arg2: memref<432x32xf32, #tpu.memory_space<vmem>>, %arg3: memref<48x1xf32, #tpu.memory_space<vmem>>, %arg4: memref<48x32xf32, #tpu.memory_space<vmem>>) attributes {dimension_semantics = [#tpu.dimension_semantics<arbitrary>], iteration_bounds = array<i64: 1>, scalar_prefetch = 0 : i64, scratch_operands = 0 : i64, tpu.core_type = #tpu.core_type<tc>, window_params = [{pipeline_mode = #tpu.pipeline_mode<synchronous>, transform_indices = @transform_0, window_bounds = array<i64: 48, 432>}, {pipeline_mode = #tpu.pipeline_mode<synchronous>, transform_indices = @transform_1, window_bounds = array<i64: 432, 32>}, {pipeline_mode = #tpu.pipeline_mode<synchronous>, transform_indices = @transform_2, window_bounds = array<i64: 48, 1>}, {pipeline_mode = #tpu.pipeline_mode<synchronous>, transform_indices = @transform_3, window_bounds = array<i64: 48, 32>}]} {
    %c0 = arith.constant 0 : index
    %c0_0 = arith.constant 0 : index
    %0 = vector.load %arg1[%c0, %c0_0] : memref<48x432xf32, #tpu.memory_space<vmem>>, vector<48x432xf32>
    %c0_1 = arith.constant 0 : index
    %c0_2 = arith.constant 0 : index
    %1 = vector.load %arg2[%c0_1, %c0_2] : memref<432x32xf32, #tpu.memory_space<vmem>>, vector<432x32xf32>
    %cst = arith.constant dense<0.000000e+00> : vector<48x32xf32>
    %2 = tpu.matmul %0, %1, %cst {dimension_numbers = #tpu.dot_dimension_numbers<[1], [0], [0], [1], [0, 0, 1, 1], [], []>} : vector<48x432xf32>, vector<432x32xf32>, vector<48x32xf32> -> vector<48x32xf32>
    %c0_3 = arith.constant 0 : index
    %c0_4 = arith.constant 0 : index
    %3 = vector.load %arg3[%c0_3, %c0_4] : memref<48x1xf32, #tpu.memory_space<vmem>>, vector<48x1xf32>
    %4 = vector.broadcast %3 : vector<48x1xf32> to vector<48x32xf32>
    %5 = arith.addf %2, %4 : vector<48x32xf32>
    %cst_5 = arith.constant 0.000000e+00 : f32
    %6 = vector.broadcast %cst_5 : f32 to vector<48x32xf32>
    %7 = arith.maximumf %5, %6 : vector<48x32xf32>
    %c0_6 = arith.constant 0 : index
    %c0_7 = arith.constant 0 : index
    %8 = vector.load %arg4[%c0_6, %c0_7] : memref<48x32xf32, #tpu.memory_space<vmem>>, vector<48x32xf32>
    tpu.vector_store %arg4[%c0_6, %c0_7], %7 {strides = array<i32>} : memref<48x32xf32, #tpu.memory_space<vmem>>, vector<48x32xf32>,
    return
  }
  func.func @transform_0(%arg0: i32) -> (i32, i32) {
    %c0_i32 = arith.constant 0 : i32
    %c0_i32_0 = arith.constant 0 : i32
    %c0_i32_1 = arith.constant 0 : i32
    return %c0_i32, %c0_i32_0 : i32, i32
  }
  func.func @transform_1(%arg0: i32) -> (i32, i32) {
    %c0_i32 = arith.constant 0 : i32
    %c0_i32_0 = arith.constant 0 : i32
    %c0_i32_1 = arith.constant 0 : i32
    return %c0_i32, %c0_i32_0 : i32, i32
  }
  func.func @transform_2(%arg0: i32) -> (i32, i32) {
    %c0_i32 = arith.constant 0 : i32
    %c0_i32_0 = arith.constant 0 : i32
    %c0_i32_1 = arith.constant 0 : i32
    return %c0_i32, %c0_i32_0 : i32, i32
  }
  func.func @transform_3(%arg0: i32) -> (i32, i32) {
    %c0_i32 = arith.constant 0 : i32
    %c0_i32_0 = arith.constant 0 : i32
    %c0_i32_1 = arith.constant 0 : i32
    return %c0_i32, %c0_i32_0 : i32, i32
  }
}

module attributes {stable_mosaic.version = 11 : i64} {
  func.func @_conv_mm_kernel(%arg0: i32, %arg1: memref<24x432xf32, #tpu.memory_space<vmem>>, %arg2: memref<432x128xf32, #tpu.memory_space<vmem>>, %arg3: memref<24x1xf32, #tpu.memory_space<vmem>>, %arg4: memref<24x128xf32, #tpu.memory_space<vmem>>) attributes {dimension_semantics = [#tpu.dimension_semantics<arbitrary>], iteration_bounds = array<i64: 1>, scalar_prefetch = 0 : i64, scratch_operands = 0 : i64, tpu.core_type = #tpu.core_type<tc>, window_params = [{pipeline_mode = #tpu.pipeline_mode<synchronous>, transform_indices = @transform_0, window_bounds = array<i64: 24, 432>}, {pipeline_mode = #tpu.pipeline_mode<synchronous>, transform_indices = @transform_1, window_bounds = array<i64: 432, 128>}, {pipeline_mode = #tpu.pipeline_mode<synchronous>, transform_indices = @transform_2, window_bounds = array<i64: 24, 1>}, {pipeline_mode = #tpu.pipeline_mode<synchronous>, transform_indices = @transform_3, window_bounds = array<i64: 24, 128>}]} {
    %c0 = arith.constant 0 : index
    %c0_0 = arith.constant 0 : index
    %0 = vector.load %arg1[%c0, %c0_0] : memref<24x432xf32, #tpu.memory_space<vmem>>, vector<24x432xf32>
    %c0_1 = arith.constant 0 : index
    %c0_2 = arith.constant 0 : index
    %1 = vector.load %arg2[%c0_1, %c0_2] : memref<432x128xf32, #tpu.memory_space<vmem>>, vector<432x128xf32>
    %cst = arith.constant dense<0.000000e+00> : vector<24x128xf32>
    %2 = tpu.matmul %0, %1, %cst {dimension_numbers = #tpu.dot_dimension_numbers<[1], [0], [0], [1], [0, 0, 1, 1], [], []>} : vector<24x432xf32>, vector<432x128xf32>, vector<24x128xf32> -> vector<24x128xf32>
    %c0_3 = arith.constant 0 : index
    %c0_4 = arith.constant 0 : index
    %3 = vector.load %arg3[%c0_3, %c0_4] : memref<24x1xf32, #tpu.memory_space<vmem>>, vector<24x1xf32>
    %4 = vector.broadcast %3 : vector<24x1xf32> to vector<24x128xf32>
    %5 = arith.addf %2, %4 : vector<24x128xf32>
    %c0_5 = arith.constant 0 : index
    %c0_6 = arith.constant 0 : index
    %6 = vector.load %arg4[%c0_5, %c0_6] : memref<24x128xf32, #tpu.memory_space<vmem>>, vector<24x128xf32>
    tpu.vector_store %arg4[%c0_5, %c0_6], %5 {strides = array<i32>} : memref<24x128xf32, #tpu.memory_space<vmem>>, vector<24x128xf32>,
    return
  }
  func.func @transform_0(%arg0: i32) -> (i32, i32) {
    %c0_i32 = arith.constant 0 : i32
    %c0_i32_0 = arith.constant 0 : i32
    %c0_i32_1 = arith.constant 0 : i32
    return %c0_i32, %c0_i32_0 : i32, i32
  }
  func.func @transform_1(%arg0: i32) -> (i32, i32) {
    %c0_i32 = arith.constant 0 : i32
    %c0_i32_0 = arith.constant 0 : i32
    %c0_i32_1 = arith.constant 0 : i32
    return %c0_i32, %c0_i32_0 : i32, i32
  }
  func.func @transform_2(%arg0: i32) -> (i32, i32) {
    %c0_i32 = arith.constant 0 : i32
    %c0_i32_0 = arith.constant 0 : i32
    %c0_i32_1 = arith.constant 0 : i32
    return %c0_i32, %c0_i32_0 : i32, i32
  }
  func.func @transform_3(%arg0: i32) -> (i32, i32) {
    %c0_i32 = arith.constant 0 : i32
    %c0_i32_0 = arith.constant 0 : i32
    %c0_i32_1 = arith.constant 0 : i32
    return %c0_i32, %c0_i32_0 : i32, i32
  }
}

module attributes {stable_mosaic.version = 11 : i64} {
  func.func @_conv_mm_kernel(%arg0: i32, %arg1: memref<24x432xf32, #tpu.memory_space<vmem>>, %arg2: memref<432x128xf32, #tpu.memory_space<vmem>>, %arg3: memref<24x1xf32, #tpu.memory_space<vmem>>, %arg4: memref<24x128xf32, #tpu.memory_space<vmem>>) attributes {dimension_semantics = [#tpu.dimension_semantics<arbitrary>], iteration_bounds = array<i64: 1>, scalar_prefetch = 0 : i64, scratch_operands = 0 : i64, tpu.core_type = #tpu.core_type<tc>, window_params = [{pipeline_mode = #tpu.pipeline_mode<synchronous>, transform_indices = @transform_0, window_bounds = array<i64: 24, 432>}, {pipeline_mode = #tpu.pipeline_mode<synchronous>, transform_indices = @transform_1, window_bounds = array<i64: 432, 128>}, {pipeline_mode = #tpu.pipeline_mode<synchronous>, transform_indices = @transform_2, window_bounds = array<i64: 24, 1>}, {pipeline_mode = #tpu.pipeline_mode<synchronous>, transform_indices = @transform_3, window_bounds = array<i64: 24, 128>}]} {
    %c0 = arith.constant 0 : index
    %c0_0 = arith.constant 0 : index
    %0 = vector.load %arg1[%c0, %c0_0] : memref<24x432xf32, #tpu.memory_space<vmem>>, vector<24x432xf32>
    %c0_1 = arith.constant 0 : index
    %c0_2 = arith.constant 0 : index
    %1 = vector.load %arg2[%c0_1, %c0_2] : memref<432x128xf32, #tpu.memory_space<vmem>>, vector<432x128xf32>
    %cst = arith.constant dense<0.000000e+00> : vector<24x128xf32>
    %2 = tpu.matmul %0, %1, %cst {dimension_numbers = #tpu.dot_dimension_numbers<[1], [0], [0], [1], [0, 0, 1, 1], [], []>} : vector<24x432xf32>, vector<432x128xf32>, vector<24x128xf32> -> vector<24x128xf32>
    %c0_3 = arith.constant 0 : index
    %c0_4 = arith.constant 0 : index
    %3 = vector.load %arg3[%c0_3, %c0_4] : memref<24x1xf32, #tpu.memory_space<vmem>>, vector<24x1xf32>
    %4 = vector.broadcast %3 : vector<24x1xf32> to vector<24x128xf32>
    %5 = arith.addf %2, %4 : vector<24x128xf32>
    %cst_5 = arith.constant 0.000000e+00 : f32
    %6 = vector.broadcast %cst_5 : f32 to vector<24x128xf32>
    %7 = arith.maximumf %5, %6 : vector<24x128xf32>
    %c0_6 = arith.constant 0 : index
    %c0_7 = arith.constant 0 : index
    %8 = vector.load %arg4[%c0_6, %c0_7] : memref<24x128xf32, #tpu.memory_space<vmem>>, vector<24x128xf32>
    tpu.vector_store %arg4[%c0_6, %c0_7], %7 {strides = array<i32>} : memref<24x128xf32, #tpu.memory_space<vmem>>, vector<24x128xf32>,
    return
  }
  func.func @transform_0(%arg0: i32) -> (i32, i32) {
    %c0_i32 = arith.constant 0 : i32
    %c0_i32_0 = arith.constant 0 : i32
    %c0_i32_1 = arith.constant 0 : i32
    return %c0_i32, %c0_i32_0 : i32, i32
  }
  func.func @transform_1(%arg0: i32) -> (i32, i32) {
    %c0_i32 = arith.constant 0 : i32
    %c0_i32_0 = arith.constant 0 : i32
    %c0_i32_1 = arith.constant 0 : i32
    return %c0_i32, %c0_i32_0 : i32, i32
  }
  func.func @transform_2(%arg0: i32) -> (i32, i32) {
    %c0_i32 = arith.constant 0 : i32
    %c0_i32_0 = arith.constant 0 : i32
    %c0_i32_1 = arith.constant 0 : i32
    return %c0_i32, %c0_i32_0 : i32, i32
  }
  func.func @transform_3(%arg0: i32) -> (i32, i32) {
    %c0_i32 = arith.constant 0 : i32
    %c0_i32_0 = arith.constant 0 : i32
    %c0_i32_1 = arith.constant 0 : i32
    return %c0_i32, %c0_i32_0 : i32, i32
  }
}

module attributes {stable_mosaic.version = 11 : i64} {
  func.func @_conv_mm_kernel(%arg0: i32, %arg1: memref<12x216xf32, #tpu.memory_space<vmem>>, %arg2: memref<216x512xf32, #tpu.memory_space<vmem>>, %arg3: memref<12x1xf32, #tpu.memory_space<vmem>>, %arg4: memref<12x512xf32, #tpu.memory_space<vmem>>) attributes {dimension_semantics = [#tpu.dimension_semantics<arbitrary>], iteration_bounds = array<i64: 1>, scalar_prefetch = 0 : i64, scratch_operands = 0 : i64, tpu.core_type = #tpu.core_type<tc>, window_params = [{pipeline_mode = #tpu.pipeline_mode<synchronous>, transform_indices = @transform_0, window_bounds = array<i64: 12, 216>}, {pipeline_mode = #tpu.pipeline_mode<synchronous>, transform_indices = @transform_1, window_bounds = array<i64: 216, 512>}, {pipeline_mode = #tpu.pipeline_mode<synchronous>, transform_indices = @transform_2, window_bounds = array<i64: 12, 1>}, {pipeline_mode = #tpu.pipeline_mode<synchronous>, transform_indices = @transform_3, window_bounds = array<i64: 12, 512>}]} {
    %c0 = arith.constant 0 : index
    %c0_0 = arith.constant 0 : index
    %0 = vector.load %arg1[%c0, %c0_0] : memref<12x216xf32, #tpu.memory_space<vmem>>, vector<12x216xf32>
    %c0_1 = arith.constant 0 : index
    %c0_2 = arith.constant 0 : index
    %1 = vector.load %arg2[%c0_1, %c0_2] : memref<216x512xf32, #tpu.memory_space<vmem>>, vector<216x512xf32>
    %cst = arith.constant dense<0.000000e+00> : vector<12x512xf32>
    %2 = tpu.matmul %0, %1, %cst {dimension_numbers = #tpu.dot_dimension_numbers<[1], [0], [0], [1], [0, 0, 1, 1], [], []>} : vector<12x216xf32>, vector<216x512xf32>, vector<12x512xf32> -> vector<12x512xf32>
    %c0_3 = arith.constant 0 : index
    %c0_4 = arith.constant 0 : index
    %3 = vector.load %arg3[%c0_3, %c0_4] : memref<12x1xf32, #tpu.memory_space<vmem>>, vector<12x1xf32>
    %4 = vector.broadcast %3 : vector<12x1xf32> to vector<12x512xf32>
    %5 = arith.addf %2, %4 : vector<12x512xf32>
    %c0_5 = arith.constant 0 : index
    %c0_6 = arith.constant 0 : index
    %6 = vector.load %arg4[%c0_5, %c0_6] : memref<12x512xf32, #tpu.memory_space<vmem>>, vector<12x512xf32>
    tpu.vector_store %arg4[%c0_5, %c0_6], %5 {strides = array<i32>} : memref<12x512xf32, #tpu.memory_space<vmem>>, vector<12x512xf32>,
    return
  }
  func.func @transform_0(%arg0: i32) -> (i32, i32) {
    %c0_i32 = arith.constant 0 : i32
    %c0_i32_0 = arith.constant 0 : i32
    %c0_i32_1 = arith.constant 0 : i32
    return %c0_i32, %c0_i32_0 : i32, i32
  }
  func.func @transform_1(%arg0: i32) -> (i32, i32) {
    %c0_i32 = arith.constant 0 : i32
    %c0_i32_0 = arith.constant 0 : i32
    %c0_i32_1 = arith.constant 0 : i32
    return %c0_i32, %c0_i32_0 : i32, i32
  }
  func.func @transform_2(%arg0: i32) -> (i32, i32) {
    %c0_i32 = arith.constant 0 : i32
    %c0_i32_0 = arith.constant 0 : i32
    %c0_i32_1 = arith.constant 0 : i32
    return %c0_i32, %c0_i32_0 : i32, i32
  }
  func.func @transform_3(%arg0: i32) -> (i32, i32) {
    %c0_i32 = arith.constant 0 : i32
    %c0_i32_0 = arith.constant 0 : i32
    %c0_i32_1 = arith.constant 0 : i32
    return %c0_i32, %c0_i32_0 : i32, i32
  }
}

module attributes {stable_mosaic.version = 11 : i64} {
  func.func @_final_kernel(%arg0: i32, %arg1: memref<12x216xf32, #tpu.memory_space<vmem>>, %arg2: memref<216x512xf32, #tpu.memory_space<vmem>>, %arg3: memref<12x1xf32, #tpu.memory_space<vmem>>, %arg4: memref<1x12xf32, #tpu.memory_space<vmem>>, %arg5: memref<1x1xf32, #tpu.memory_space<vmem>>, %arg6: memref<1x512xf32, #tpu.memory_space<vmem>>, %arg7: memref<512x2xf32, #tpu.memory_space<vmem>>, %arg8: memref<1x1xf32, #tpu.memory_space<vmem>>, %arg9: memref<1x2xf32, #tpu.memory_space<vmem>>) attributes {dimension_semantics = [#tpu.dimension_semantics<arbitrary>], iteration_bounds = array<i64: 1>, scalar_prefetch = 0 : i64, scratch_operands = 0 : i64, tpu.core_type = #tpu.core_type<tc>, window_params = [{pipeline_mode = #tpu.pipeline_mode<synchronous>, transform_indices = @transform_0, window_bounds = array<i64: 12, 216>}, {pipeline_mode = #tpu.pipeline_mode<synchronous>, transform_indices = @transform_1, window_bounds = array<i64: 216, 512>}, {pipeline_mode = #tpu.pipeline_mode<synchronous>, transform_indices = @transform_2, window_bounds = array<i64: 12, 1>}, {pipeline_mode = #tpu.pipeline_mode<synchronous>, transform_indices = @transform_3, window_bounds = array<i64: 1, 12>}, {pipeline_mode = #tpu.pipeline_mode<synchronous>, transform_indices = @transform_4, window_bounds = array<i64: 1, 1>}, {pipeline_mode = #tpu.pipeline_mode<synchronous>, transform_indices = @transform_5, window_bounds = array<i64: 1, 512>}, {pipeline_mode = #tpu.pipeline_mode<synchronous>, transform_indices = @transform_6, window_bounds = array<i64: 512, 2>}, {pipeline_mode = #tpu.pipeline_mode<synchronous>, transform_indices = @transform_7, window_bounds = array<i64: 1, 1>}, {pipeline_mode = #tpu.pipeline_mode<synchronous>, transform_indices = @transform_8, window_bounds = array<i64: 1, 2>}]} {
    %c0 = arith.constant 0 : index
    %c0_0 = arith.constant 0 : index
    %0 = vector.load %arg1[%c0, %c0_0] : memref<12x216xf32, #tpu.memory_space<vmem>>, vector<12x216xf32>
    %c0_1 = arith.constant 0 : index
    %c0_2 = arith.constant 0 : index
    %1 = vector.load %arg2[%c0_1, %c0_2] : memref<216x512xf32, #tpu.memory_space<vmem>>, vector<216x512xf32>
    %cst = arith.constant dense<0.000000e+00> : vector<12x512xf32>
    %2 = tpu.matmul %0, %1, %cst {dimension_numbers = #tpu.dot_dimension_numbers<[1], [0], [0], [1], [0, 0, 1, 1], [], []>} : vector<12x216xf32>, vector<216x512xf32>, vector<12x512xf32> -> vector<12x512xf32>
    %c0_3 = arith.constant 0 : index
    %c0_4 = arith.constant 0 : index
    %3 = vector.load %arg3[%c0_3, %c0_4] : memref<12x1xf32, #tpu.memory_space<vmem>>, vector<12x1xf32>
    %4 = vector.broadcast %3 : vector<12x1xf32> to vector<12x512xf32>
    %5 = arith.addf %2, %4 : vector<12x512xf32>
    %cst_5 = arith.constant 0.000000e+00 : f32
    %6 = vector.broadcast %cst_5 : f32 to vector<12x512xf32>
    %7 = arith.maximumf %5, %6 : vector<12x512xf32>
    %c0_6 = arith.constant 0 : index
    %c0_7 = arith.constant 0 : index
    %8 = vector.load %arg4[%c0_6, %c0_7] : memref<1x12xf32, #tpu.memory_space<vmem>>, vector<1x12xf32>
    %cst_8 = arith.constant dense<0.000000e+00> : vector<1x512xf32>
    %9 = tpu.matmul %8, %7, %cst_8 {dimension_numbers = #tpu.dot_dimension_numbers<[1], [0], [0], [1], [0, 0, 1, 1], [], []>} : vector<1x12xf32>, vector<12x512xf32>, vector<1x512xf32> -> vector<1x512xf32>
    %c0_9 = arith.constant 0 : index
    %c0_10 = arith.constant 0 : index
    %10 = vector.load %arg5[%c0_9, %c0_10] : memref<1x1xf32, #tpu.memory_space<vmem>>, vector<1x1xf32>
    %11 = vector.broadcast %10 : vector<1x1xf32> to vector<1x512xf32>
    %12 = arith.addf %9, %11 : vector<1x512xf32>
    %cst_11 = arith.constant 0.000000e+00 : f32
    %13 = vector.broadcast %cst_11 : f32 to vector<1x512xf32>
    %14 = arith.maximumf %12, %13 : vector<1x512xf32>
    %c0_12 = arith.constant 0 : index
    %c0_13 = arith.constant 0 : index
    %15 = vector.load %arg6[%c0_12, %c0_13] : memref<1x512xf32, #tpu.memory_space<vmem>>, vector<1x512xf32>
    %16 = arith.mulf %14, %15 : vector<1x512xf32>
    %c0_14 = arith.constant 0 : index
    %c0_15 = arith.constant 0 : index
    %17 = vector.load %arg7[%c0_14, %c0_15] : memref<512x2xf32, #tpu.memory_space<vmem>>, vector<512x2xf32>
    %cst_16 = arith.constant dense<0.000000e+00> : vector<1x2xf32>
    %18 = tpu.matmul %16, %17, %cst_16 {dimension_numbers = #tpu.dot_dimension_numbers<[1], [0], [0], [1], [0, 0, 1, 1], [], []>} : vector<1x512xf32>, vector<512x2xf32>, vector<1x2xf32> -> vector<1x2xf32>
    %c0_17 = arith.constant 0 : index
    %c0_18 = arith.constant 0 : index
    %19 = vector.load %arg8[%c0_17, %c0_18] : memref<1x1xf32, #tpu.memory_space<vmem>>, vector<1x1xf32>
    %20 = vector.broadcast %19 : vector<1x1xf32> to vector<1x2xf32>
    %21 = arith.addf %18, %20 : vector<1x2xf32>
    %c0_19 = arith.constant 0 : index
    %c0_20 = arith.constant 0 : index
    %22 = vector.load %arg9[%c0_19, %c0_20] : memref<1x2xf32, #tpu.memory_space<vmem>>, vector<1x2xf32>
    tpu.vector_store %arg9[%c0_19, %c0_20], %21 {strides = array<i32>} : memref<1x2xf32, #tpu.memory_space<vmem>>, vector<1x2xf32>,
    return
  }
  func.func @transform_0(%arg0: i32) -> (i32, i32) {
    %c0_i32 = arith.constant 0 : i32
    %c0_i32_0 = arith.constant 0 : i32
    %c0_i32_1 = arith.constant 0 : i32
    return %c0_i32, %c0_i32_0 : i32, i32
  }
  func.func @transform_1(%arg0: i32) -> (i32, i32) {
    %c0_i32 = arith.constant 0 : i32
    %c0_i32_0 = arith.constant 0 : i32
    %c0_i32_1 = arith.constant 0 : i32
    return %c0_i32, %c0_i32_0 : i32, i32
  }
  func.func @transform_2(%arg0: i32) -> (i32, i32) {
    %c0_i32 = arith.constant 0 : i32
    %c0_i32_0 = arith.constant 0 : i32
    %c0_i32_1 = arith.constant 0 : i32
    return %c0_i32, %c0_i32_0 : i32, i32
  }
  func.func @transform_3(%arg0: i32) -> (i32, i32) {
    %c0_i32 = arith.constant 0 : i32
    %c0_i32_0 = arith.constant 0 : i32
    %c0_i32_1 = arith.constant 0 : i32
    return %c0_i32, %c0_i32_0 : i32, i32
  }
  func.func @transform_4(%arg0: i32) -> (i32, i32) {
    %c0_i32 = arith.constant 0 : i32
    %c0_i32_0 = arith.constant 0 : i32
    %c0_i32_1 = arith.constant 0 : i32
    return %c0_i32, %c0_i32_0 : i32, i32
  }
  func.func @transform_5(%arg0: i32) -> (i32, i32) {
    %c0_i32 = arith.constant 0 : i32
    %c0_i32_0 = arith.constant 0 : i32
    %c0_i32_1 = arith.constant 0 : i32
    return %c0_i32, %c0_i32_0 : i32, i32
  }
  func.func @transform_6(%arg0: i32) -> (i32, i32) {
    %c0_i32 = arith.constant 0 : i32
    %c0_i32_0 = arith.constant 0 : i32
    %c0_i32_1 = arith.constant 0 : i32
    return %c0_i32, %c0_i32_0 : i32, i32
  }
  func.func @transform_7(%arg0: i32) -> (i32, i32) {
    %c0_i32 = arith.constant 0 : i32
    %c0_i32_0 = arith.constant 0 : i32
    %c0_i32_1 = arith.constant 0 : i32
    return %c0_i32, %c0_i32_0 : i32, i32
  }
  func.func @transform_8(%arg0: i32) -> (i32, i32) {
    %c0_i32 = arith.constant 0 : i32
    %c0_i32_0 = arith.constant 0 : i32
    %c0_i32_1 = arith.constant 0 : i32
    return %c0_i32, %c0_i32_0 : i32, i32
  }
}

</mosaic_0001>

<bundles_post_ra>
// kernel: forward.11
= control target key start
LH: loop header
LB: loop body
LE: loop exit
PB: predicated region body
PF: predicated region fallthrough
CT: control target
= control target key end

     0   :  { %vm55_vm0 = vcmask 1043456   ;;  %v253_v3 = vmov 0.0   ;;  %vm48_vm1 = vcmask 293888   ;;  %v254_v24 = vmov 0   ;;  %s375_s1 = inlined_call_operand.vmem [shape: f32[36,512], index: 1, kind: input, shape index: {}]   ;;  %s376_s0 = inlined_call_operand.vmem [shape: f32[12,36], index: 0, kind: input, shape index: {}]   ;;  %s377_s2 = inlined_call_operand.vmem [shape: f32[12,1], index: 2, kind: input, shape index: {}]   ;;  %s378_s3 = inlined_call_operand.vmem [shape: f32[12,512], index: 3, kind: output, shape index: {}]  }
   0x1   :  { %v33_v0 = vld [vmem:[%s375_s1 + $0x88] sm:$0xf]  ;;  %v35_v1 = vld [vmem:[%s375_s1 + $0x98] sm:$0xf]  ;;  %v32_v2 = vld [vmem:[%s375_s1 + $0x80] sm:$0xf]  ;;  %132 = vmatprep.mubr.f32.mxu0 %v253_v3  ;;  %209 = vmatprep.mubr.f32.mxu1 %v253_v3 }
   0x2   :  { %242 = vmatprep.subr.msk.mxu0 %vm55_vm0, %v33_v0  ;;  %246 = vmatprep.subr.msk.mxu1 %vm55_vm0, %v35_v1  ;;  %v34_v4 = vld [vmem:[%s375_s1 + $0x90] sm:$0xf]  ;;  %v29_v5 = vld [vmem:[%s375_s1 + $0x68] sm:$0xff]  ;;  %v31_v6 = vld [vmem:[%s375_s1 + $0x78] sm:$0xff] }
   0x3   :  { %243 = vmatpush1.msk.msra.mxu0 %vm55_vm0, %v32_v2  ;;  %247 = vmatpush1.msk.msra.mxu1 %vm55_vm0, %v34_v4  ;;  %v28_v7 = vld [vmem:[%s375_s1 + $0x60] sm:$0xff]  ;;  %v30_v8 = vld [vmem:[%s375_s1 + $0x70] sm:$0xff]  ;;  %v25_v9 = vld [vmem:[%s375_s1 + $0x48] sm:$0xff] }
   0x4   :  { %92 = vmatprep.subr.mxu0 %v29_v5  ;;  %169 = vmatprep.subr.mxu1 %v31_v6  ;;  %v27_v10 = vld [vmem:[%s375_s1 + $0x58] sm:$0xff]  ;;  %v24_v11 = vld [vmem:[%s375_s1 + $0x40] sm:$0xff]  ;;  %v26_v12 = vld [vmem:[%s375_s1 + $0x50] sm:$0xff] }
   0x5   :  { %93 = vmatpush1.msra.mxu0 %v28_v7  ;;  %170 = vmatpush1.msra.mxu1 %v30_v8  ;;  %v21_v13 = vld [vmem:[%s375_s1 + $0x28] sm:$0xff]  ;;  %v23_v14 = vld [vmem:[%s375_s1 + $0x38] sm:$0xff]  ;;  %v20_v15 = vld [vmem:[%s375_s1 + $0x20] sm:$0xff] }
   0x6   :  { %94 = vmatprep.subr.mxu0 %v25_v9  ;;  %171 = vmatprep.subr.mxu1 %v27_v10  ;;  %v22_v16 = vld [vmem:[%s375_s1 + $0x30] sm:$0xff]  ;;  %v17_v17 = vld [vmem:[%s375_s1 + $0x8] sm:$0xff]  ;;  %v19_v18 = vld [vmem:[%s375_s1 + $0x18] sm:$0xff] }
   0x7   :  { %95 = vmatpush1.msra.mxu0 %v24_v11  ;;  %172 = vmatpush1.msra.mxu1 %v26_v12  ;;  %v16_v19 = vld [vmem:[%s375_s1] sm:$0xff]  ;;  %v18_v20 = vld [vmem:[%s375_s1 + $0x10] sm:$0xff]  ;;  %v15_v23 = vld [vmem:[%s376_s0 + $0x8] sm:$0xf] }
   0x8   :  { %96 = vmatprep.subr.mxu0 %v21_v13  ;;  %173 = vmatprep.subr.mxu1 %v23_v14  ;;  %v14_v21 = vld [vmem:[%s376_s0] sm:$0xff]  ;;  %v37_v25 = vld [vmem:[%s377_s2 + $0x8] sm:$0xf] }
   0x9   :  { %97 = vmatpush1.msra.mxu0 %v20_v15  ;;  %174 = vmatpush1.msra.mxu1 %v22_v16  ;;  %v36_v22 = vld [vmem:[%s377_s2] sm:$0xff] }
   0xa   :  { %98 = vmatprep.subr.mxu0 %v17_v17  ;;  %175 = vmatprep.subr.mxu1 %v19_v18 }
   0xb   :  { %99 = vmatpush1.msra.mxu0 %v16_v19  ;;  %176 = vmatpush1.msra.mxu1 %v18_v20 }
   0xc   :  { %244 = vmatmul.mubr.msk.f32.vlgmr.msra.gmra.mxu0 %vm48_vm1, %v14_v21  ;;  %248 = vmatmul.mubr.msk.f32.vlgmr.msra.gmra.mxu1 %vm48_vm1, %v14_v21 }
   0xd   :  { %138 = vmatprep.mubr.f32.mxu0 %v253_v3  ;;  %215 = vmatprep.mubr.f32.mxu1 %v253_v3 }
   0xe   :  { %252 = vset.pattern.permute.xlu0 %v254_v24 }
   0xf   :  { %40 = vperm.xlu0 %252, %v36_v22  }
  0x10   :  { %245 = vmatmul.mubr.msk.f32.gmra.mxu0 %vm48_vm1, %v15_v23  ;;  %249 = vmatmul.mubr.msk.f32.gmra.mxu1 %vm48_vm1, %v15_v23 }
  0x13   :  { %45 = vperm.xlu0 %252, %v37_v25  }
  0x8a   :  { %v41_v26 = vpop.permute.xlu0 %40 }
  0x8e   :  { %v46_v35 = vpop.permute.xlu0 %45 }
  0xcc   :  { %v134_v27 = vpop.f32.mrf.mxu0  ;;  %v211_v28 = vpop.f32.mrf.mxu1 }
  0xcd   :  { %v135_v29 = vadd.f32 %v134_v27, %v41_v26  ;;  %v212_v30 = vadd.f32 %v211_v28, %v41_v26 }
  0xce   :  { %v136_v31 = vpop.f32.mrf.mxu0  ;;  %v213_v32 = vpop.f32.mrf.mxu1 }
  0xcf   :  { %v222_v33 = vmax.f32 %v135_v29, 0.0  ;;  %v224_v34 = vmax.f32 %v212_v30, 0.0  ;;  %v137_v36 = vadd.f32 %v136_v31, %v41_v26  ;;  %v214_v37 = vadd.f32 %v213_v32, %v41_v26 }
  0xd0   :  { %v140_v38 = vpop.f32.mrf.mxu0  ;;  %v217_v39 = vpop.f32.mrf.mxu1 }
  0xd1   :  { %230 = vst [vmem:[%s378_s3] sm:$0xff] %v222_v33  ;;  %232 = vst [vmem:[%s378_s3 + $0x10] sm:$0xff] %v224_v34  ;;  %v223_v40 = vmax.f32 %v137_v36, 0.0  ;;  %v225_v41 = vmax.f32 %v214_v37, 0.0  ;;  %v141_v42 = vadd.f32 %v140_v38, %v46_v35  ;;  %v218_v43 = vadd.f32 %v217_v39, %v46_v35 }
  0xd2   :  { %v142_v44 = vpop.f32.mrf.mxu0  ;;  %v219_v45 = vpop.f32.mrf.mxu1 }
  0xd3   :  { %231 = vst [vmem:[%s378_s3 + $0x8] sm:$0xff] %v223_v40  ;;  %233 = vst [vmem:[%s378_s3 + $0x18] sm:$0xff] %v225_v41  ;;  %v226_v46 = vmax.f32 %v141_v42, 0.0  ;;  %v228_v47 = vmax.f32 %v218_v43, 0.0  ;;  %v143_v48 = vadd.f32 %v142_v44, %v46_v35  ;;  %v220_v49 = vadd.f32 %v219_v45, %v46_v35 }
  0xd5   :  { %234 = vst [vmem:[%s378_s3 + $0x20] sm:$0xf] %v226_v46  ;;  %236 = vst [vmem:[%s378_s3 + $0x30] sm:$0xf] %v228_v47  ;;  %v227_v50 = vmax.f32 %v143_v48, 0.0  ;;  %v229_v51 = vmax.f32 %v220_v49, 0.0 }
  0xd7   :  { %235 = vst [vmem:[%s378_s3 + $0x28] sm:$0xf] %v227_v50  ;;  %237 = vst [vmem:[%s378_s3 + $0x38] sm:$0xf] %v229_v51 }

// kernel: forward.12
= control target key start
LH: loop header
LB: loop body
LE: loop exit
PB: predicated region body
PF: predicated region fallthrough
CT: control target
= control target key end

     0   :  { %vm59_vm0 = vcmask 1043456   ;;  %v244_v0 = vmov 0.0   ;;  %vm49_vm1 = vcmask 883712   ;;  %vm245_vm2 = vmmov 0   ;;  %s370_s1 = inlined_call_operand.vmem [shape: f32[108,128], index: 1, kind: input, shape index: {}]   ;;  %s371_s0 = inlined_call_operand.vmem [shape: f32[24,108], index: 0, kind: input, shape index: {}]   ;;  %s372_s2 = inlined_call_operand.vmem [shape: f32[24,1], index: 2, kind: input, shape index: {}]   ;;  %s373_s3 = inlined_call_operand.vmem [shape: f32[24,128], index: 3, kind: output, shape index: {}]  }
   0x1   :  { %174 = vmatprep.subr.mxu0 %v244_v0  ;;  %211 = vmatprep.subr.mxu1 %v244_v0  ;;  %v30_v1 = vld [vmem:[%s370_s1 + $0x68] sm:$0xf]  ;;  %v29_v2 = vld [vmem:[%s370_s1 + $0x60] sm:$0xff]  ;;  %v28_v3 = vld [vmem:[%s370_s1 + $0x58] sm:$0xff]  ;;  %v246_v20 = vmov 0  }
   0x2   :  { %175 = vmatpush3.msk.msra.mxu0 %vm59_vm0, %v30_v1  ;;  %225 = vmatpush3.msk.msra.mxu1 %vm59_vm0, %v30_v1  ;;  %v27_v4 = vld [vmem:[%s370_s1 + $0x50] sm:$0xff]  ;;  %v26_v5 = vld [vmem:[%s370_s1 + $0x48] sm:$0xff]  ;;  %v25_v6 = vld [vmem:[%s370_s1 + $0x40] sm:$0xff] }
   0x3   :  { %176 = vmatprep.subr.mxu0 %v244_v0  ;;  %212 = vmatprep.subr.mxu1 %v244_v0  ;;  %v24_v7 = vld [vmem:[%s370_s1 + $0x38] sm:$0xff]  ;;  %v23_v8 = vld [vmem:[%s370_s1 + $0x30] sm:$0xff]  ;;  %v22_v9 = vld [vmem:[%s370_s1 + $0x28] sm:$0xff] }
   0x4   :  { %177 = vmatpush3.msra.mxu0 %v29_v2  ;;  %226 = vmatpush3.msra.mxu1 %v29_v2  ;;  %v21_v10 = vld [vmem:[%s370_s1 + $0x20] sm:$0xff]  ;;  %v20_v11 = vld [vmem:[%s370_s1 + $0x18] sm:$0xff]  ;;  %v19_v12 = vld [vmem:[%s370_s1 + $0x10] sm:$0xff] }
   0x5   :  { %178 = vmatprep.subr.mxu0 %v244_v0  ;;  %213 = vmatprep.subr.mxu1 %v244_v0  ;;  %v18_v13 = vld [vmem:[%s370_s1 + $0x8] sm:$0xff]  ;;  %v17_v14 = vld [vmem:[%s370_s1] sm:$0xff]  ;;  %v33_v18 = vld [vmem:[%s372_s2 + $0x10] sm:$0xff] }
   0x6   :  { %179 = vmatpush3.msra.mxu0 %v28_v3  ;;  %227 = vmatpush3.msra.mxu1 %v28_v3  ;;  %v14_v15 = vld [vmem:[%s371_s0] sm:$0xff]  ;;  %v15_v16 = vld [vmem:[%s371_s0 + $0x8] sm:$0xff]  ;;  %v16_v19 = vld [vmem:[%s371_s0 + $0x10] sm:$0xff] }
   0x7   :  { %180 = vmatprep.subr.mxu0 %v244_v0  ;;  %214 = vmatprep.subr.mxu1 %v244_v0  ;;  %v31_v17 = vld [vmem:[%s372_s2] sm:$0xff]  ;;  %v32_v21 = vld [vmem:[%s372_s2 + $0x8] sm:$0xff] }
   0x8   :  { %181 = vmatpush3.msra.mxu0 %v27_v4  ;;  %228 = vmatpush3.msra.mxu1 %v27_v4 }
   0x9   :  { %182 = vmatprep.subr.mxu0 %v244_v0  ;;  %215 = vmatprep.subr.mxu1 %v244_v0 }
   0xa   :  { %183 = vmatpush3.msra.mxu0 %v26_v5  ;;  %229 = vmatpush3.msra.mxu1 %v26_v5 }
   0xb   :  { %184 = vmatprep.subr.mxu0 %v244_v0  ;;  %216 = vmatprep.subr.mxu1 %v244_v0 }
   0xc   :  { %185 = vmatpush3.msra.mxu0 %v25_v6  ;;  %230 = vmatpush3.msra.mxu1 %v25_v6 }
   0xd   :  { %186 = vmatprep.subr.mxu0 %v244_v0  ;;  %217 = vmatprep.subr.mxu1 %v244_v0 }
   0xe   :  { %187 = vmatpush3.msra.mxu0 %v24_v7  ;;  %231 = vmatpush3.msra.mxu1 %v24_v7 }
   0xf   :  { %188 = vmatprep.subr.mxu0 %v244_v0  ;;  %218 = vmatprep.subr.mxu1 %v244_v0 }
  0x10   :  { %189 = vmatpush3.msra.mxu0 %v23_v8  ;;  %232 = vmatpush3.msra.mxu1 %v23_v8 }
  0x11   :  { %190 = vmatprep.subr.mxu0 %v244_v0  ;;  %219 = vmatprep.subr.mxu1 %v244_v0 }
  0x12   :  { %191 = vmatpush3.msra.mxu0 %v22_v9  ;;  %233 = vmatpush3.msra.mxu1 %v22_v9 }
  0x13   :  { %192 = vmatprep.subr.mxu0 %v244_v0  ;;  %220 = vmatprep.subr.mxu1 %v244_v0 }
  0x14   :  { %193 = vmatpush3.msra.mxu0 %v21_v10  ;;  %234 = vmatpush3.msra.mxu1 %v21_v10 }
  0x15   :  { %194 = vmatprep.subr.mxu0 %v244_v0  ;;  %221 = vmatprep.subr.mxu1 %v244_v0 }
  0x16   :  { %195 = vmatpush3.msra.mxu0 %v20_v11  ;;  %235 = vmatpush3.msra.mxu1 %v20_v11 }
  0x17   :  { %196 = vmatprep.subr.mxu0 %v244_v0  ;;  %222 = vmatprep.subr.mxu1 %v244_v0 }
  0x18   :  { %197 = vmatpush3.msra.mxu0 %v19_v12  ;;  %236 = vmatpush3.msra.mxu1 %v19_v12 }
  0x19   :  { %198 = vmatprep.subr.mxu0 %v244_v0  ;;  %223 = vmatprep.subr.mxu1 %v244_v0 }
  0x1a   :  { %199 = vmatpush3.msra.mxu0 %v18_v13  ;;  %237 = vmatpush3.msra.mxu1 %v18_v13 }
  0x1b   :  { %200 = vmatprep.subr.mxu0 %v244_v0  ;;  %224 = vmatprep.subr.mxu1 %v244_v0 }
  0x1c   :  { %201 = vmatpush3.msra.mxu0 %v17_v14  ;;  %238 = vmatpush3.msra.mxu1 %v17_v14 }
  0x1d   :  { %202 = vmatprep.mubr.msk.f32.mxu0 %vm245_vm2, %v244_v0  ;;  %205 = vmatprep.mubr.msk.f32.mxu1 %vm245_vm2, %v244_v0 }
  0x1e   :  { %203 = vmatmul.mubr.msk.f32.vlgmr.msra.gmra.mxu0 %vm49_vm1, %v14_v15  ;;  %206 = vmatmul.mubr.msk.f32.vlgmr.msra.gmra.mxu1 %vm49_vm1, %v15_v16 }
  0x1f   :  { %208 = vmatprep.mubr.msk.f32.mxu1 %vm245_vm2, %v244_v0  ;;  %242 = vset.pattern.permute.xlu0 %v246_v20 }
  0x20   :  { %36 = vperm.xlu0 %242, %v31_v17   ;;  %243 = vset.pattern.permute.xlu1 %v246_v20 }
  0x21   :  { %46 = vperm.xlu1 %243, %v33_v18  }
  0x22   :  { %209 = vmatmul.mubr.msk.f32.gmra.mxu1 %vm49_vm1, %v16_v19 }
  0x24   :  { %41 = vperm.xlu0 %242, %v32_v21  }
  0x9b   :  { %v37_v22 = vpop.permute.xlu0 %36 }
  0x9c   :  { %v47_v28 = vpop.permute.xlu1 %46 }
  0x9f   :  { %v42_v23 = vpop.permute.xlu0 %41 }
  0xde   :  { %v129_v24 = vpop.f32.mrf.mxu0  ;;  %v134_v25 = vpop.f32.mrf.mxu1 }
  0xdf   :  { %v130_v26 = vadd.f32 %v129_v24, %v37_v22  ;;  %v135_v27 = vadd.f32 %v134_v25, %v42_v23 }
  0xe0   :  { %v207_v29 = vpop.f32.mrf.mxu1  ;;  %v204_v30 = vpop.f32.mrf.mxu0 }
  0xe1   :  { %v143_v31 = vmax.f32 %v130_v26, 0.0  ;;  %v144_v32 = vmax.f32 %v135_v27, 0.0 }
  0xe2   :  { %v139_v33 = vpop.f32.mrf.mxu1 }
  0xe3   :  { %146 = vst [vmem:[%s373_s3] sm:$0xff] %v143_v31  ;;  %147 = vst [vmem:[%s373_s3 + $0x8] sm:$0xff] %v144_v32  ;;  %v140_v34 = vadd.f32 %v139_v33, %v47_v28 }
  0xe4   :  { %v210_v35 = vpop.f32.mrf.mxu1 }
  0xe5   :  { %v145_v36 = vmax.f32 %v140_v34, 0.0 }
  0xe7   :  { %148 = vst [vmem:[%s373_s3 + $0x10] sm:$0xff] %v145_v36 }

// kernel: forward.13
= control target key start
LH: loop header
LB: loop body
LE: loop exit
PB: predicated region body
PF: predicated region fallthrough
CT: control target
= control target key end

     0   :  { %v284_v0 = vmov 0.0   ;;  %vm89_vm0 = vcmask 719872   ;;  %v285_v40 = vmov 0   ;;  %vm209_vm1 = vcmask 261120   ;;  %s525_s1 = inlined_call_operand.vmem [shape: f32[216,32], index: 1, kind: input, shape index: {}]   ;;  %s526_s0 = inlined_call_operand.vmem [shape: f32[48,216], index: 0, kind: input, shape index: {}]   ;;  %s527_s2 = inlined_call_operand.vmem [shape: f32[48,1], index: 2, kind: input, shape index: {}]   ;;  %s528_s3 = inlined_call_operand.vmem [shape: f32[48,32], index: 3, kind: output, shape index: {}]  }
   0x1   :  { %108 = vmatprep.subr.mxu0 %v284_v0  ;;  %226 = vmatprep.subr.mxu1 %v284_v0  ;;  %v41_v1 = vld [vmem:[%s525_s1 + $0x78] sm:$0xff]  ;;  %v40_v2 = vld [vmem:[%s525_s1 + $0x70] sm:$0xff]  ;;  %v39_v3 = vld [vmem:[%s525_s1 + $0x68] sm:$0xff] }
   0x2   :  { %109 = vmatpush1.msra.mxu0 %v41_v1  ;;  %253 = vmatpush1.msra.mxu1 %v41_v1  ;;  %v38_v4 = vld [vmem:[%s525_s1 + $0x60] sm:$0xff]  ;;  %v37_v5 = vld [vmem:[%s525_s1 + $0x58] sm:$0xff]  ;;  %v36_v6 = vld [vmem:[%s525_s1 + $0x50] sm:$0xff] }
   0x3   :  { %110 = vmatprep.subr.mxu0 %v284_v0  ;;  %227 = vmatprep.subr.mxu1 %v284_v0  ;;  %v35_v7 = vld [vmem:[%s525_s1 + $0x48] sm:$0xff]  ;;  %v34_v8 = vld [vmem:[%s525_s1 + $0x40] sm:$0xff]  ;;  %v33_v9 = vld [vmem:[%s525_s1 + $0x38] sm:$0xff] }
   0x4   :  { %111 = vmatpush1.msra.mxu0 %v40_v2  ;;  %254 = vmatpush1.msra.mxu1 %v40_v2  ;;  %v32_v10 = vld [vmem:[%s525_s1 + $0x30] sm:$0xff]  ;;  %v31_v11 = vld [vmem:[%s525_s1 + $0x28] sm:$0xff]  ;;  %v30_v12 = vld [vmem:[%s525_s1 + $0x20] sm:$0xff] }
   0x5   :  { %112 = vmatprep.subr.mxu0 %v284_v0  ;;  %228 = vmatprep.subr.mxu1 %v284_v0  ;;  %v29_v13 = vld [vmem:[%s525_s1 + $0x18] sm:$0xff]  ;;  %v28_v14 = vld [vmem:[%s525_s1 + $0x10] sm:$0xff]  ;;  %v27_v15 = vld [vmem:[%s525_s1 + $0x8] sm:$0xff] }
   0x6   :  { %113 = vmatpush1.msra.mxu0 %v39_v3  ;;  %255 = vmatpush1.msra.mxu1 %v39_v3  ;;  %v26_v16 = vld [vmem:[%s525_s1] sm:$0xff]  ;;  %v52_v17 = vld [vmem:[%s525_s1 + $0xd0] sm:$0xff]  ;;  %v51_v18 = vld [vmem:[%s525_s1 + $0xc8] sm:$0xff] }
   0x7   :  { %114 = vmatprep.subr.mxu0 %v284_v0  ;;  %229 = vmatprep.subr.mxu1 %v284_v0  ;;  %v50_v19 = vld [vmem:[%s525_s1 + $0xc0] sm:$0xff]  ;;  %v49_v20 = vld [vmem:[%s525_s1 + $0xb8] sm:$0xff]  ;;  %v48_v21 = vld [vmem:[%s525_s1 + $0xb0] sm:$0xff] }
   0x8   :  { %115 = vmatpush1.msra.mxu0 %v38_v4  ;;  %256 = vmatpush1.msra.mxu1 %v38_v4  ;;  %v47_v22 = vld [vmem:[%s525_s1 + $0xa8] sm:$0xff]  ;;  %v46_v23 = vld [vmem:[%s525_s1 + $0xa0] sm:$0xff]  ;;  %v45_v24 = vld [vmem:[%s525_s1 + $0x98] sm:$0xff] }
   0x9   :  { %116 = vmatprep.subr.mxu0 %v284_v0  ;;  %230 = vmatprep.subr.mxu1 %v284_v0  ;;  %v44_v25 = vld [vmem:[%s525_s1 + $0x90] sm:$0xff]  ;;  %v43_v26 = vld [vmem:[%s525_s1 + $0x88] sm:$0xff]  ;;  %v42_v27 = vld [vmem:[%s525_s1 + $0x80] sm:$0xff] }
   0xa   :  { %117 = vmatpush1.msra.mxu0 %v37_v5  ;;  %257 = vmatpush1.msra.mxu1 %v37_v5  ;;  %v15_v28 = vld [vmem:[%s526_s0 + $0x8] sm:$0xff]  ;;  %v21_v29 = vld [vmem:[%s526_s0 + $0x38] sm:$0xff]  ;;  %v14_v30 = vld [vmem:[%s526_s0] sm:$0xff] }
   0xb   :  { %118 = vmatprep.subr.mxu0 %v284_v0  ;;  %231 = vmatprep.subr.mxu1 %v284_v0  ;;  %v20_v31 = vld [vmem:[%s526_s0 + $0x30] sm:$0xff]  ;;  %v17_v32 = vld [vmem:[%s526_s0 + $0x18] sm:$0xff]  ;;  %v23_v33 = vld [vmem:[%s526_s0 + $0x48] sm:$0xff] }
   0xc   :  { %119 = vmatpush1.msra.mxu0 %v36_v6  ;;  %258 = vmatpush1.msra.mxu1 %v36_v6  ;;  %v55_v34 = vld [vmem:[%s527_s2 + $0x10] sm:$0xff]  ;;  %v53_v35 = vld [vmem:[%s527_s2] sm:$0xff]  ;;  %v19_v38 = vld [vmem:[%s526_s0 + $0x28] sm:$0xff] }
   0xd   :  { %120 = vmatprep.subr.mxu0 %v284_v0  ;;  %232 = vmatprep.subr.mxu1 %v284_v0  ;;  %v16_v36 = vld [vmem:[%s526_s0 + $0x10] sm:$0xff]  ;;  %v22_v37 = vld [vmem:[%s526_s0 + $0x40] sm:$0xff]  ;;  %v25_v39 = vld [vmem:[%s526_s0 + $0x58] sm:$0xff] }
   0xe   :  { %121 = vmatpush1.msra.mxu0 %v35_v7  ;;  %259 = vmatpush1.msra.mxu1 %v35_v7  ;;  %v56_v41 = vld [vmem:[%s527_s2 + $0x18] sm:$0xff]  ;;  %v54_v42 = vld [vmem:[%s527_s2 + $0x8] sm:$0xff]  ;;  %v18_v43 = vld [vmem:[%s526_s0 + $0x20] sm:$0xff] }
   0xf   :  { %122 = vmatprep.subr.mxu0 %v284_v0  ;;  %233 = vmatprep.subr.mxu1 %v284_v0  ;;  %v24_v44 = vld [vmem:[%s526_s0 + $0x50] sm:$0xff]  ;;  %v58_v45 = vld [vmem:[%s527_s2 + $0x28] sm:$0xff]  ;;  %v57_v46 = vld [vmem:[%s527_s2 + $0x20] sm:$0xff] }
  0x10   :  { %123 = vmatpush1.msra.mxu0 %v34_v8  ;;  %260 = vmatpush1.msra.mxu1 %v34_v8 }
  0x11   :  { %124 = vmatprep.subr.mxu0 %v284_v0  ;;  %234 = vmatprep.subr.mxu1 %v284_v0 }
  0x12   :  { %125 = vmatpush1.msra.mxu0 %v33_v9  ;;  %261 = vmatpush1.msra.mxu1 %v33_v9 }
  0x13   :  { %126 = vmatprep.subr.mxu0 %v284_v0  ;;  %235 = vmatprep.subr.mxu1 %v284_v0 }
  0x14   :  { %127 = vmatpush1.msra.mxu0 %v32_v10  ;;  %262 = vmatpush1.msra.mxu1 %v32_v10 }
  0x15   :  { %128 = vmatprep.subr.mxu0 %v284_v0  ;;  %236 = vmatprep.subr.mxu1 %v284_v0 }
  0x16   :  { %129 = vmatpush1.msra.mxu0 %v31_v11  ;;  %263 = vmatpush1.msra.mxu1 %v31_v11 }
  0x17   :  { %130 = vmatprep.subr.mxu0 %v284_v0  ;;  %237 = vmatprep.subr.mxu1 %v284_v0 }
  0x18   :  { %131 = vmatpush1.msra.mxu0 %v30_v12  ;;  %264 = vmatpush1.msra.mxu1 %v30_v12 }
  0x19   :  { %132 = vmatprep.subr.mxu0 %v284_v0  ;;  %238 = vmatprep.subr.mxu1 %v284_v0 }
  0x1a   :  { %133 = vmatpush1.msra.mxu0 %v29_v13  ;;  %265 = vmatpush1.msra.mxu1 %v29_v13 }
  0x1b   :  { %134 = vmatprep.subr.mxu0 %v284_v0  ;;  %239 = vmatprep.subr.mxu1 %v284_v0 }
  0x1c   :  { %135 = vmatpush1.msra.mxu0 %v28_v14  ;;  %266 = vmatpush1.msra.mxu1 %v28_v14 }
  0x1d   :  { %136 = vmatprep.subr.mxu0 %v284_v0  ;;  %240 = vmatprep.subr.mxu1 %v284_v0 }
  0x1e   :  { %137 = vmatpush1.msra.mxu0 %v27_v15  ;;  %267 = vmatpush1.msra.mxu1 %v27_v15 }
  0x1f   :  { %138 = vmatprep.subr.mxu0 %v284_v0  ;;  %241 = vmatprep.subr.mxu1 %v284_v0 }
  0x20   :  { %139 = vmatpush1.msra.mxu0 %v26_v16  ;;  %268 = vmatpush1.msra.mxu1 %v26_v16 }
  0x21   :  { %150 = vmatprep.subr.mxu0 %v284_v0  ;;  %242 = vmatprep.subr.mxu1 %v284_v0 }
  0x22   :  { %151 = vmatpush2.msra.mxu0 %v52_v17  ;;  %269 = vmatpush2.msra.mxu1 %v52_v17 }
  0x23   :  { %152 = vmatprep.subr.mxu0 %v284_v0  ;;  %243 = vmatprep.subr.mxu1 %v284_v0 }
  0x24   :  { %153 = vmatpush2.msra.mxu0 %v51_v18  ;;  %270 = vmatpush2.msra.mxu1 %v51_v18 }
  0x25   :  { %154 = vmatprep.subr.mxu0 %v284_v0  ;;  %244 = vmatprep.subr.mxu1 %v284_v0 }
  0x26   :  { %155 = vmatpush2.msra.mxu0 %v50_v19  ;;  %271 = vmatpush2.msra.mxu1 %v50_v19 }
  0x27   :  { %156 = vmatprep.subr.mxu0 %v284_v0  ;;  %245 = vmatprep.subr.mxu1 %v284_v0 }
  0x28   :  { %157 = vmatpush2.msra.mxu0 %v49_v20  ;;  %272 = vmatpush2.msra.mxu1 %v49_v20 }
  0x29   :  { %158 = vmatprep.subr.mxu0 %v284_v0  ;;  %246 = vmatprep.subr.mxu1 %v284_v0 }
  0x2a   :  { %159 = vmatpush2.msra.mxu0 %v48_v21  ;;  %273 = vmatpush2.msra.mxu1 %v48_v21 }
  0x2b   :  { %160 = vmatprep.subr.mxu0 %v284_v0  ;;  %247 = vmatprep.subr.mxu1 %v284_v0 }
  0x2c   :  { %161 = vmatpush2.msra.mxu0 %v47_v22  ;;  %274 = vmatpush2.msra.mxu1 %v47_v22 }
  0x2d   :  { %162 = vmatprep.subr.mxu0 %v284_v0  ;;  %248 = vmatprep.subr.mxu1 %v284_v0 }
  0x2e   :  { %163 = vmatpush2.msra.mxu0 %v46_v23  ;;  %275 = vmatpush2.msra.mxu1 %v46_v23 }
  0x2f   :  { %164 = vmatprep.subr.mxu0 %v284_v0  ;;  %249 = vmatprep.subr.mxu1 %v284_v0 }
  0x30   :  { %165 = vmatpush2.msra.mxu0 %v45_v24  ;;  %276 = vmatpush2.msra.mxu1 %v45_v24 }
  0x31   :  { %166 = vmatprep.subr.mxu0 %v284_v0  ;;  %250 = vmatprep.subr.mxu1 %v284_v0 }
  0x32   :  { %167 = vmatpush2.msra.mxu0 %v44_v25  ;;  %277 = vmatpush2.msra.mxu1 %v44_v25 }
  0x33   :  { %168 = vmatprep.subr.mxu0 %v284_v0  ;;  %251 = vmatprep.subr.mxu1 %v284_v0 }
  0x34   :  { %169 = vmatpush2.msra.mxu0 %v43_v26  ;;  %278 = vmatpush2.msra.mxu1 %v43_v26 }
  0x35   :  { %170 = vmatprep.subr.mxu0 %v284_v0  ;;  %252 = vmatprep.subr.mxu1 %v284_v0 }
  0x36   :  { %171 = vmatpush2.msra.mxu0 %v42_v27  ;;  %279 = vmatpush2.msra.mxu1 %v42_v27 }
  0x37   :  { %220 = vmatprep.mubr.msk.f32.mxu0 %vm89_vm0, %v15_v28  ;;  %223 = vmatprep.mubr.msk.f32.mxu1 %vm89_vm0, %v21_v29 }
  0x38   :  { %173 = vmatmul.mubr.f32.vlgmr.msra.gmra.mxu0 %v14_v30  ;;  %188 = vmatmul.mubr.f32.vlgmr.msra.gmra.mxu1 %v20_v31 }
  0x39   :  { %221 = vmatprep.mubr.msk.f32.mxu0 %vm89_vm0, %v17_v32  ;;  %224 = vmatprep.mubr.msk.f32.mxu1 %vm89_vm0, %v23_v33 }
  0x3a   :  { %283 = vset.pattern.permute.xlu1 %v285_v40  ;;  %282 = vset.pattern.permute.xlu0 %v285_v40 }
  0x3b   :  { %71 = vperm.xlu1 %283, %v55_v34   ;;  %61 = vperm.xlu0 %282, %v53_v35  }
  0x3c   :  { %178 = vmatmul.mubr.f32.gmra.mxu0 %v16_v36  ;;  %193 = vmatmul.mubr.f32.gmra.mxu1 %v22_v37 }
  0x3d   :  { %222 = vmatprep.mubr.msk.f32.mxu0 %vm89_vm0, %v19_v38  ;;  %225 = vmatprep.mubr.msk.f32.mxu1 %vm89_vm0, %v25_v39 }
  0x3f   :  { %76 = vperm.xlu1 %283, %v56_v41   ;;  %66 = vperm.xlu0 %282, %v54_v42  }
  0x40   :  { %183 = vmatmul.mubr.f32.gmra.mxu0 %v18_v43  ;;  %198 = vmatmul.mubr.f32.gmra.mxu1 %v24_v44 }
  0x43   :  { %86 = vperm.xlu1 %283, %v58_v45   ;;  %81 = vperm.xlu0 %282, %v57_v46  }
  0xb6   :  { %v62_v47 = vpop.permute.xlu0 %61  ;;  %v72_v48 = vpop.permute.xlu1 %71 }
  0xba   :  { %v67_v49 = vpop.permute.xlu0 %66  ;;  %v77_v50 = vpop.permute.xlu1 %76 }
  0xbe   :  { %v82_v57 = vpop.permute.xlu0 %81  ;;  %v87_v2 = vpop.permute.xlu1 %86 }
  0xf8   :  { %v174_v51 = vpop.f32.mrf.mxu0  ;;  %v189_v52 = vpop.f32.mrf.mxu1 }
  0xf9   :  { %v175_v53 = vadd.f32 %v174_v51, %v62_v47  ;;  %v190_v54 = vadd.f32 %v189_v52, %v77_v50 }
  0xfa   :  { %v176_v55 = vpop.f32.mrf.mxu0  ;;  %v191_v56 = vpop.f32.mrf.mxu1 }
  0xfb   :  { %v203_v58 = vmax.f32 %v175_v53, 0.0  ;;  %v206_v59 = vmax.f32 %v190_v54, 0.0 }
  0xfc   :  { %v179_v60 = vpop.f32.mrf.mxu0  ;;  %v194_v61 = vpop.f32.mrf.mxu1 }
  0xfd   :  { %210 = vst.msk [vmem:[%s528_s3] sm:$0xff] %vm209_vm1, %v203_v58  ;;  %213 = vst.msk [vmem:[%s528_s3 + $0x18] sm:$0xff] %vm209_vm1, %v206_v59  ;;  %v180_v62 = vadd.f32 %v179_v60, %v67_v49  ;;  %v195_v63 = vadd.f32 %v194_v61, %v82_v57 }
  0xfe   :  { %v181_v0 = vpop.f32.mrf.mxu0  ;;  %v196_v1 = vpop.f32.mrf.mxu1 }
  0xff   :  { %v204_v3 = vmax.f32 %v180_v62, 0.0  ;;  %v207_v4 = vmax.f32 %v195_v63, 0.0 }
 0x100   :  { %v184_v5 = vpop.f32.mrf.mxu0  ;;  %v199_v6 = vpop.f32.mrf.mxu1 }
 0x101   :  { %211 = vst.msk [vmem:[%s528_s3 + $0x8] sm:$0xff] %vm209_vm1, %v204_v3  ;;  %214 = vst.msk [vmem:[%s528_s3 + $0x20] sm:$0xff] %vm209_vm1, %v207_v4  ;;  %v185_v7 = vadd.f32 %v184_v5, %v72_v48  ;;  %v200_v8 = vadd.f32 %v199_v6, %v87_v2 }
 0x102   :  { %v186_v9 = vpop.f32.mrf.mxu0  ;;  %v201_v10 = vpop.f32.mrf.mxu1 }
 0x103   :  { %v205_v11 = vmax.f32 %v185_v7, 0.0  ;;  %v208_v12 = vmax.f32 %v200_v8, 0.0 }
 0x105   :  { %212 = vst.msk [vmem:[%s528_s3 + $0x10] sm:$0xff] %vm209_vm1, %v205_v11  ;;  %215 = vst.msk [vmem:[%s528_s3 + $0x28] sm:$0xff] %vm209_vm1, %v208_v12 }

// kernel: forward.15
= control target key start
LH: loop header
LB: loop body
LE: loop exit
PB: predicated region body
PF: predicated region fallthrough
CT: control target
= control target key end

     0   :  { %v423_v0 = vmov 0.0   ;;  %v424_v4 = vmov 0   ;;  %vm131_vm0 = vcmask 392192   ;;  %vm352_vm1 = vcmask 261120   ;;  %s774_s1 = inlined_call_operand.vmem [shape: f32[432,32], index: 1, kind: input, shape index: {}]   ;;  %s775_s0 = inlined_call_operand.vmem [shape: f32[48,432], index: 0, kind: input, shape index: {}]   ;;  %s776_s2 = inlined_call_operand.vmem [shape: f32[48,1], index: 2, kind: input, shape index: {}]   ;;  %s777_s3 = inlined_call_operand.vmem [shape: f32[48,32], index: 3, kind: input, shape index: {}]   ;;  %s778_s4 = inlined_call_operand.vmem [shape: f32[48,32], index: 4, kind: output, shape index: {}]  }
   0x1   :  { %245 = vmatprep.subr.mxu1 %v423_v0  ;;  %v72_v1 = vld [vmem:[%s774_s1 + $0xf8] sm:$0xff]  ;;  %421 = vset.pattern.permute.xlu0 %v424_v4  ;;  %v71_v5 = vld [vmem:[%s774_s1 + $0xf0] sm:$0xff]  ;;  %v70_v8 = vld [vmem:[%s774_s1 + $0xe8] sm:$0xff] }
   0x2   :  { %v88_v2 = vld [vmem:[%s774_s1 + $0x178] sm:$0xff]  ;;  %369 = vmatprep.subr.mxu0 %v72_v1  ;;  %v87_v6 = vld [vmem:[%s774_s1 + $0x170] sm:$0xff]  ;;  %v86_v9 = vld [vmem:[%s774_s1 + $0x168] sm:$0xff]  ;;  %422 = vset.pattern.permute.xlu1 %v424_v4 }
   0x3   :  { %v56_v3 = vld [vmem:[%s774_s1 + $0x78] sm:$0xff]  ;;  %246 = vmatpush1.msra.mxu1 %v88_v2  ;;  %v55_v7 = vld [vmem:[%s774_s1 + $0x70] sm:$0xff]  ;;  %v54_v10 = vld [vmem:[%s774_s1 + $0x68] sm:$0xff] }
   0x4   :  { %370 = vmatpush3.msra.mxu0 %v56_v3  ;;  %247 = vmatprep.subr.mxu1 %v423_v0  ;;  %v69_v11 = vld [vmem:[%s774_s1 + $0xe0] sm:$0xff]  ;;  %v68_v14 = vld [vmem:[%s774_s1 + $0xd8] sm:$0xff]  ;;  %v67_v17 = vld [vmem:[%s774_s1 + $0xd0] sm:$0xff] }
   0x5   :  { %371 = vmatprep.subr.mxu0 %v71_v5  ;;  %248 = vmatpush1.msra.mxu1 %v87_v6  ;;  %v85_v12 = vld [vmem:[%s774_s1 + $0x160] sm:$0xff]  ;;  %v84_v15 = vld [vmem:[%s774_s1 + $0x158] sm:$0xff]  ;;  %v83_v18 = vld [vmem:[%s774_s1 + $0x150] sm:$0xff] }
   0x6   :  { %372 = vmatpush3.msra.mxu0 %v55_v7  ;;  %249 = vmatprep.subr.mxu1 %v423_v0  ;;  %v53_v13 = vld [vmem:[%s774_s1 + $0x60] sm:$0xff]  ;;  %v52_v16 = vld [vmem:[%s774_s1 + $0x58] sm:$0xff]  ;;  %v51_v19 = vld [vmem:[%s774_s1 + $0x50] sm:$0xff] }
   0x7   :  { %373 = vmatprep.subr.mxu0 %v70_v8  ;;  %250 = vmatpush1.msra.mxu1 %v86_v9  ;;  %v66_v20 = vld [vmem:[%s774_s1 + $0xc8] sm:$0xff]  ;;  %v65_v23 = vld [vmem:[%s774_s1 + $0xc0] sm:$0xff]  ;;  %v64_v26 = vld [vmem:[%s774_s1 + $0xb8] sm:$0xff] }
   0x8   :  { %374 = vmatpush3.msra.mxu0 %v54_v10  ;;  %251 = vmatprep.subr.mxu1 %v423_v0  ;;  %v82_v21 = vld [vmem:[%s774_s1 + $0x148] sm:$0xff]  ;;  %v81_v24 = vld [vmem:[%s774_s1 + $0x140] sm:$0xff]  ;;  %v80_v27 = vld [vmem:[%s774_s1 + $0x138] sm:$0xff] }
   0x9   :  { %375 = vmatprep.subr.mxu0 %v69_v11  ;;  %252 = vmatpush1.msra.mxu1 %v85_v12  ;;  %v50_v22 = vld [vmem:[%s774_s1 + $0x48] sm:$0xff]  ;;  %v49_v25 = vld [vmem:[%s774_s1 + $0x40] sm:$0xff]  ;;  %v48_v28 = vld [vmem:[%s774_s1 + $0x38] sm:$0xff] }
   0xa   :  { %376 = vmatpush3.msra.mxu0 %v53_v13  ;;  %253 = vmatprep.subr.mxu1 %v423_v0  ;;  %v63_v29 = vld [vmem:[%s774_s1 + $0xb0] sm:$0xff]  ;;  %v62_v32 = vld [vmem:[%s774_s1 + $0xa8] sm:$0xff]  ;;  %v61_v35 = vld [vmem:[%s774_s1 + $0xa0] sm:$0xff] }
   0xb   :  { %377 = vmatprep.subr.mxu0 %v68_v14  ;;  %254 = vmatpush1.msra.mxu1 %v84_v15  ;;  %v79_v30 = vld [vmem:[%s774_s1 + $0x130] sm:$0xff]  ;;  %v78_v33 = vld [vmem:[%s774_s1 + $0x128] sm:$0xff]  ;;  %v77_v36 = vld [vmem:[%s774_s1 + $0x120] sm:$0xff] }
   0xc   :  { %378 = vmatpush3.msra.mxu0 %v52_v16  ;;  %255 = vmatprep.subr.mxu1 %v423_v0  ;;  %v47_v31 = vld [vmem:[%s774_s1 + $0x30] sm:$0xff]  ;;  %v46_v34 = vld [vmem:[%s774_s1 + $0x28] sm:$0xff]  ;;  %v45_v37 = vld [vmem:[%s774_s1 + $0x20] sm:$0xff] }
   0xd   :  { %379 = vmatprep.subr.mxu0 %v67_v17  ;;  %256 = vmatpush1.msra.mxu1 %v83_v18  ;;  %v60_v38 = vld [vmem:[%s774_s1 + $0x98] sm:$0xff]  ;;  %v59_v41 = vld [vmem:[%s774_s1 + $0x90] sm:$0xff]  ;;  %v58_v44 = vld [vmem:[%s774_s1 + $0x88] sm:$0xff] }
   0xe   :  { %380 = vmatpush3.msra.mxu0 %v51_v19  ;;  %257 = vmatprep.subr.mxu1 %v423_v0  ;;  %v76_v39 = vld [vmem:[%s774_s1 + $0x118] sm:$0xff]  ;;  %v75_v42 = vld [vmem:[%s774_s1 + $0x110] sm:$0xff]  ;;  %v74_v45 = vld [vmem:[%s774_s1 + $0x108] sm:$0xff] }
   0xf   :  { %381 = vmatprep.subr.mxu0 %v66_v20  ;;  %258 = vmatpush1.msra.mxu1 %v82_v21  ;;  %v44_v40 = vld [vmem:[%s774_s1 + $0x18] sm:$0xff]  ;;  %v43_v43 = vld [vmem:[%s774_s1 + $0x10] sm:$0xff]  ;;  %v42_v46 = vld [vmem:[%s774_s1 + $0x8] sm:$0xff] }
  0x10   :  { %382 = vmatpush3.msra.mxu0 %v50_v22  ;;  %259 = vmatprep.subr.mxu1 %v423_v0  ;;  %v57_v47 = vld [vmem:[%s774_s1 + $0x80] sm:$0xff]  ;;  %v18_v50 = vld [vmem:[%s775_s0 + $0x8] sm:$0xff]  ;;  %v20_v54 = vld [vmem:[%s775_s0 + $0x18] sm:$0xff] }
  0x11   :  { %383 = vmatprep.subr.mxu0 %v65_v23  ;;  %260 = vmatpush1.msra.mxu1 %v81_v24  ;;  %v73_v48 = vld [vmem:[%s774_s1 + $0x100] sm:$0xff]  ;;  %v94_v52 = vld [vmem:[%s774_s1 + $0x1a8] sm:$0xff]  ;;  %v92_v58 = vld [vmem:[%s774_s1 + $0x198] sm:$0xff] }
  0x12   :  { %384 = vmatpush3.msra.mxu0 %v49_v25  ;;  %261 = vmatprep.subr.mxu1 %v423_v0  ;;  %v41_v49 = vld [vmem:[%s774_s1] sm:$0xff]  ;;  %v22_v53 = vld [vmem:[%s775_s0 + $0x28] sm:$0xff]  ;;  %v91_v60 = vld [vmem:[%s774_s1 + $0x190] sm:$0xff] }
  0x13   :  { %385 = vmatprep.subr.mxu0 %v64_v26  ;;  %262 = vmatpush1.msra.mxu1 %v80_v27  ;;  %v17_v51 = vld [vmem:[%s775_s0] sm:$0xff]  ;;  %v26_v59 = vld [vmem:[%s775_s0 + $0x48] sm:$0xff]  ;;  %v97_v2 = vld [vmem:[%s776_s2 + $0x10] sm:$0xff] }
  0x14   :  { %386 = vmatpush3.msra.mxu0 %v48_v28  ;;  %263 = vmatprep.subr.mxu1 %v423_v0  ;;  %v93_v55 = vld [vmem:[%s774_s1 + $0x1a0] sm:$0xff]  ;;  %v96_v61 = vld [vmem:[%s776_s2 + $0x8] sm:$0xff]  ;;  %v19_v4 = vld [vmem:[%s775_s0 + $0x10] sm:$0xff] }
  0x15   :  { %387 = vmatprep.subr.mxu0 %v63_v29  ;;  %264 = vmatpush1.msra.mxu1 %v79_v30  ;;  %v95_v56 = vld [vmem:[%s776_s2] sm:$0xff]  ;;  %v90_v63 = vld [vmem:[%s774_s1 + $0x188] sm:$0xff]  ;;  %v24_v7 = vld [vmem:[%s775_s0 + $0x38] sm:$0xff] }
  0x16   :  { %388 = vmatpush3.msra.mxu0 %v47_v31  ;;  %265 = vmatprep.subr.mxu1 %v423_v0  ;;  %v21_v57 = vld [vmem:[%s775_s0 + $0x20] sm:$0xff]  ;;  %v30_v1 = vld [vmem:[%s775_s0 + $0x68] sm:$0xff]  ;;  %v98_v9 = vld [vmem:[%s776_s2 + $0x18] sm:$0xff] }
  0x17   :  { %389 = vmatprep.subr.mxu0 %v62_v32  ;;  %266 = vmatpush1.msra.mxu1 %v78_v33  ;;  %v25_v62 = vld [vmem:[%s775_s0 + $0x40] sm:$0xff]  ;;  %v34_v8 = vld [vmem:[%s775_s0 + $0x88] sm:$0xff]  ;;  %v28_v11 = vld [vmem:[%s775_s0 + $0x58] sm:$0xff] }
  0x18   :  { %390 = vmatpush3.msra.mxu0 %v46_v34  ;;  %267 = vmatprep.subr.mxu1 %v423_v0  ;;  %v89_v3 = vld [vmem:[%s774_s1 + $0x180] sm:$0xff]  ;;  %v38_v12 = vld [vmem:[%s775_s0 + $0xa8] sm:$0xff]  ;;  %v27_v14 = vld [vmem:[%s775_s0 + $0x50] sm:$0xff] }
  0x19   :  { %391 = vmatprep.subr.mxu0 %v61_v35  ;;  %268 = vmatpush1.msra.mxu1 %v77_v36  ;;  %v99_v5 = vld [vmem:[%s776_s2 + $0x20] sm:$0xff]  ;;  %v100_v13 = vld [vmem:[%s776_s2 + $0x28] sm:$0xff]  ;;  %v32_v16 = vld [vmem:[%s775_s0 + $0x78] sm:$0xff] }
  0x1a   :  { %392 = vmatpush3.msra.mxu0 %v45_v37  ;;  %269 = vmatprep.subr.mxu1 %v423_v0  ;;  %v29_v6 = vld [vmem:[%s775_s0 + $0x60] sm:$0xff]  ;;  %v31_v17 = vld [vmem:[%s775_s0 + $0x70] sm:$0xff]  ;;  %v36_v18 = vld [vmem:[%s775_s0 + $0x98] sm:$0xff] }
  0x1b   :  { %393 = vmatprep.subr.mxu0 %v60_v38  ;;  %270 = vmatpush1.msra.mxu1 %v76_v39  ;;  %v33_v10 = vld [vmem:[%s775_s0 + $0x80] sm:$0xff]  ;;  %v35_v19 = vld [vmem:[%s775_s0 + $0x90] sm:$0xff]  ;;  %v40_v20 = vld [vmem:[%s775_s0 + $0xb8] sm:$0xff] }
  0x1c   :  { %394 = vmatpush3.msra.mxu0 %v44_v40  ;;  %271 = vmatprep.subr.mxu1 %v423_v0  ;;  %v37_v15 = vld [vmem:[%s775_s0 + $0xa0] sm:$0xff]  ;;  %v39_v21 = vld [vmem:[%s775_s0 + $0xb0] sm:$0xff] }
  0x1d   :  { %395 = vmatprep.subr.mxu0 %v59_v41  ;;  %272 = vmatpush1.msra.mxu1 %v75_v42  ;;  %v340_v34 = vld [vmem:[%s777_s3] sm:$0xff] }
  0x1e   :  { %396 = vmatpush3.msra.mxu0 %v43_v43  ;;  %273 = vmatprep.subr.mxu1 %v423_v0 }
  0x1f   :  { %397 = vmatprep.subr.mxu0 %v58_v44  ;;  %274 = vmatpush1.msra.mxu1 %v74_v45  ;;  %v341_v44 = vld [vmem:[%s777_s3 + $0x8] sm:$0xff] }
  0x20   :  { %398 = vmatpush3.msra.mxu0 %v42_v46  ;;  %275 = vmatprep.subr.mxu1 %v423_v0 }
  0x21   :  { %399 = vmatprep.subr.mxu0 %v57_v47  ;;  %276 = vmatpush1.msra.mxu1 %v73_v48 }
  0x22   :  { %400 = vmatpush3.msra.mxu0 %v41_v49  ;;  %214 = vmatprep.mubr.f32.mxu0 %v18_v50 }
  0x23   :  { %297 = vmatprep.subr.mxu1 %v423_v0  ;;  %215 = vmatmul.mubr.f32.vlgmr.msra.gmra.mxu0 %v17_v51 }
  0x24   :  { %298 = vmatpush2.msra.mxu1 %v94_v52  ;;  %219 = vmatprep.mubr.f32.mxu0 %v22_v53  ;;  %v342_v53 = vld [vmem:[%s777_s3 + $0x10] sm:$0xff] }
  0x25   :  { %299 = vmatprep.subr.mxu1 %v423_v0  ;;  %363 = vmatprep.mubr.msk.f32.mxu1 %vm131_vm0, %v20_v54 }
  0x26   :  { %300 = vmatpush2.msra.mxu1 %v93_v55  ;;  %103 = vperm.xlu0 %421, %v95_v56  }
  0x27   :  { %301 = vmatprep.subr.mxu1 %v423_v0  ;;  %220 = vmatmul.mubr.f32.gmra.mxu0 %v21_v57 }
  0x28   :  { %302 = vmatpush2.msra.mxu1 %v92_v58  ;;  %224 = vmatprep.mubr.f32.mxu0 %v26_v59 }
  0x29   :  { %303 = vmatprep.subr.mxu1 %v423_v0  ;;  %113 = vperm.xlu1 %422, %v97_v2  }
  0x2a   :  { %304 = vmatpush2.msra.mxu1 %v91_v60  ;;  %108 = vperm.xlu0 %421, %v96_v61  }
  0x2b   :  { %305 = vmatprep.subr.mxu1 %v423_v0  ;;  %225 = vmatmul.mubr.f32.gmra.mxu0 %v25_v62 }
  0x2c   :  { %306 = vmatpush2.msra.mxu1 %v90_v63  ;;  %229 = vmatprep.mubr.f32.mxu0 %v30_v1  ;;  %v343_v1 = vld [vmem:[%s777_s3 + $0x18] sm:$0xff] }
  0x2d   :  { %307 = vmatprep.subr.mxu1 %v423_v0  ;;  %v23_v0 = vld [vmem:[%s775_s0 + $0x30] sm:$0xff]  ;;  %118 = vperm.xlu1 %422, %v98_v9  }
  0x2e   :  { %308 = vmatpush2.msra.mxu1 %v89_v3  ;;  %123 = vperm.xlu0 %421, %v99_v5  }
  0x2f   :  { %310 = vmatmul.mubr.f32.vlgmr.msra.gmra.mxu1 %v19_v4  ;;  %230 = vmatmul.mubr.f32.gmra.mxu0 %v29_v6 }
  0x30   :  { %364 = vmatprep.mubr.msk.f32.mxu1 %vm131_vm0, %v24_v7  ;;  %234 = vmatprep.mubr.f32.mxu0 %v34_v8  ;;  %v344_v8 = vld [vmem:[%s777_s3 + $0x20] sm:$0xff] }
  0x31   :  { %128 = vperm.xlu1 %422, %v100_v13  }
  0x33   :  { %315 = vmatmul.mubr.f32.gmra.mxu1 %v23_v0  ;;  %235 = vmatmul.mubr.f32.gmra.mxu0 %v33_v10 }
  0x34   :  { %365 = vmatprep.mubr.msk.f32.mxu1 %vm131_vm0, %v28_v11  ;;  %239 = vmatprep.mubr.f32.mxu0 %v38_v12 }
  0x37   :  { %320 = vmatmul.mubr.f32.gmra.mxu1 %v27_v14  ;;  %240 = vmatmul.mubr.f32.gmra.mxu0 %v37_v15  ;;  %v345_v14 = vld [vmem:[%s777_s3 + $0x28] sm:$0xff] }
  0x38   :  { %366 = vmatprep.mubr.msk.f32.mxu1 %vm131_vm0, %v32_v16 }
  0x3b   :  { %325 = vmatmul.mubr.f32.gmra.mxu1 %v31_v17 }
  0x3c   :  { %367 = vmatprep.mubr.msk.f32.mxu1 %vm131_vm0, %v36_v18 }
  0x3f   :  { %330 = vmatmul.mubr.f32.gmra.mxu1 %v35_v19 }
  0x40   :  { %368 = vmatprep.mubr.msk.f32.mxu1 %vm131_vm0, %v40_v20 }
  0x43   :  { %335 = vmatmul.mubr.f32.gmra.mxu1 %v39_v21 }
  0xa1   :  { %v104_v25 = vpop.permute.xlu0 %103 }
  0xa4   :  { %v114_v42 = vpop.permute.xlu1 %113 }
  0xa5   :  { %v109_v32 = vpop.permute.xlu0 %108 }
  0xa8   :  { %v119_v56 = vpop.permute.xlu1 %118 }
  0xa9   :  { %v124_v61 = vpop.permute.xlu0 %123 }
  0xac   :  { %v129_v0 = vpop.permute.xlu1 %128 }
  0xe3   :  { %v401_v22 = vpop.f32.mrf.mxu0 }
  0xe5   :  { %v402_v23 = vpop.f32.mrf.mxu0 }
  0xe6   :  { %v403_v27 = vadd.f32 %v402_v23, %v401_v22 }
  0xe7   :  { %v404_v24 = vpop.f32.mrf.mxu0 }
  0xe8   :  { %v217_v31 = vadd.f32 %v403_v27, %v104_v25 }
  0xe9   :  { %v405_v26 = vpop.f32.mrf.mxu0 }
  0xea   :  { %v406_v30 = vadd.f32 %v405_v26, %v404_v24 }
  0xeb   :  { %v407_v28 = vpop.f32.mrf.mxu0 }
  0xec   :  { %v222_v40 = vadd.f32 %v406_v30, %v109_v32 }
  0xed   :  { %v408_v29 = vpop.f32.mrf.mxu0 }
  0xee   :  { %v409_v39 = vadd.f32 %v408_v29, %v407_v28 }
  0xef   :  { %v311_v33 = vpop.f32.mrf.mxu1  ;;  %v410_v35 = vpop.f32.mrf.mxu0 }
  0xf0   :  { %v312_v36 = vadd.f32 %v311_v33, %v217_v31  ;;  %v227_v49 = vadd.f32 %v409_v39, %v114_v42 }
  0xf1   :  { %v313_v37 = vpop.f32.mrf.mxu1  ;;  %v411_v38 = vpop.f32.mrf.mxu0 }
  0xf2   :  { %v346_v41 = vadd.f32 %v340_v34, %v312_v36  ;;  %v412_v50 = vadd.f32 %v411_v38, %v410_v35 }
  0xf3   :  { %v316_v43 = vpop.f32.mrf.mxu1  ;;  %v413_v45 = vpop.f32.mrf.mxu0 }
  0xf4   :  { %353 = vst.msk [vmem:[%s778_s4] sm:$0xff] %vm352_vm1, %v346_v41  ;;  %v317_v46 = vadd.f32 %v316_v43, %v222_v40  ;;  %v232_v58 = vadd.f32 %v412_v50, %v119_v56 }
  0xf5   :  { %v318_v47 = vpop.f32.mrf.mxu1  ;;  %v414_v48 = vpop.f32.mrf.mxu0 }
  0xf6   :  { %v347_v51 = vadd.f32 %v341_v44, %v317_v46  ;;  %v415_v59 = vadd.f32 %v414_v48, %v413_v45 }
  0xf7   :  { %v321_v52 = vpop.f32.mrf.mxu1  ;;  %v416_v54 = vpop.f32.mrf.mxu0 }
  0xf8   :  { %354 = vst.msk [vmem:[%s778_s4 + $0x8] sm:$0xff] %vm352_vm1, %v347_v51  ;;  %v322_v55 = vadd.f32 %v321_v52, %v227_v49  ;;  %v237_v5 = vadd.f32 %v415_v59, %v124_v61 }
  0xf9   :  { %v323_v57 = vpop.f32.mrf.mxu1  ;;  %v417_v62 = vpop.f32.mrf.mxu0 }
  0xfa   :  { %v348_v60 = vadd.f32 %v342_v53, %v322_v55  ;;  %v418_v4 = vadd.f32 %v417_v62, %v416_v54 }
  0xfb   :  { %v326_v63 = vpop.f32.mrf.mxu1 }
  0xfc   :  { %355 = vst.msk [vmem:[%s778_s4 + $0x10] sm:$0xff] %vm352_vm1, %v348_v60  ;;  %v327_v2 = vadd.f32 %v326_v63, %v232_v58  ;;  %v242_v12 = vadd.f32 %v418_v4, %v129_v0 }
  0xfd   :  { %v328_v3 = vpop.f32.mrf.mxu1 }
  0xfe   :  { %v349_v6 = vadd.f32 %v343_v1, %v327_v2 }
  0xff   :  { %v331_v7 = vpop.f32.mrf.mxu1 }
 0x100   :  { %356 = vst.msk [vmem:[%s778_s4 + $0x18] sm:$0xff] %vm352_vm1, %v349_v6  ;;  %v332_v9 = vadd.f32 %v331_v7, %v237_v5 }
 0x101   :  { %v333_v10 = vpop.f32.mrf.mxu1 }
 0x102   :  { %v350_v11 = vadd.f32 %v344_v8, %v332_v9 }
 0x103   :  { %v336_v13 = vpop.f32.mrf.mxu1 }
 0x104   :  { %357 = vst.msk [vmem:[%s778_s4 + $0x20] sm:$0xff] %vm352_vm1, %v350_v11  ;;  %v337_v15 = vadd.f32 %v336_v13, %v242_v12 }
 0x105   :  { %v338_v16 = vpop.f32.mrf.mxu1 }
 0x106   :  { %v351_v17 = vadd.f32 %v345_v14, %v337_v15 }
 0x108   :  { %358 = vst.msk [vmem:[%s778_s4 + $0x28] sm:$0xff] %vm352_vm1, %v351_v17 }

// kernel: forward.14
= control target key start
LH: loop header
LB: loop body
LE: loop exit
PB: predicated region body
PF: predicated region fallthrough
CT: control target
= control target key end

     0   :  { %v414_v0 = vmov 0.0   ;;  %v415_v4 = vmov 0   ;;  %vm128_vm0 = vcmask 392192   ;;  %vm343_vm1 = vcmask 261120   ;;  %s742_s1 = inlined_call_operand.vmem [shape: f32[432,32], index: 1, kind: input, shape index: {}]   ;;  %s743_s0 = inlined_call_operand.vmem [shape: f32[48,432], index: 0, kind: input, shape index: {}]   ;;  %s744_s2 = inlined_call_operand.vmem [shape: f32[48,1], index: 2, kind: input, shape index: {}]   ;;  %s745_s3 = inlined_call_operand.vmem [shape: f32[48,32], index: 3, kind: output, shape index: {}]  }
   0x1   :  { %242 = vmatprep.subr.mxu1 %v414_v0  ;;  %v69_v1 = vld [vmem:[%s742_s1 + $0xf8] sm:$0xff]  ;;  %412 = vset.pattern.permute.xlu0 %v415_v4  ;;  %v68_v5 = vld [vmem:[%s742_s1 + $0xf0] sm:$0xff]  ;;  %v67_v8 = vld [vmem:[%s742_s1 + $0xe8] sm:$0xff] }
   0x2   :  { %v85_v2 = vld [vmem:[%s742_s1 + $0x178] sm:$0xff]  ;;  %360 = vmatprep.subr.mxu0 %v69_v1  ;;  %v84_v6 = vld [vmem:[%s742_s1 + $0x170] sm:$0xff]  ;;  %v83_v9 = vld [vmem:[%s742_s1 + $0x168] sm:$0xff]  ;;  %413 = vset.pattern.permute.xlu1 %v415_v4 }
   0x3   :  { %v53_v3 = vld [vmem:[%s742_s1 + $0x78] sm:$0xff]  ;;  %243 = vmatpush1.msra.mxu1 %v85_v2  ;;  %v52_v7 = vld [vmem:[%s742_s1 + $0x70] sm:$0xff]  ;;  %v51_v10 = vld [vmem:[%s742_s1 + $0x68] sm:$0xff] }
   0x4   :  { %361 = vmatpush3.msra.mxu0 %v53_v3  ;;  %244 = vmatprep.subr.mxu1 %v414_v0  ;;  %v66_v11 = vld [vmem:[%s742_s1 + $0xe0] sm:$0xff]  ;;  %v65_v14 = vld [vmem:[%s742_s1 + $0xd8] sm:$0xff]  ;;  %v64_v17 = vld [vmem:[%s742_s1 + $0xd0] sm:$0xff] }
   0x5   :  { %362 = vmatprep.subr.mxu0 %v68_v5  ;;  %245 = vmatpush1.msra.mxu1 %v84_v6  ;;  %v82_v12 = vld [vmem:[%s742_s1 + $0x160] sm:$0xff]  ;;  %v81_v15 = vld [vmem:[%s742_s1 + $0x158] sm:$0xff]  ;;  %v80_v18 = vld [vmem:[%s742_s1 + $0x150] sm:$0xff] }
   0x6   :  { %363 = vmatpush3.msra.mxu0 %v52_v7  ;;  %246 = vmatprep.subr.mxu1 %v414_v0  ;;  %v50_v13 = vld [vmem:[%s742_s1 + $0x60] sm:$0xff]  ;;  %v49_v16 = vld [vmem:[%s742_s1 + $0x58] sm:$0xff]  ;;  %v48_v19 = vld [vmem:[%s742_s1 + $0x50] sm:$0xff] }
   0x7   :  { %364 = vmatprep.subr.mxu0 %v67_v8  ;;  %247 = vmatpush1.msra.mxu1 %v83_v9  ;;  %v63_v20 = vld [vmem:[%s742_s1 + $0xc8] sm:$0xff]  ;;  %v62_v23 = vld [vmem:[%s742_s1 + $0xc0] sm:$0xff]  ;;  %v61_v26 = vld [vmem:[%s742_s1 + $0xb8] sm:$0xff] }
   0x8   :  { %365 = vmatpush3.msra.mxu0 %v51_v10  ;;  %248 = vmatprep.subr.mxu1 %v414_v0  ;;  %v79_v21 = vld [vmem:[%s742_s1 + $0x148] sm:$0xff]  ;;  %v78_v24 = vld [vmem:[%s742_s1 + $0x140] sm:$0xff]  ;;  %v77_v27 = vld [vmem:[%s742_s1 + $0x138] sm:$0xff] }
   0x9   :  { %366 = vmatprep.subr.mxu0 %v66_v11  ;;  %249 = vmatpush1.msra.mxu1 %v82_v12  ;;  %v47_v22 = vld [vmem:[%s742_s1 + $0x48] sm:$0xff]  ;;  %v46_v25 = vld [vmem:[%s742_s1 + $0x40] sm:$0xff]  ;;  %v45_v28 = vld [vmem:[%s742_s1 + $0x38] sm:$0xff] }
   0xa   :  { %367 = vmatpush3.msra.mxu0 %v50_v13  ;;  %250 = vmatprep.subr.mxu1 %v414_v0  ;;  %v60_v29 = vld [vmem:[%s742_s1 + $0xb0] sm:$0xff]  ;;  %v59_v32 = vld [vmem:[%s742_s1 + $0xa8] sm:$0xff]  ;;  %v58_v35 = vld [vmem:[%s742_s1 + $0xa0] sm:$0xff] }
   0xb   :  { %368 = vmatprep.subr.mxu0 %v65_v14  ;;  %251 = vmatpush1.msra.mxu1 %v81_v15  ;;  %v76_v30 = vld [vmem:[%s742_s1 + $0x130] sm:$0xff]  ;;  %v75_v33 = vld [vmem:[%s742_s1 + $0x128] sm:$0xff]  ;;  %v74_v36 = vld [vmem:[%s742_s1 + $0x120] sm:$0xff] }
   0xc   :  { %369 = vmatpush3.msra.mxu0 %v49_v16  ;;  %252 = vmatprep.subr.mxu1 %v414_v0  ;;  %v44_v31 = vld [vmem:[%s742_s1 + $0x30] sm:$0xff]  ;;  %v43_v34 = vld [vmem:[%s742_s1 + $0x28] sm:$0xff]  ;;  %v42_v37 = vld [vmem:[%s742_s1 + $0x20] sm:$0xff] }
   0xd   :  { %370 = vmatprep.subr.mxu0 %v64_v17  ;;  %253 = vmatpush1.msra.mxu1 %v80_v18  ;;  %v57_v38 = vld [vmem:[%s742_s1 + $0x98] sm:$0xff]  ;;  %v56_v41 = vld [vmem:[%s742_s1 + $0x90] sm:$0xff]  ;;  %v55_v44 = vld [vmem:[%s742_s1 + $0x88] sm:$0xff] }
   0xe   :  { %371 = vmatpush3.msra.mxu0 %v48_v19  ;;  %254 = vmatprep.subr.mxu1 %v414_v0  ;;  %v73_v39 = vld [vmem:[%s742_s1 + $0x118] sm:$0xff]  ;;  %v72_v42 = vld [vmem:[%s742_s1 + $0x110] sm:$0xff]  ;;  %v71_v45 = vld [vmem:[%s742_s1 + $0x108] sm:$0xff] }
   0xf   :  { %372 = vmatprep.subr.mxu0 %v63_v20  ;;  %255 = vmatpush1.msra.mxu1 %v79_v21  ;;  %v41_v40 = vld [vmem:[%s742_s1 + $0x18] sm:$0xff]  ;;  %v40_v43 = vld [vmem:[%s742_s1 + $0x10] sm:$0xff]  ;;  %v39_v46 = vld [vmem:[%s742_s1 + $0x8] sm:$0xff] }
  0x10   :  { %373 = vmatpush3.msra.mxu0 %v47_v22  ;;  %256 = vmatprep.subr.mxu1 %v414_v0  ;;  %v54_v47 = vld [vmem:[%s742_s1 + $0x80] sm:$0xff]  ;;  %v15_v50 = vld [vmem:[%s743_s0 + $0x8] sm:$0xff]  ;;  %v17_v54 = vld [vmem:[%s743_s0 + $0x18] sm:$0xff] }
  0x11   :  { %374 = vmatprep.subr.mxu0 %v62_v23  ;;  %257 = vmatpush1.msra.mxu1 %v78_v24  ;;  %v70_v48 = vld [vmem:[%s742_s1 + $0x100] sm:$0xff]  ;;  %v91_v52 = vld [vmem:[%s742_s1 + $0x1a8] sm:$0xff]  ;;  %v89_v58 = vld [vmem:[%s742_s1 + $0x198] sm:$0xff] }
  0x12   :  { %375 = vmatpush3.msra.mxu0 %v46_v25  ;;  %258 = vmatprep.subr.mxu1 %v414_v0  ;;  %v38_v49 = vld [vmem:[%s742_s1] sm:$0xff]  ;;  %v19_v53 = vld [vmem:[%s743_s0 + $0x28] sm:$0xff]  ;;  %v88_v60 = vld [vmem:[%s742_s1 + $0x190] sm:$0xff] }
  0x13   :  { %376 = vmatprep.subr.mxu0 %v61_v26  ;;  %259 = vmatpush1.msra.mxu1 %v77_v27  ;;  %v14_v51 = vld [vmem:[%s743_s0] sm:$0xff]  ;;  %v23_v59 = vld [vmem:[%s743_s0 + $0x48] sm:$0xff]  ;;  %v94_v2 = vld [vmem:[%s744_s2 + $0x10] sm:$0xff] }
  0x14   :  { %377 = vmatpush3.msra.mxu0 %v45_v28  ;;  %260 = vmatprep.subr.mxu1 %v414_v0  ;;  %v90_v55 = vld [vmem:[%s742_s1 + $0x1a0] sm:$0xff]  ;;  %v93_v61 = vld [vmem:[%s744_s2 + $0x8] sm:$0xff]  ;;  %v16_v4 = vld [vmem:[%s743_s0 + $0x10] sm:$0xff] }
  0x15   :  { %378 = vmatprep.subr.mxu0 %v60_v29  ;;  %261 = vmatpush1.msra.mxu1 %v76_v30  ;;  %v92_v56 = vld [vmem:[%s744_s2] sm:$0xff]  ;;  %v87_v63 = vld [vmem:[%s742_s1 + $0x188] sm:$0xff]  ;;  %v21_v7 = vld [vmem:[%s743_s0 + $0x38] sm:$0xff] }
  0x16   :  { %379 = vmatpush3.msra.mxu0 %v44_v31  ;;  %262 = vmatprep.subr.mxu1 %v414_v0  ;;  %v18_v57 = vld [vmem:[%s743_s0 + $0x20] sm:$0xff]  ;;  %v27_v1 = vld [vmem:[%s743_s0 + $0x68] sm:$0xff]  ;;  %v95_v9 = vld [vmem:[%s744_s2 + $0x18] sm:$0xff] }
  0x17   :  { %380 = vmatprep.subr.mxu0 %v59_v32  ;;  %263 = vmatpush1.msra.mxu1 %v75_v33  ;;  %v22_v62 = vld [vmem:[%s743_s0 + $0x40] sm:$0xff]  ;;  %v31_v8 = vld [vmem:[%s743_s0 + $0x88] sm:$0xff]  ;;  %v25_v11 = vld [vmem:[%s743_s0 + $0x58] sm:$0xff] }
  0x18   :  { %381 = vmatpush3.msra.mxu0 %v43_v34  ;;  %264 = vmatprep.subr.mxu1 %v414_v0  ;;  %v86_v3 = vld [vmem:[%s742_s1 + $0x180] sm:$0xff]  ;;  %v35_v12 = vld [vmem:[%s743_s0 + $0xa8] sm:$0xff]  ;;  %v24_v14 = vld [vmem:[%s743_s0 + $0x50] sm:$0xff] }
  0x19   :  { %382 = vmatprep.subr.mxu0 %v58_v35  ;;  %265 = vmatpush1.msra.mxu1 %v74_v36  ;;  %v96_v5 = vld [vmem:[%s744_s2 + $0x20] sm:$0xff]  ;;  %v97_v13 = vld [vmem:[%s744_s2 + $0x28] sm:$0xff]  ;;  %v29_v16 = vld [vmem:[%s743_s0 + $0x78] sm:$0xff] }
  0x1a   :  { %383 = vmatpush3.msra.mxu0 %v42_v37  ;;  %266 = vmatprep.subr.mxu1 %v414_v0  ;;  %v26_v6 = vld [vmem:[%s743_s0 + $0x60] sm:$0xff]  ;;  %v28_v17 = vld [vmem:[%s743_s0 + $0x70] sm:$0xff]  ;;  %v33_v18 = vld [vmem:[%s743_s0 + $0x98] sm:$0xff] }
  0x1b   :  { %384 = vmatprep.subr.mxu0 %v57_v38  ;;  %267 = vmatpush1.msra.mxu1 %v73_v39  ;;  %v30_v10 = vld [vmem:[%s743_s0 + $0x80] sm:$0xff]  ;;  %v32_v19 = vld [vmem:[%s743_s0 + $0x90] sm:$0xff]  ;;  %v37_v20 = vld [vmem:[%s743_s0 + $0xb8] sm:$0xff] }
  0x1c   :  { %385 = vmatpush3.msra.mxu0 %v41_v40  ;;  %268 = vmatprep.subr.mxu1 %v414_v0  ;;  %v34_v15 = vld [vmem:[%s743_s0 + $0xa0] sm:$0xff]  ;;  %v36_v21 = vld [vmem:[%s743_s0 + $0xb0] sm:$0xff] }
  0x1d   :  { %386 = vmatprep.subr.mxu0 %v56_v41  ;;  %269 = vmatpush1.msra.mxu1 %v72_v42 }
  0x1e   :  { %387 = vmatpush3.msra.mxu0 %v40_v43  ;;  %270 = vmatprep.subr.mxu1 %v414_v0 }
  0x1f   :  { %388 = vmatprep.subr.mxu0 %v55_v44  ;;  %271 = vmatpush1.msra.mxu1 %v71_v45 }
  0x20   :  { %389 = vmatpush3.msra.mxu0 %v39_v46  ;;  %272 = vmatprep.subr.mxu1 %v414_v0 }
  0x21   :  { %390 = vmatprep.subr.mxu0 %v54_v47  ;;  %273 = vmatpush1.msra.mxu1 %v70_v48 }
  0x22   :  { %391 = vmatpush3.msra.mxu0 %v38_v49  ;;  %211 = vmatprep.mubr.f32.mxu0 %v15_v50 }
  0x23   :  { %294 = vmatprep.subr.mxu1 %v414_v0  ;;  %212 = vmatmul.mubr.f32.vlgmr.msra.gmra.mxu0 %v14_v51 }
  0x24   :  { %295 = vmatpush2.msra.mxu1 %v91_v52  ;;  %216 = vmatprep.mubr.f32.mxu0 %v19_v53 }
  0x25   :  { %296 = vmatprep.subr.mxu1 %v414_v0  ;;  %354 = vmatprep.mubr.msk.f32.mxu1 %vm128_vm0, %v17_v54 }
  0x26   :  { %297 = vmatpush2.msra.mxu1 %v90_v55  ;;  %100 = vperm.xlu0 %412, %v92_v56  }
  0x27   :  { %298 = vmatprep.subr.mxu1 %v414_v0  ;;  %217 = vmatmul.mubr.f32.gmra.mxu0 %v18_v57 }
  0x28   :  { %299 = vmatpush2.msra.mxu1 %v89_v58  ;;  %221 = vmatprep.mubr.f32.mxu0 %v23_v59 }
  0x29   :  { %300 = vmatprep.subr.mxu1 %v414_v0  ;;  %110 = vperm.xlu1 %413, %v94_v2  }
  0x2a   :  { %301 = vmatpush2.msra.mxu1 %v88_v60  ;;  %105 = vperm.xlu0 %412, %v93_v61  }
  0x2b   :  { %302 = vmatprep.subr.mxu1 %v414_v0  ;;  %222 = vmatmul.mubr.f32.gmra.mxu0 %v22_v62 }
  0x2c   :  { %303 = vmatpush2.msra.mxu1 %v87_v63  ;;  %226 = vmatprep.mubr.f32.mxu0 %v27_v1 }
  0x2d   :  { %304 = vmatprep.subr.mxu1 %v414_v0  ;;  %v20_v0 = vld [vmem:[%s743_s0 + $0x30] sm:$0xff]  ;;  %115 = vperm.xlu1 %413, %v95_v9  }
  0x2e   :  { %305 = vmatpush2.msra.mxu1 %v86_v3  ;;  %120 = vperm.xlu0 %412, %v96_v5  }
  0x2f   :  { %307 = vmatmul.mubr.f32.vlgmr.msra.gmra.mxu1 %v16_v4  ;;  %227 = vmatmul.mubr.f32.gmra.mxu0 %v26_v6 }
  0x30   :  { %355 = vmatprep.mubr.msk.f32.mxu1 %vm128_vm0, %v21_v7  ;;  %231 = vmatprep.mubr.f32.mxu0 %v31_v8 }
  0x31   :  { %125 = vperm.xlu1 %413, %v97_v13  }
  0x33   :  { %312 = vmatmul.mubr.f32.gmra.mxu1 %v20_v0  ;;  %232 = vmatmul.mubr.f32.gmra.mxu0 %v30_v10 }
  0x34   :  { %356 = vmatprep.mubr.msk.f32.mxu1 %vm128_vm0, %v25_v11  ;;  %236 = vmatprep.mubr.f32.mxu0 %v35_v12 }
  0x37   :  { %317 = vmatmul.mubr.f32.gmra.mxu1 %v24_v14  ;;  %237 = vmatmul.mubr.f32.gmra.mxu0 %v34_v15 }
  0x38   :  { %357 = vmatprep.mubr.msk.f32.mxu1 %vm128_vm0, %v29_v16 }
  0x3b   :  { %322 = vmatmul.mubr.f32.gmra.mxu1 %v28_v17 }
  0x3c   :  { %358 = vmatprep.mubr.msk.f32.mxu1 %vm128_vm0, %v33_v18 }
  0x3f   :  { %327 = vmatmul.mubr.f32.gmra.mxu1 %v32_v19 }
  0x40   :  { %359 = vmatprep.mubr.msk.f32.mxu1 %vm128_vm0, %v37_v20 }
  0x43   :  { %332 = vmatmul.mubr.f32.gmra.mxu1 %v36_v21 }
  0xa1   :  { %v101_v25 = vpop.permute.xlu0 %100 }
  0xa4   :  { %v111_v41 = vpop.permute.xlu1 %110 }
  0xa5   :  { %v106_v32 = vpop.permute.xlu0 %105 }
  0xa8   :  { %v116_v53 = vpop.permute.xlu1 %115 }
  0xa9   :  { %v121_v58 = vpop.permute.xlu0 %120 }
  0xac   :  { %v126_v4 = vpop.permute.xlu1 %125 }
  0xe3   :  { %v392_v22 = vpop.f32.mrf.mxu0 }
  0xe5   :  { %v393_v23 = vpop.f32.mrf.mxu0 }
  0xe6   :  { %v394_v27 = vadd.f32 %v393_v23, %v392_v22 }
  0xe7   :  { %v395_v24 = vpop.f32.mrf.mxu0 }
  0xe8   :  { %v214_v31 = vadd.f32 %v394_v27, %v101_v25 }
  0xe9   :  { %v396_v26 = vpop.f32.mrf.mxu0 }
  0xea   :  { %v397_v30 = vadd.f32 %v396_v26, %v395_v24 }
  0xeb   :  { %v398_v28 = vpop.f32.mrf.mxu0 }
  0xec   :  { %v219_v39 = vadd.f32 %v397_v30, %v106_v32 }
  0xed   :  { %v399_v29 = vpop.f32.mrf.mxu0 }
  0xee   :  { %v400_v38 = vadd.f32 %v399_v29, %v398_v28 }
  0xef   :  { %v308_v33 = vpop.f32.mrf.mxu1  ;;  %v401_v34 = vpop.f32.mrf.mxu0 }
  0xf0   :  { %v309_v35 = vadd.f32 %v308_v33, %v214_v31  ;;  %v224_v47 = vadd.f32 %v400_v38, %v111_v41 }
  0xf1   :  { %v310_v36 = vpop.f32.mrf.mxu1  ;;  %v402_v37 = vpop.f32.mrf.mxu0 }
  0xf2   :  { %v337_v40 = vmax.f32 %v309_v35, 0.0  ;;  %v403_v48 = vadd.f32 %v402_v37, %v401_v34 }
  0xf3   :  { %v313_v42 = vpop.f32.mrf.mxu1  ;;  %v404_v43 = vpop.f32.mrf.mxu0 }
  0xf4   :  { %344 = vst.msk [vmem:[%s745_s3] sm:$0xff] %vm343_vm1, %v337_v40  ;;  %v314_v44 = vadd.f32 %v313_v42, %v219_v39  ;;  %v229_v55 = vadd.f32 %v403_v48, %v116_v53 }
  0xf5   :  { %v315_v45 = vpop.f32.mrf.mxu1  ;;  %v405_v46 = vpop.f32.mrf.mxu0 }
  0xf6   :  { %v338_v49 = vmax.f32 %v314_v44, 0.0  ;;  %v406_v56 = vadd.f32 %v405_v46, %v404_v43 }
  0xf7   :  { %v318_v50 = vpop.f32.mrf.mxu1  ;;  %v407_v51 = vpop.f32.mrf.mxu0 }
  0xf8   :  { %345 = vst.msk [vmem:[%s745_s3 + $0x8] sm:$0xff] %vm343_vm1, %v338_v49  ;;  %v319_v52 = vadd.f32 %v318_v50, %v224_v47  ;;  %v234_v63 = vadd.f32 %v406_v56, %v121_v58 }
  0xf9   :  { %v320_v54 = vpop.f32.mrf.mxu1  ;;  %v408_v59 = vpop.f32.mrf.mxu0 }
  0xfa   :  { %v339_v57 = vmax.f32 %v319_v52, 0.0  ;;  %v409_v1 = vadd.f32 %v408_v59, %v407_v51 }
  0xfb   :  { %v323_v60 = vpop.f32.mrf.mxu1 }
  0xfc   :  { %346 = vst.msk [vmem:[%s745_s3 + $0x10] sm:$0xff] %vm343_vm1, %v339_v57  ;;  %v324_v61 = vadd.f32 %v323_v60, %v229_v55  ;;  %v239_v8 = vadd.f32 %v409_v1, %v126_v4 }
  0xfd   :  { %v325_v62 = vpop.f32.mrf.mxu1 }
  0xfe   :  { %v340_v2 = vmax.f32 %v324_v61, 0.0 }
  0xff   :  { %v328_v3 = vpop.f32.mrf.mxu1 }
 0x100   :  { %347 = vst.msk [vmem:[%s745_s3 + $0x18] sm:$0xff] %vm343_vm1, %v340_v2  ;;  %v329_v5 = vadd.f32 %v328_v3, %v234_v63 }
 0x101   :  { %v330_v6 = vpop.f32.mrf.mxu1 }
 0x102   :  { %v341_v7 = vmax.f32 %v329_v5, 0.0 }
 0x103   :  { %v333_v9 = vpop.f32.mrf.mxu1 }
 0x104   :  { %348 = vst.msk [vmem:[%s745_s3 + $0x20] sm:$0xff] %vm343_vm1, %v341_v7  ;;  %v334_v0 = vadd.f32 %v333_v9, %v239_v8 }
 0x105   :  { %v335_v10 = vpop.f32.mrf.mxu1 }
 0x106   :  { %v342_v11 = vmax.f32 %v334_v0, 0.0 }
 0x108   :  { %349 = vst.msk [vmem:[%s745_s3 + $0x28] sm:$0xff] %vm343_vm1, %v342_v11 }

// kernel: forward.18
= control target key start
LH: loop header
LB: loop body
LE: loop exit
PB: predicated region body
PF: predicated region fallthrough
CT: control target
= control target key end

     0   :  { %v323_v0 = vmov 0.0   ;;  %v324_v4 = vmov 0   ;;  %vm98_vm0 = vcmask 392192   ;;  %s588_s1 = inlined_call_operand.vmem [shape: f32[432,128], index: 1, kind: input, shape index: {}]   ;;  %s589_s0 = inlined_call_operand.vmem [shape: f32[24,432], index: 0, kind: input, shape index: {}]   ;;  %s590_s2 = inlined_call_operand.vmem [shape: f32[24,1], index: 2, kind: input, shape index: {}]   ;;  %s591_s3 = inlined_call_operand.vmem [shape: f32[24,128], index: 3, kind: output, shape index: {}]  }
   0x1   :  { %188 = vmatprep.subr.mxu1 %v323_v0  ;;  %v73_v1 = vld [vmem:[%s588_s1 + $0x178] sm:$0xff]  ;;  %v72_v2 = vld [vmem:[%s588_s1 + $0x170] sm:$0xff]  ;;  %321 = vset.pattern.permute.xlu0 %v324_v4  ;;  %v71_v7 = vld [vmem:[%s588_s1 + $0x168] sm:$0xff] }
   0x2   :  { %v57_v3 = vld [vmem:[%s588_s1 + $0xf8] sm:$0xff]  ;;  %189 = vmatpush1.msra.mxu1 %v73_v1  ;;  %v56_v6 = vld [vmem:[%s588_s1 + $0xf0] sm:$0xff]  ;;  %v55_v9 = vld [vmem:[%s588_s1 + $0xe8] sm:$0xff]  ;;  %322 = vset.pattern.permute.xlu1 %v324_v4 }
   0x3   :  { %278 = vmatprep.subr.mxu0 %v57_v3  ;;  %v41_v5 = vld [vmem:[%s588_s1 + $0x78] sm:$0xff]  ;;  %190 = vmatprep.subr.mxu1 %v323_v0  ;;  %v40_v8 = vld [vmem:[%s588_s1 + $0x70] sm:$0xff]  ;;  %v39_v10 = vld [vmem:[%s588_s1 + $0x68] sm:$0xff] }
   0x4   :  { %279 = vmatpush3.msra.mxu0 %v41_v5  ;;  %191 = vmatpush1.msra.mxu1 %v72_v2  ;;  %v70_v11 = vld [vmem:[%s588_s1 + $0x160] sm:$0xff]  ;;  %v69_v14 = vld [vmem:[%s588_s1 + $0x158] sm:$0xff]  ;;  %v68_v17 = vld [vmem:[%s588_s1 + $0x150] sm:$0xff] }
   0x5   :  { %280 = vmatprep.subr.mxu0 %v56_v6  ;;  %192 = vmatprep.subr.mxu1 %v323_v0  ;;  %v54_v12 = vld [vmem:[%s588_s1 + $0xe0] sm:$0xff]  ;;  %v53_v15 = vld [vmem:[%s588_s1 + $0xd8] sm:$0xff]  ;;  %v52_v18 = vld [vmem:[%s588_s1 + $0xd0] sm:$0xff] }
   0x6   :  { %281 = vmatpush3.msra.mxu0 %v40_v8  ;;  %193 = vmatpush1.msra.mxu1 %v71_v7  ;;  %v38_v13 = vld [vmem:[%s588_s1 + $0x60] sm:$0xff]  ;;  %v37_v16 = vld [vmem:[%s588_s1 + $0x58] sm:$0xff]  ;;  %v36_v19 = vld [vmem:[%s588_s1 + $0x50] sm:$0xff] }
   0x7   :  { %282 = vmatprep.subr.mxu0 %v55_v9  ;;  %194 = vmatprep.subr.mxu1 %v323_v0  ;;  %v67_v20 = vld [vmem:[%s588_s1 + $0x148] sm:$0xff]  ;;  %v66_v23 = vld [vmem:[%s588_s1 + $0x140] sm:$0xff]  ;;  %v65_v26 = vld [vmem:[%s588_s1 + $0x138] sm:$0xff] }
   0x8   :  { %283 = vmatpush3.msra.mxu0 %v39_v10  ;;  %195 = vmatpush1.msra.mxu1 %v70_v11  ;;  %v51_v21 = vld [vmem:[%s588_s1 + $0xc8] sm:$0xff]  ;;  %v50_v24 = vld [vmem:[%s588_s1 + $0xc0] sm:$0xff]  ;;  %v49_v27 = vld [vmem:[%s588_s1 + $0xb8] sm:$0xff] }
   0x9   :  { %284 = vmatprep.subr.mxu0 %v54_v12  ;;  %196 = vmatprep.subr.mxu1 %v323_v0  ;;  %v35_v22 = vld [vmem:[%s588_s1 + $0x48] sm:$0xff]  ;;  %v34_v25 = vld [vmem:[%s588_s1 + $0x40] sm:$0xff]  ;;  %v33_v28 = vld [vmem:[%s588_s1 + $0x38] sm:$0xff] }
   0xa   :  { %285 = vmatpush3.msra.mxu0 %v38_v13  ;;  %197 = vmatpush1.msra.mxu1 %v69_v14  ;;  %v64_v29 = vld [vmem:[%s588_s1 + $0x130] sm:$0xff]  ;;  %v63_v32 = vld [vmem:[%s588_s1 + $0x128] sm:$0xff]  ;;  %v62_v35 = vld [vmem:[%s588_s1 + $0x120] sm:$0xff] }
   0xb   :  { %286 = vmatprep.subr.mxu0 %v53_v15  ;;  %198 = vmatprep.subr.mxu1 %v323_v0  ;;  %v48_v30 = vld [vmem:[%s588_s1 + $0xb0] sm:$0xff]  ;;  %v47_v33 = vld [vmem:[%s588_s1 + $0xa8] sm:$0xff]  ;;  %v46_v36 = vld [vmem:[%s588_s1 + $0xa0] sm:$0xff] }
   0xc   :  { %287 = vmatpush3.msra.mxu0 %v37_v16  ;;  %199 = vmatpush1.msra.mxu1 %v68_v17  ;;  %v32_v31 = vld [vmem:[%s588_s1 + $0x30] sm:$0xff]  ;;  %v31_v34 = vld [vmem:[%s588_s1 + $0x28] sm:$0xff]  ;;  %v30_v37 = vld [vmem:[%s588_s1 + $0x20] sm:$0xff] }
   0xd   :  { %288 = vmatprep.subr.mxu0 %v52_v18  ;;  %200 = vmatprep.subr.mxu1 %v323_v0  ;;  %v61_v38 = vld [vmem:[%s588_s1 + $0x118] sm:$0xff]  ;;  %v60_v41 = vld [vmem:[%s588_s1 + $0x110] sm:$0xff]  ;;  %v59_v44 = vld [vmem:[%s588_s1 + $0x108] sm:$0xff] }
   0xe   :  { %289 = vmatpush3.msra.mxu0 %v36_v19  ;;  %201 = vmatpush1.msra.mxu1 %v67_v20  ;;  %v45_v39 = vld [vmem:[%s588_s1 + $0x98] sm:$0xff]  ;;  %v44_v42 = vld [vmem:[%s588_s1 + $0x90] sm:$0xff]  ;;  %v43_v45 = vld [vmem:[%s588_s1 + $0x88] sm:$0xff] }
   0xf   :  { %290 = vmatprep.subr.mxu0 %v51_v21  ;;  %202 = vmatprep.subr.mxu1 %v323_v0  ;;  %v29_v40 = vld [vmem:[%s588_s1 + $0x18] sm:$0xff]  ;;  %v28_v43 = vld [vmem:[%s588_s1 + $0x10] sm:$0xff]  ;;  %v27_v46 = vld [vmem:[%s588_s1 + $0x8] sm:$0xff] }
  0x10   :  { %291 = vmatpush3.msra.mxu0 %v35_v22  ;;  %203 = vmatpush1.msra.mxu1 %v66_v23  ;;  %v58_v47 = vld [vmem:[%s588_s1 + $0x100] sm:$0xff]  ;;  %v79_v50 = vld [vmem:[%s588_s1 + $0x1a8] sm:$0xff]  ;;  %v17_v55 = vld [vmem:[%s589_s0 + $0x18] sm:$0xff] }
  0x11   :  { %292 = vmatprep.subr.mxu0 %v50_v24  ;;  %204 = vmatprep.subr.mxu1 %v323_v0  ;;  %v42_v48 = vld [vmem:[%s588_s1 + $0x80] sm:$0xff]  ;;  %v15_v51 = vld [vmem:[%s589_s0 + $0x8] sm:$0xff]  ;;  %v77_v56 = vld [vmem:[%s588_s1 + $0x198] sm:$0xff] }
  0x12   :  { %293 = vmatpush3.msra.mxu0 %v34_v25  ;;  %205 = vmatpush1.msra.mxu1 %v65_v26  ;;  %v26_v49 = vld [vmem:[%s588_s1] sm:$0xff]  ;;  %v19_v54 = vld [vmem:[%s589_s0 + $0x28] sm:$0xff]  ;;  %v76_v59 = vld [vmem:[%s588_s1 + $0x190] sm:$0xff] }
  0x13   :  { %294 = vmatprep.subr.mxu0 %v49_v27  ;;  %206 = vmatprep.subr.mxu1 %v323_v0  ;;  %v14_v52 = vld [vmem:[%s589_s0] sm:$0xff]  ;;  %v23_v60 = vld [vmem:[%s589_s0 + $0x48] sm:$0xff]  ;;  %v82_v2 = vld [vmem:[%s590_s2 + $0x10] sm:$0xff] }
  0x14   :  { %295 = vmatpush3.msra.mxu0 %v33_v28  ;;  %207 = vmatpush1.msra.mxu1 %v64_v29  ;;  %v78_v53 = vld [vmem:[%s588_s1 + $0x1a0] sm:$0xff]  ;;  %v75_v61 = vld [vmem:[%s588_s1 + $0x188] sm:$0xff]  ;;  %v16_v3 = vld [vmem:[%s589_s0 + $0x10] sm:$0xff] }
  0x15   :  { %296 = vmatprep.subr.mxu0 %v48_v30  ;;  %208 = vmatprep.subr.mxu1 %v323_v0  ;;  %v80_v57 = vld [vmem:[%s590_s2] sm:$0xff]  ;;  %v81_v62 = vld [vmem:[%s590_s2 + $0x8] sm:$0xff]  ;;  %v21_v5 = vld [vmem:[%s589_s0 + $0x38] sm:$0xff] }
  0x16   :  { %297 = vmatpush3.msra.mxu0 %v32_v31  ;;  %209 = vmatpush1.msra.mxu1 %v63_v32  ;;  %v18_v58 = vld [vmem:[%s589_s0 + $0x20] sm:$0xff]  ;;  %v20_v4 = vld [vmem:[%s589_s0 + $0x30] sm:$0xff]  ;;  %v25_v6 = vld [vmem:[%s589_s0 + $0x58] sm:$0xff] }
  0x17   :  { %298 = vmatprep.subr.mxu0 %v47_v33  ;;  %210 = vmatprep.subr.mxu1 %v323_v0  ;;  %v22_v63 = vld [vmem:[%s589_s0 + $0x40] sm:$0xff] }
  0x18   :  { %299 = vmatpush3.msra.mxu0 %v31_v34  ;;  %211 = vmatpush1.msra.mxu1 %v62_v35  ;;  %v74_v1 = vld [vmem:[%s588_s1 + $0x180] sm:$0xff] }
  0x19   :  { %300 = vmatprep.subr.mxu0 %v46_v36  ;;  %212 = vmatprep.subr.mxu1 %v323_v0 }
  0x1a   :  { %301 = vmatpush3.msra.mxu0 %v30_v37  ;;  %213 = vmatpush1.msra.mxu1 %v61_v38 }
  0x1b   :  { %302 = vmatprep.subr.mxu0 %v45_v39  ;;  %214 = vmatprep.subr.mxu1 %v323_v0 }
  0x1c   :  { %303 = vmatpush3.msra.mxu0 %v29_v40  ;;  %215 = vmatpush1.msra.mxu1 %v60_v41 }
  0x1d   :  { %304 = vmatprep.subr.mxu0 %v44_v42  ;;  %216 = vmatprep.subr.mxu1 %v323_v0 }
  0x1e   :  { %305 = vmatpush3.msra.mxu0 %v28_v43  ;;  %217 = vmatpush1.msra.mxu1 %v59_v44 }
  0x1f   :  { %306 = vmatprep.subr.mxu0 %v43_v45  ;;  %218 = vmatprep.subr.mxu1 %v323_v0 }
  0x20   :  { %307 = vmatpush3.msra.mxu0 %v27_v46  ;;  %219 = vmatpush1.msra.mxu1 %v58_v47 }
  0x21   :  { %308 = vmatprep.subr.mxu0 %v42_v48  ;;  %240 = vmatprep.subr.mxu1 %v323_v0 }
  0x22   :  { %309 = vmatpush3.msra.mxu0 %v26_v49  ;;  %241 = vmatpush2.msra.mxu1 %v79_v50 }
  0x23   :  { %172 = vmatprep.mubr.f32.mxu0 %v15_v51  ;;  %242 = vmatprep.subr.mxu1 %v323_v0 }
  0x24   :  { %173 = vmatmul.mubr.f32.vlgmr.msra.gmra.mxu0 %v14_v52  ;;  %243 = vmatpush2.msra.mxu1 %v78_v53 }
  0x25   :  { %177 = vmatprep.mubr.f32.mxu0 %v19_v54  ;;  %244 = vmatprep.subr.mxu1 %v323_v0 }
  0x26   :  { %275 = vmatprep.mubr.msk.f32.mxu1 %vm98_vm0, %v17_v55  ;;  %245 = vmatpush2.msra.mxu1 %v77_v56 }
  0x27   :  { %85 = vperm.xlu0 %321, %v80_v57   ;;  %246 = vmatprep.subr.mxu1 %v323_v0 }
  0x28   :  { %178 = vmatmul.mubr.f32.gmra.mxu0 %v18_v58  ;;  %247 = vmatpush2.msra.mxu1 %v76_v59 }
  0x29   :  { %182 = vmatprep.mubr.f32.mxu0 %v23_v60  ;;  %248 = vmatprep.subr.mxu1 %v323_v0 }
  0x2a   :  { %249 = vmatpush2.msra.mxu1 %v75_v61  ;;  %95 = vperm.xlu1 %322, %v82_v2  }
  0x2b   :  { %90 = vperm.xlu0 %321, %v81_v62   ;;  %250 = vmatprep.subr.mxu1 %v323_v0  ;;  %v24_v0 = vld [vmem:[%s589_s0 + $0x50] sm:$0xff] }
  0x2c   :  { %183 = vmatmul.mubr.f32.gmra.mxu0 %v22_v63  ;;  %251 = vmatpush2.msra.mxu1 %v74_v1 }
  0x2d   :  { %253 = vmatmul.mubr.f32.vlgmr.msra.gmra.mxu1 %v16_v3 }
  0x2e   :  { %276 = vmatprep.mubr.msk.f32.mxu1 %vm98_vm0, %v21_v5 }
  0x31   :  { %258 = vmatmul.mubr.f32.gmra.mxu1 %v20_v4 }
  0x32   :  { %277 = vmatprep.mubr.msk.f32.mxu1 %vm98_vm0, %v25_v6 }
  0x35   :  { %263 = vmatmul.mubr.f32.gmra.mxu1 %v24_v0 }
  0xa2   :  { %v86_v9 = vpop.permute.xlu0 %85 }
  0xa5   :  { %v96_v23 = vpop.permute.xlu1 %95 }
  0xa6   :  { %v91_v16 = vpop.permute.xlu0 %90 }
  0xe4   :  { %v310_v7 = vpop.f32.mrf.mxu0 }
  0xe6   :  { %v311_v8 = vpop.f32.mrf.mxu0 }
  0xe7   :  { %v312_v11 = vadd.f32 %v311_v8, %v310_v7 }
  0xe8   :  { %v313_v10 = vpop.f32.mrf.mxu0 }
  0xe9   :  { %v175_v14 = vadd.f32 %v312_v11, %v86_v9 }
  0xea   :  { %v314_v12 = vpop.f32.mrf.mxu0 }
  0xeb   :  { %v315_v15 = vadd.f32 %v314_v12, %v313_v10 }
  0xec   :  { %v316_v13 = vpop.f32.mrf.mxu0 }
  0xed   :  { %v254_v17 = vpop.f32.mrf.mxu1  ;;  %v180_v21 = vadd.f32 %v315_v15, %v91_v16 }
  0xee   :  { %v317_v18 = vpop.f32.mrf.mxu0  ;;  %v255_v19 = vadd.f32 %v254_v17, %v175_v14 }
  0xef   :  { %v256_v20 = vpop.f32.mrf.mxu1  ;;  %v318_v22 = vadd.f32 %v317_v18, %v316_v13 }
  0xf0   :  { %268 = vst [vmem:[%s591_s3] sm:$0xff] %v255_v19 }
  0xf1   :  { %v259_v24 = vpop.f32.mrf.mxu1  ;;  %v185_v27 = vadd.f32 %v318_v22, %v96_v23 }
  0xf2   :  { %v260_v25 = vadd.f32 %v259_v24, %v180_v21 }
  0xf3   :  { %v261_v26 = vpop.f32.mrf.mxu1 }
  0xf4   :  { %269 = vst [vmem:[%s591_s3 + $0x8] sm:$0xff] %v260_v25 }
  0xf5   :  { %v264_v28 = vpop.f32.mrf.mxu1 }
  0xf6   :  { %v265_v29 = vadd.f32 %v264_v28, %v185_v27 }
  0xf7   :  { %v266_v30 = vpop.f32.mrf.mxu1 }
  0xf8   :  { %270 = vst [vmem:[%s591_s3 + $0x10] sm:$0xff] %v265_v29 }

// kernel: forward.19
= control target key start
LH: loop header
LB: loop body
LE: loop exit
PB: predicated region body
PF: predicated region fallthrough
CT: control target
= control target key end

     0   :  { %v326_v0 = vmov 0.0   ;;  %v327_v4 = vmov 0   ;;  %vm98_vm0 = vcmask 392192   ;;  %s591_s1 = inlined_call_operand.vmem [shape: f32[432,128], index: 1, kind: input, shape index: {}]   ;;  %s592_s0 = inlined_call_operand.vmem [shape: f32[24,432], index: 0, kind: input, shape index: {}]   ;;  %s593_s2 = inlined_call_operand.vmem [shape: f32[24,1], index: 2, kind: input, shape index: {}]   ;;  %s594_s3 = inlined_call_operand.vmem [shape: f32[24,128], index: 3, kind: output, shape index: {}]  }
   0x1   :  { %188 = vmatprep.subr.mxu1 %v326_v0  ;;  %v73_v1 = vld [vmem:[%s591_s1 + $0x178] sm:$0xff]  ;;  %v72_v2 = vld [vmem:[%s591_s1 + $0x170] sm:$0xff]  ;;  %324 = vset.pattern.permute.xlu0 %v327_v4  ;;  %v71_v7 = vld [vmem:[%s591_s1 + $0x168] sm:$0xff] }
   0x2   :  { %v57_v3 = vld [vmem:[%s591_s1 + $0xf8] sm:$0xff]  ;;  %189 = vmatpush1.msra.mxu1 %v73_v1  ;;  %v56_v6 = vld [vmem:[%s591_s1 + $0xf0] sm:$0xff]  ;;  %v55_v9 = vld [vmem:[%s591_s1 + $0xe8] sm:$0xff]  ;;  %325 = vset.pattern.permute.xlu1 %v327_v4 }
   0x3   :  { %281 = vmatprep.subr.mxu0 %v57_v3  ;;  %v41_v5 = vld [vmem:[%s591_s1 + $0x78] sm:$0xff]  ;;  %190 = vmatprep.subr.mxu1 %v326_v0  ;;  %v40_v8 = vld [vmem:[%s591_s1 + $0x70] sm:$0xff]  ;;  %v39_v10 = vld [vmem:[%s591_s1 + $0x68] sm:$0xff] }
   0x4   :  { %282 = vmatpush3.msra.mxu0 %v41_v5  ;;  %191 = vmatpush1.msra.mxu1 %v72_v2  ;;  %v70_v11 = vld [vmem:[%s591_s1 + $0x160] sm:$0xff]  ;;  %v69_v14 = vld [vmem:[%s591_s1 + $0x158] sm:$0xff]  ;;  %v68_v17 = vld [vmem:[%s591_s1 + $0x150] sm:$0xff] }
   0x5   :  { %283 = vmatprep.subr.mxu0 %v56_v6  ;;  %192 = vmatprep.subr.mxu1 %v326_v0  ;;  %v54_v12 = vld [vmem:[%s591_s1 + $0xe0] sm:$0xff]  ;;  %v53_v15 = vld [vmem:[%s591_s1 + $0xd8] sm:$0xff]  ;;  %v52_v18 = vld [vmem:[%s591_s1 + $0xd0] sm:$0xff] }
   0x6   :  { %284 = vmatpush3.msra.mxu0 %v40_v8  ;;  %193 = vmatpush1.msra.mxu1 %v71_v7  ;;  %v38_v13 = vld [vmem:[%s591_s1 + $0x60] sm:$0xff]  ;;  %v37_v16 = vld [vmem:[%s591_s1 + $0x58] sm:$0xff]  ;;  %v36_v19 = vld [vmem:[%s591_s1 + $0x50] sm:$0xff] }
   0x7   :  { %285 = vmatprep.subr.mxu0 %v55_v9  ;;  %194 = vmatprep.subr.mxu1 %v326_v0  ;;  %v67_v20 = vld [vmem:[%s591_s1 + $0x148] sm:$0xff]  ;;  %v66_v23 = vld [vmem:[%s591_s1 + $0x140] sm:$0xff]  ;;  %v65_v26 = vld [vmem:[%s591_s1 + $0x138] sm:$0xff] }
   0x8   :  { %286 = vmatpush3.msra.mxu0 %v39_v10  ;;  %195 = vmatpush1.msra.mxu1 %v70_v11  ;;  %v51_v21 = vld [vmem:[%s591_s1 + $0xc8] sm:$0xff]  ;;  %v50_v24 = vld [vmem:[%s591_s1 + $0xc0] sm:$0xff]  ;;  %v49_v27 = vld [vmem:[%s591_s1 + $0xb8] sm:$0xff] }
   0x9   :  { %287 = vmatprep.subr.mxu0 %v54_v12  ;;  %196 = vmatprep.subr.mxu1 %v326_v0  ;;  %v35_v22 = vld [vmem:[%s591_s1 + $0x48] sm:$0xff]  ;;  %v34_v25 = vld [vmem:[%s591_s1 + $0x40] sm:$0xff]  ;;  %v33_v28 = vld [vmem:[%s591_s1 + $0x38] sm:$0xff] }
   0xa   :  { %288 = vmatpush3.msra.mxu0 %v38_v13  ;;  %197 = vmatpush1.msra.mxu1 %v69_v14  ;;  %v64_v29 = vld [vmem:[%s591_s1 + $0x130] sm:$0xff]  ;;  %v63_v32 = vld [vmem:[%s591_s1 + $0x128] sm:$0xff]  ;;  %v62_v35 = vld [vmem:[%s591_s1 + $0x120] sm:$0xff] }
   0xb   :  { %289 = vmatprep.subr.mxu0 %v53_v15  ;;  %198 = vmatprep.subr.mxu1 %v326_v0  ;;  %v48_v30 = vld [vmem:[%s591_s1 + $0xb0] sm:$0xff]  ;;  %v47_v33 = vld [vmem:[%s591_s1 + $0xa8] sm:$0xff]  ;;  %v46_v36 = vld [vmem:[%s591_s1 + $0xa0] sm:$0xff] }
   0xc   :  { %290 = vmatpush3.msra.mxu0 %v37_v16  ;;  %199 = vmatpush1.msra.mxu1 %v68_v17  ;;  %v32_v31 = vld [vmem:[%s591_s1 + $0x30] sm:$0xff]  ;;  %v31_v34 = vld [vmem:[%s591_s1 + $0x28] sm:$0xff]  ;;  %v30_v37 = vld [vmem:[%s591_s1 + $0x20] sm:$0xff] }
   0xd   :  { %291 = vmatprep.subr.mxu0 %v52_v18  ;;  %200 = vmatprep.subr.mxu1 %v326_v0  ;;  %v61_v38 = vld [vmem:[%s591_s1 + $0x118] sm:$0xff]  ;;  %v60_v41 = vld [vmem:[%s591_s1 + $0x110] sm:$0xff]  ;;  %v59_v44 = vld [vmem:[%s591_s1 + $0x108] sm:$0xff] }
   0xe   :  { %292 = vmatpush3.msra.mxu0 %v36_v19  ;;  %201 = vmatpush1.msra.mxu1 %v67_v20  ;;  %v45_v39 = vld [vmem:[%s591_s1 + $0x98] sm:$0xff]  ;;  %v44_v42 = vld [vmem:[%s591_s1 + $0x90] sm:$0xff]  ;;  %v43_v45 = vld [vmem:[%s591_s1 + $0x88] sm:$0xff] }
   0xf   :  { %293 = vmatprep.subr.mxu0 %v51_v21  ;;  %202 = vmatprep.subr.mxu1 %v326_v0  ;;  %v29_v40 = vld [vmem:[%s591_s1 + $0x18] sm:$0xff]  ;;  %v28_v43 = vld [vmem:[%s591_s1 + $0x10] sm:$0xff]  ;;  %v27_v46 = vld [vmem:[%s591_s1 + $0x8] sm:$0xff] }
  0x10   :  { %294 = vmatpush3.msra.mxu0 %v35_v22  ;;  %203 = vmatpush1.msra.mxu1 %v66_v23  ;;  %v58_v47 = vld [vmem:[%s591_s1 + $0x100] sm:$0xff]  ;;  %v79_v50 = vld [vmem:[%s591_s1 + $0x1a8] sm:$0xff]  ;;  %v17_v55 = vld [vmem:[%s592_s0 + $0x18] sm:$0xff] }
  0x11   :  { %295 = vmatprep.subr.mxu0 %v50_v24  ;;  %204 = vmatprep.subr.mxu1 %v326_v0  ;;  %v42_v48 = vld [vmem:[%s591_s1 + $0x80] sm:$0xff]  ;;  %v15_v51 = vld [vmem:[%s592_s0 + $0x8] sm:$0xff]  ;;  %v77_v56 = vld [vmem:[%s591_s1 + $0x198] sm:$0xff] }
  0x12   :  { %296 = vmatpush3.msra.mxu0 %v34_v25  ;;  %205 = vmatpush1.msra.mxu1 %v65_v26  ;;  %v26_v49 = vld [vmem:[%s591_s1] sm:$0xff]  ;;  %v19_v54 = vld [vmem:[%s592_s0 + $0x28] sm:$0xff]  ;;  %v76_v59 = vld [vmem:[%s591_s1 + $0x190] sm:$0xff] }
  0x13   :  { %297 = vmatprep.subr.mxu0 %v49_v27  ;;  %206 = vmatprep.subr.mxu1 %v326_v0  ;;  %v14_v52 = vld [vmem:[%s592_s0] sm:$0xff]  ;;  %v23_v60 = vld [vmem:[%s592_s0 + $0x48] sm:$0xff]  ;;  %v82_v2 = vld [vmem:[%s593_s2 + $0x10] sm:$0xff] }
  0x14   :  { %298 = vmatpush3.msra.mxu0 %v33_v28  ;;  %207 = vmatpush1.msra.mxu1 %v64_v29  ;;  %v78_v53 = vld [vmem:[%s591_s1 + $0x1a0] sm:$0xff]  ;;  %v75_v61 = vld [vmem:[%s591_s1 + $0x188] sm:$0xff]  ;;  %v16_v3 = vld [vmem:[%s592_s0 + $0x10] sm:$0xff] }
  0x15   :  { %299 = vmatprep.subr.mxu0 %v48_v30  ;;  %208 = vmatprep.subr.mxu1 %v326_v0  ;;  %v80_v57 = vld [vmem:[%s593_s2] sm:$0xff]  ;;  %v81_v62 = vld [vmem:[%s593_s2 + $0x8] sm:$0xff]  ;;  %v21_v5 = vld [vmem:[%s592_s0 + $0x38] sm:$0xff] }
  0x16   :  { %300 = vmatpush3.msra.mxu0 %v32_v31  ;;  %209 = vmatpush1.msra.mxu1 %v63_v32  ;;  %v18_v58 = vld [vmem:[%s592_s0 + $0x20] sm:$0xff]  ;;  %v20_v4 = vld [vmem:[%s592_s0 + $0x30] sm:$0xff]  ;;  %v25_v6 = vld [vmem:[%s592_s0 + $0x58] sm:$0xff] }
  0x17   :  { %301 = vmatprep.subr.mxu0 %v47_v33  ;;  %210 = vmatprep.subr.mxu1 %v326_v0  ;;  %v22_v63 = vld [vmem:[%s592_s0 + $0x40] sm:$0xff] }
  0x18   :  { %302 = vmatpush3.msra.mxu0 %v31_v34  ;;  %211 = vmatpush1.msra.mxu1 %v62_v35  ;;  %v74_v1 = vld [vmem:[%s591_s1 + $0x180] sm:$0xff] }
  0x19   :  { %303 = vmatprep.subr.mxu0 %v46_v36  ;;  %212 = vmatprep.subr.mxu1 %v326_v0 }
  0x1a   :  { %304 = vmatpush3.msra.mxu0 %v30_v37  ;;  %213 = vmatpush1.msra.mxu1 %v61_v38 }
  0x1b   :  { %305 = vmatprep.subr.mxu0 %v45_v39  ;;  %214 = vmatprep.subr.mxu1 %v326_v0 }
  0x1c   :  { %306 = vmatpush3.msra.mxu0 %v29_v40  ;;  %215 = vmatpush1.msra.mxu1 %v60_v41 }
  0x1d   :  { %307 = vmatprep.subr.mxu0 %v44_v42  ;;  %216 = vmatprep.subr.mxu1 %v326_v0 }
  0x1e   :  { %308 = vmatpush3.msra.mxu0 %v28_v43  ;;  %217 = vmatpush1.msra.mxu1 %v59_v44 }
  0x1f   :  { %309 = vmatprep.subr.mxu0 %v43_v45  ;;  %218 = vmatprep.subr.mxu1 %v326_v0 }
  0x20   :  { %310 = vmatpush3.msra.mxu0 %v27_v46  ;;  %219 = vmatpush1.msra.mxu1 %v58_v47 }
  0x21   :  { %311 = vmatprep.subr.mxu0 %v42_v48  ;;  %240 = vmatprep.subr.mxu1 %v326_v0 }
  0x22   :  { %312 = vmatpush3.msra.mxu0 %v26_v49  ;;  %241 = vmatpush2.msra.mxu1 %v79_v50 }
  0x23   :  { %172 = vmatprep.mubr.f32.mxu0 %v15_v51  ;;  %242 = vmatprep.subr.mxu1 %v326_v0 }
  0x24   :  { %173 = vmatmul.mubr.f32.vlgmr.msra.gmra.mxu0 %v14_v52  ;;  %243 = vmatpush2.msra.mxu1 %v78_v53 }
  0x25   :  { %177 = vmatprep.mubr.f32.mxu0 %v19_v54  ;;  %244 = vmatprep.subr.mxu1 %v326_v0 }
  0x26   :  { %278 = vmatprep.mubr.msk.f32.mxu1 %vm98_vm0, %v17_v55  ;;  %245 = vmatpush2.msra.mxu1 %v77_v56 }
  0x27   :  { %85 = vperm.xlu0 %324, %v80_v57   ;;  %246 = vmatprep.subr.mxu1 %v326_v0 }
  0x28   :  { %178 = vmatmul.mubr.f32.gmra.mxu0 %v18_v58  ;;  %247 = vmatpush2.msra.mxu1 %v76_v59 }
  0x29   :  { %182 = vmatprep.mubr.f32.mxu0 %v23_v60  ;;  %248 = vmatprep.subr.mxu1 %v326_v0 }
  0x2a   :  { %249 = vmatpush2.msra.mxu1 %v75_v61  ;;  %95 = vperm.xlu1 %325, %v82_v2  }
  0x2b   :  { %90 = vperm.xlu0 %324, %v81_v62   ;;  %250 = vmatprep.subr.mxu1 %v326_v0  ;;  %v24_v0 = vld [vmem:[%s592_s0 + $0x50] sm:$0xff] }
  0x2c   :  { %183 = vmatmul.mubr.f32.gmra.mxu0 %v22_v63  ;;  %251 = vmatpush2.msra.mxu1 %v74_v1 }
  0x2d   :  { %253 = vmatmul.mubr.f32.vlgmr.msra.gmra.mxu1 %v16_v3 }
  0x2e   :  { %279 = vmatprep.mubr.msk.f32.mxu1 %vm98_vm0, %v21_v5 }
  0x31   :  { %258 = vmatmul.mubr.f32.gmra.mxu1 %v20_v4 }
  0x32   :  { %280 = vmatprep.mubr.msk.f32.mxu1 %vm98_vm0, %v25_v6 }
  0x35   :  { %263 = vmatmul.mubr.f32.gmra.mxu1 %v24_v0 }
  0xa2   :  { %v86_v9 = vpop.permute.xlu0 %85 }
  0xa5   :  { %v96_v24 = vpop.permute.xlu1 %95 }
  0xa6   :  { %v91_v16 = vpop.permute.xlu0 %90 }
  0xe4   :  { %v313_v7 = vpop.f32.mrf.mxu0 }
  0xe6   :  { %v314_v8 = vpop.f32.mrf.mxu0 }
  0xe7   :  { %v315_v11 = vadd.f32 %v314_v8, %v313_v7 }
  0xe8   :  { %v316_v10 = vpop.f32.mrf.mxu0 }
  0xe9   :  { %v175_v14 = vadd.f32 %v315_v11, %v86_v9 }
  0xea   :  { %v317_v12 = vpop.f32.mrf.mxu0 }
  0xeb   :  { %v318_v15 = vadd.f32 %v317_v12, %v316_v10 }
  0xec   :  { %v319_v13 = vpop.f32.mrf.mxu0 }
  0xed   :  { %v254_v17 = vpop.f32.mrf.mxu1  ;;  %v180_v21 = vadd.f32 %v318_v15, %v91_v16 }
  0xee   :  { %v320_v18 = vpop.f32.mrf.mxu0  ;;  %v255_v19 = vadd.f32 %v254_v17, %v175_v14 }
  0xef   :  { %v256_v20 = vpop.f32.mrf.mxu1  ;;  %v321_v23 = vadd.f32 %v320_v18, %v319_v13 }
  0xf0   :  { %v268_v22 = vmax.f32 %v255_v19, 0.0 }
  0xf1   :  { %v259_v25 = vpop.f32.mrf.mxu1  ;;  %v185_v28 = vadd.f32 %v321_v23, %v96_v24 }
  0xf2   :  { %271 = vst [vmem:[%s594_s3] sm:$0xff] %v268_v22  ;;  %v260_v26 = vadd.f32 %v259_v25, %v180_v21 }
  0xf3   :  { %v261_v27 = vpop.f32.mrf.mxu1 }
  0xf4   :  { %v269_v29 = vmax.f32 %v260_v26, 0.0 }
  0xf5   :  { %v264_v30 = vpop.f32.mrf.mxu1 }
  0xf6   :  { %272 = vst [vmem:[%s594_s3 + $0x8] sm:$0xff] %v269_v29  ;;  %v265_v31 = vadd.f32 %v264_v30, %v185_v28 }
  0xf7   :  { %v266_v32 = vpop.f32.mrf.mxu1 }
  0xf8   :  { %v270_v33 = vmax.f32 %v265_v31, 0.0 }
  0xfa   :  { %273 = vst [vmem:[%s594_s3 + $0x10] sm:$0xff] %v270_v33 }

// kernel: forward.20
= control target key start
LH: loop header
LB: loop body
LE: loop exit
PB: predicated region body
PF: predicated region fallthrough
CT: control target
= control target key end

     0   :  { %v317_v3 = vmov 0   ;;  %vm138_vm0 = vcmask 719872   ;;  %s708_s1 = inlined_call_operand.vmem [shape: f32[216,512], index: 1, kind: input, shape index: {}]   ;;  %s709_s0 = inlined_call_operand.vmem [shape: f32[12,216], index: 0, kind: input, shape index: {}]   ;;  %s710_s2 = inlined_call_operand.vmem [shape: f32[12,1], index: 2, kind: input, shape index: {}]   ;;  %s711_s3 = inlined_call_operand.vmem [shape: f32[12,512], index: 3, kind: output, shape index: {}]  }
   0x1   :  { %v79_v0 = vld [vmem:[%s708_s1 + $0x1e8] sm:$0xff]  ;;  %v81_v1 = vld [vmem:[%s708_s1 + $0x1f8] sm:$0xff]  ;;  %v78_v2 = vld [vmem:[%s708_s1 + $0x1e0] sm:$0xff]  ;;  %316 = vset.pattern.permute.xlu0 %v317_v3 }
   0x2   :  { %145 = vmatprep.subr.mxu0 %v79_v0  ;;  %222 = vmatprep.subr.mxu1 %v81_v1  ;;  %v80_v4 = vld [vmem:[%s708_s1 + $0x1f0] sm:$0xff]  ;;  %v75_v5 = vld [vmem:[%s708_s1 + $0x1c8] sm:$0xff]  ;;  %v77_v6 = vld [vmem:[%s708_s1 + $0x1d8] sm:$0xff] }
   0x3   :  { %146 = vmatpush1.msra.mxu0 %v78_v2  ;;  %223 = vmatpush1.msra.mxu1 %v80_v4  ;;  %v74_v7 = vld [vmem:[%s708_s1 + $0x1c0] sm:$0xff]  ;;  %v76_v8 = vld [vmem:[%s708_s1 + $0x1d0] sm:$0xff]  ;;  %v71_v9 = vld [vmem:[%s708_s1 + $0x1a8] sm:$0xff] }
   0x4   :  { %147 = vmatprep.subr.mxu0 %v75_v5  ;;  %224 = vmatprep.subr.mxu1 %v77_v6  ;;  %v73_v10 = vld [vmem:[%s708_s1 + $0x1b8] sm:$0xff]  ;;  %v70_v11 = vld [vmem:[%s708_s1 + $0x1a0] sm:$0xff]  ;;  %v72_v12 = vld [vmem:[%s708_s1 + $0x1b0] sm:$0xff] }
   0x5   :  { %148 = vmatpush1.msra.mxu0 %v74_v7  ;;  %225 = vmatpush1.msra.mxu1 %v76_v8  ;;  %v67_v13 = vld [vmem:[%s708_s1 + $0x188] sm:$0xff]  ;;  %v69_v14 = vld [vmem:[%s708_s1 + $0x198] sm:$0xff]  ;;  %v66_v15 = vld [vmem:[%s708_s1 + $0x180] sm:$0xff] }
   0x6   :  { %149 = vmatprep.subr.mxu0 %v71_v9  ;;  %226 = vmatprep.subr.mxu1 %v73_v10  ;;  %v68_v16 = vld [vmem:[%s708_s1 + $0x190] sm:$0xff]  ;;  %v63_v17 = vld [vmem:[%s708_s1 + $0x168] sm:$0xff]  ;;  %v65_v18 = vld [vmem:[%s708_s1 + $0x178] sm:$0xff] }
   0x7   :  { %150 = vmatpush1.msra.mxu0 %v70_v11  ;;  %227 = vmatpush1.msra.mxu1 %v72_v12  ;;  %v62_v19 = vld [vmem:[%s708_s1 + $0x160] sm:$0xff]  ;;  %v64_v20 = vld [vmem:[%s708_s1 + $0x170] sm:$0xff]  ;;  %v59_v21 = vld [vmem:[%s708_s1 + $0x148] sm:$0xff] }
   0x8   :  { %151 = vmatprep.subr.mxu0 %v67_v13  ;;  %228 = vmatprep.subr.mxu1 %v69_v14  ;;  %v61_v22 = vld [vmem:[%s708_s1 + $0x158] sm:$0xff]  ;;  %v58_v23 = vld [vmem:[%s708_s1 + $0x140] sm:$0xff]  ;;  %v60_v24 = vld [vmem:[%s708_s1 + $0x150] sm:$0xff] }
   0x9   :  { %152 = vmatpush1.msra.mxu0 %v66_v15  ;;  %229 = vmatpush1.msra.mxu1 %v68_v16  ;;  %v55_v25 = vld [vmem:[%s708_s1 + $0x128] sm:$0xff]  ;;  %v57_v26 = vld [vmem:[%s708_s1 + $0x138] sm:$0xff]  ;;  %v54_v27 = vld [vmem:[%s708_s1 + $0x120] sm:$0xff] }
   0xa   :  { %153 = vmatprep.subr.mxu0 %v63_v17  ;;  %230 = vmatprep.subr.mxu1 %v65_v18  ;;  %v56_v28 = vld [vmem:[%s708_s1 + $0x130] sm:$0xff]  ;;  %v51_v29 = vld [vmem:[%s708_s1 + $0x108] sm:$0xff]  ;;  %v53_v30 = vld [vmem:[%s708_s1 + $0x118] sm:$0xff] }
   0xb   :  { %154 = vmatpush1.msra.mxu0 %v62_v19  ;;  %231 = vmatpush1.msra.mxu1 %v64_v20  ;;  %v50_v31 = vld [vmem:[%s708_s1 + $0x100] sm:$0xff]  ;;  %v52_v32 = vld [vmem:[%s708_s1 + $0x110] sm:$0xff]  ;;  %v47_v33 = vld [vmem:[%s708_s1 + $0xe8] sm:$0xff] }
   0xc   :  { %155 = vmatprep.subr.mxu0 %v59_v21  ;;  %232 = vmatprep.subr.mxu1 %v61_v22  ;;  %v49_v34 = vld [vmem:[%s708_s1 + $0xf8] sm:$0xff]  ;;  %v46_v35 = vld [vmem:[%s708_s1 + $0xe0] sm:$0xff]  ;;  %v48_v36 = vld [vmem:[%s708_s1 + $0xf0] sm:$0xff] }
   0xd   :  { %156 = vmatpush1.msra.mxu0 %v58_v23  ;;  %233 = vmatpush1.msra.mxu1 %v60_v24  ;;  %v43_v37 = vld [vmem:[%s708_s1 + $0xc8] sm:$0xff]  ;;  %v45_v38 = vld [vmem:[%s708_s1 + $0xd8] sm:$0xff]  ;;  %v42_v39 = vld [vmem:[%s708_s1 + $0xc0] sm:$0xff] }
   0xe   :  { %157 = vmatprep.subr.mxu0 %v55_v25  ;;  %234 = vmatprep.subr.mxu1 %v57_v26  ;;  %v44_v40 = vld [vmem:[%s708_s1 + $0xd0] sm:$0xff]  ;;  %v39_v41 = vld [vmem:[%s708_s1 + $0xa8] sm:$0xff]  ;;  %v41_v42 = vld [vmem:[%s708_s1 + $0xb8] sm:$0xff] }
   0xf   :  { %158 = vmatpush1.msra.mxu0 %v54_v27  ;;  %235 = vmatpush1.msra.mxu1 %v56_v28  ;;  %v38_v43 = vld [vmem:[%s708_s1 + $0xa0] sm:$0xff]  ;;  %v40_v44 = vld [vmem:[%s708_s1 + $0xb0] sm:$0xff]  ;;  %v35_v45 = vld [vmem:[%s708_s1 + $0x88] sm:$0xff] }
  0x10   :  { %159 = vmatprep.subr.mxu0 %v51_v29  ;;  %236 = vmatprep.subr.mxu1 %v53_v30  ;;  %v37_v46 = vld [vmem:[%s708_s1 + $0x98] sm:$0xff]  ;;  %v34_v47 = vld [vmem:[%s708_s1 + $0x80] sm:$0xff]  ;;  %v36_v48 = vld [vmem:[%s708_s1 + $0x90] sm:$0xff] }
  0x11   :  { %160 = vmatpush1.msra.mxu0 %v50_v31  ;;  %237 = vmatpush1.msra.mxu1 %v52_v32  ;;  %v31_v49 = vld [vmem:[%s708_s1 + $0x68] sm:$0xff]  ;;  %v33_v50 = vld [vmem:[%s708_s1 + $0x78] sm:$0xff]  ;;  %v30_v51 = vld [vmem:[%s708_s1 + $0x60] sm:$0xff] }
  0x12   :  { %161 = vmatprep.subr.mxu0 %v47_v33  ;;  %238 = vmatprep.subr.mxu1 %v49_v34  ;;  %v32_v52 = vld [vmem:[%s708_s1 + $0x70] sm:$0xff]  ;;  %v27_v53 = vld [vmem:[%s708_s1 + $0x48] sm:$0xff]  ;;  %v29_v54 = vld [vmem:[%s708_s1 + $0x58] sm:$0xff] }
  0x13   :  { %162 = vmatpush1.msra.mxu0 %v46_v35  ;;  %239 = vmatpush1.msra.mxu1 %v48_v36  ;;  %v26_v55 = vld [vmem:[%s708_s1 + $0x40] sm:$0xff]  ;;  %v28_v56 = vld [vmem:[%s708_s1 + $0x50] sm:$0xff]  ;;  %v23_v57 = vld [vmem:[%s708_s1 + $0x28] sm:$0xff] }
  0x14   :  { %163 = vmatprep.subr.mxu0 %v43_v37  ;;  %240 = vmatprep.subr.mxu1 %v45_v38  ;;  %v25_v58 = vld [vmem:[%s708_s1 + $0x38] sm:$0xff]  ;;  %v22_v59 = vld [vmem:[%s708_s1 + $0x20] sm:$0xff]  ;;  %v24_v60 = vld [vmem:[%s708_s1 + $0x30] sm:$0xff] }
  0x15   :  { %164 = vmatpush1.msra.mxu0 %v42_v39  ;;  %241 = vmatpush1.msra.mxu1 %v44_v40  ;;  %v19_v61 = vld [vmem:[%s708_s1 + $0x8] sm:$0xff]  ;;  %v21_v62 = vld [vmem:[%s708_s1 + $0x18] sm:$0xff]  ;;  %v18_v63 = vld [vmem:[%s708_s1] sm:$0xff] }
  0x16   :  { %165 = vmatprep.subr.mxu0 %v39_v41  ;;  %242 = vmatprep.subr.mxu1 %v41_v42  ;;  %v20_v0 = vld [vmem:[%s708_s1 + $0x10] sm:$0xff]  ;;  %v123_v1 = vld [vmem:[%s708_s1 + $0x348] sm:$0xff]  ;;  %v125_v2 = vld [vmem:[%s708_s1 + $0x358] sm:$0xff] }
  0x17   :  { %166 = vmatpush1.msra.mxu0 %v38_v43  ;;  %243 = vmatpush1.msra.mxu1 %v40_v44  ;;  %v122_v3 = vld [vmem:[%s708_s1 + $0x340] sm:$0xff]  ;;  %v124_v4 = vld [vmem:[%s708_s1 + $0x350] sm:$0xff]  ;;  %v119_v5 = vld [vmem:[%s708_s1 + $0x328] sm:$0xff] }
  0x18   :  { %167 = vmatprep.subr.mxu0 %v35_v45  ;;  %244 = vmatprep.subr.mxu1 %v37_v46  ;;  %v121_v6 = vld [vmem:[%s708_s1 + $0x338] sm:$0xff]  ;;  %v118_v7 = vld [vmem:[%s708_s1 + $0x320] sm:$0xff]  ;;  %v120_v8 = vld [vmem:[%s708_s1 + $0x330] sm:$0xff] }
  0x19   :  { %168 = vmatpush1.msra.mxu0 %v34_v47  ;;  %245 = vmatpush1.msra.mxu1 %v36_v48  ;;  %v115_v9 = vld [vmem:[%s708_s1 + $0x308] sm:$0xff]  ;;  %v117_v10 = vld [vmem:[%s708_s1 + $0x318] sm:$0xff]  ;;  %v114_v11 = vld [vmem:[%s708_s1 + $0x300] sm:$0xff] }
  0x1a   :  { %169 = vmatprep.subr.mxu0 %v31_v49  ;;  %246 = vmatprep.subr.mxu1 %v33_v50  ;;  %v116_v12 = vld [vmem:[%s708_s1 + $0x310] sm:$0xff]  ;;  %v111_v13 = vld [vmem:[%s708_s1 + $0x2e8] sm:$0xff]  ;;  %v113_v14 = vld [vmem:[%s708_s1 + $0x2f8] sm:$0xff] }
  0x1b   :  { %170 = vmatpush1.msra.mxu0 %v30_v51  ;;  %247 = vmatpush1.msra.mxu1 %v32_v52  ;;  %v110_v15 = vld [vmem:[%s708_s1 + $0x2e0] sm:$0xff]  ;;  %v112_v16 = vld [vmem:[%s708_s1 + $0x2f0] sm:$0xff]  ;;  %v107_v17 = vld [vmem:[%s708_s1 + $0x2c8] sm:$0xff] }
  0x1c   :  { %171 = vmatprep.subr.mxu0 %v27_v53  ;;  %248 = vmatprep.subr.mxu1 %v29_v54  ;;  %v109_v18 = vld [vmem:[%s708_s1 + $0x2d8] sm:$0xff]  ;;  %v106_v19 = vld [vmem:[%s708_s1 + $0x2c0] sm:$0xff]  ;;  %v108_v20 = vld [vmem:[%s708_s1 + $0x2d0] sm:$0xff] }
  0x1d   :  { %172 = vmatpush1.msra.mxu0 %v26_v55  ;;  %249 = vmatpush1.msra.mxu1 %v28_v56  ;;  %v103_v21 = vld [vmem:[%s708_s1 + $0x2a8] sm:$0xff]  ;;  %v105_v22 = vld [vmem:[%s708_s1 + $0x2b8] sm:$0xff]  ;;  %v102_v23 = vld [vmem:[%s708_s1 + $0x2a0] sm:$0xff] }
  0x1e   :  { %173 = vmatprep.subr.mxu0 %v23_v57  ;;  %250 = vmatprep.subr.mxu1 %v25_v58  ;;  %v104_v24 = vld [vmem:[%s708_s1 + $0x2b0] sm:$0xff]  ;;  %v99_v25 = vld [vmem:[%s708_s1 + $0x288] sm:$0xff]  ;;  %v101_v26 = vld [vmem:[%s708_s1 + $0x298] sm:$0xff] }
  0x1f   :  { %174 = vmatpush1.msra.mxu0 %v22_v59  ;;  %251 = vmatpush1.msra.mxu1 %v24_v60  ;;  %v98_v27 = vld [vmem:[%s708_s1 + $0x280] sm:$0xff]  ;;  %v100_v28 = vld [vmem:[%s708_s1 + $0x290] sm:$0xff]  ;;  %v95_v29 = vld [vmem:[%s708_s1 + $0x268] sm:$0xff] }
  0x20   :  { %175 = vmatprep.subr.mxu0 %v19_v61  ;;  %252 = vmatprep.subr.mxu1 %v21_v62  ;;  %v97_v30 = vld [vmem:[%s708_s1 + $0x278] sm:$0xff]  ;;  %v94_v31 = vld [vmem:[%s708_s1 + $0x260] sm:$0xff]  ;;  %v96_v32 = vld [vmem:[%s708_s1 + $0x270] sm:$0xff] }
  0x21   :  { %176 = vmatpush1.msra.mxu0 %v18_v63  ;;  %253 = vmatpush1.msra.mxu1 %v20_v0  ;;  %v91_v33 = vld [vmem:[%s708_s1 + $0x248] sm:$0xff]  ;;  %v93_v34 = vld [vmem:[%s708_s1 + $0x258] sm:$0xff]  ;;  %v90_v35 = vld [vmem:[%s708_s1 + $0x240] sm:$0xff] }
  0x22   :  { %187 = vmatprep.subr.mxu0 %v123_v1  ;;  %264 = vmatprep.subr.mxu1 %v125_v2  ;;  %v92_v36 = vld [vmem:[%s708_s1 + $0x250] sm:$0xff]  ;;  %v87_v37 = vld [vmem:[%s708_s1 + $0x228] sm:$0xff]  ;;  %v89_v38 = vld [vmem:[%s708_s1 + $0x238] sm:$0xff] }
  0x23   :  { %188 = vmatpush2.msra.mxu0 %v122_v3  ;;  %265 = vmatpush2.msra.mxu1 %v124_v4  ;;  %v86_v39 = vld [vmem:[%s708_s1 + $0x220] sm:$0xff]  ;;  %v88_v40 = vld [vmem:[%s708_s1 + $0x230] sm:$0xff]  ;;  %v83_v41 = vld [vmem:[%s708_s1 + $0x208] sm:$0xff] }
  0x24   :  { %189 = vmatprep.subr.mxu0 %v119_v5  ;;  %266 = vmatprep.subr.mxu1 %v121_v6  ;;  %v85_v42 = vld [vmem:[%s708_s1 + $0x218] sm:$0xff]  ;;  %v82_v43 = vld [vmem:[%s708_s1 + $0x200] sm:$0xff]  ;;  %v15_v44 = vld [vmem:[%s709_s0 + $0x8] sm:$0xff] }
  0x25   :  { %190 = vmatpush2.msra.mxu0 %v118_v7  ;;  %267 = vmatpush2.msra.mxu1 %v120_v8  ;;  %v84_v45 = vld [vmem:[%s708_s1 + $0x210] sm:$0xff]  ;;  %v14_v46 = vld [vmem:[%s709_s0] sm:$0xff]  ;;  %v17_v47 = vld [vmem:[%s709_s0 + $0x18] sm:$0xf] }
  0x26   :  { %191 = vmatprep.subr.mxu0 %v115_v9  ;;  %268 = vmatprep.subr.mxu1 %v117_v10  ;;  %v126_v48 = vld [vmem:[%s710_s2] sm:$0xff]  ;;  %v16_v49 = vld [vmem:[%s709_s0 + $0x10] sm:$0xf]  ;;  %v127_v50 = vld [vmem:[%s710_s2 + $0x8] sm:$0xf] }
  0x27   :  { %192 = vmatpush2.msra.mxu0 %v114_v11  ;;  %269 = vmatpush2.msra.mxu1 %v116_v12 }
  0x28   :  { %193 = vmatprep.subr.mxu0 %v111_v13  ;;  %270 = vmatprep.subr.mxu1 %v113_v14 }
  0x29   :  { %194 = vmatpush2.msra.mxu0 %v110_v15  ;;  %271 = vmatpush2.msra.mxu1 %v112_v16 }
  0x2a   :  { %195 = vmatprep.subr.mxu0 %v107_v17  ;;  %272 = vmatprep.subr.mxu1 %v109_v18 }
  0x2b   :  { %196 = vmatpush2.msra.mxu0 %v106_v19  ;;  %273 = vmatpush2.msra.mxu1 %v108_v20 }
  0x2c   :  { %197 = vmatprep.subr.mxu0 %v103_v21  ;;  %274 = vmatprep.subr.mxu1 %v105_v22 }
  0x2d   :  { %198 = vmatpush2.msra.mxu0 %v102_v23  ;;  %275 = vmatpush2.msra.mxu1 %v104_v24 }
  0x2e   :  { %199 = vmatprep.subr.mxu0 %v99_v25  ;;  %276 = vmatprep.subr.mxu1 %v101_v26 }
  0x2f   :  { %200 = vmatpush2.msra.mxu0 %v98_v27  ;;  %277 = vmatpush2.msra.mxu1 %v100_v28 }
  0x30   :  { %201 = vmatprep.subr.mxu0 %v95_v29  ;;  %278 = vmatprep.subr.mxu1 %v97_v30 }
  0x31   :  { %202 = vmatpush2.msra.mxu0 %v94_v31  ;;  %279 = vmatpush2.msra.mxu1 %v96_v32 }
  0x32   :  { %203 = vmatprep.subr.mxu0 %v91_v33  ;;  %280 = vmatprep.subr.mxu1 %v93_v34 }
  0x33   :  { %204 = vmatpush2.msra.mxu0 %v90_v35  ;;  %281 = vmatpush2.msra.mxu1 %v92_v36 }
  0x34   :  { %205 = vmatprep.subr.mxu0 %v87_v37  ;;  %282 = vmatprep.subr.mxu1 %v89_v38 }
  0x35   :  { %206 = vmatpush2.msra.mxu0 %v86_v39  ;;  %283 = vmatpush2.msra.mxu1 %v88_v40 }
  0x36   :  { %207 = vmatprep.subr.mxu0 %v83_v41  ;;  %284 = vmatprep.subr.mxu1 %v85_v42 }
  0x37   :  { %208 = vmatpush2.msra.mxu0 %v82_v43  ;;  %311 = vmatprep.mubr.msk.f32.mxu0 %vm138_vm0, %v15_v44 }
  0x38   :  { %285 = vmatpush2.msra.mxu1 %v84_v45  ;;  %313 = vmatprep.mubr.msk.f32.mxu1 %vm138_vm0, %v15_v44 }
  0x39   :  { %210 = vmatmul.mubr.f32.vlgmr.msra.gmra.mxu0 %v14_v46  ;;  %287 = vmatmul.mubr.f32.vlgmr.msra.gmra.mxu1 %v14_v46 }
  0x3a   :  { %312 = vmatprep.mubr.msk.f32.mxu0 %vm138_vm0, %v17_v47  ;;  %314 = vmatprep.mubr.msk.f32.mxu1 %vm138_vm0, %v17_v47 }
  0x3b   :  { %130 = vperm.xlu0 %316, %v126_v48  }
  0x3d   :  { %216 = vmatmul.mubr.f32.gmra.mxu0 %v16_v49  ;;  %293 = vmatmul.mubr.f32.gmra.mxu1 %v16_v49 }
  0x3f   :  { %135 = vperm.xlu0 %316, %v127_v50  }
  0xb6   :  { %v131_v51 = vpop.permute.xlu0 %130 }
  0xba   :  { %v136_v58 = vpop.permute.xlu0 %135 }
  0xf9   :  { %v211_v52 = vpop.f32.mrf.mxu0  ;;  %v288_v53 = vpop.f32.mrf.mxu1 }
  0xfa   :  { %v212_v54 = vadd.f32 %v211_v52, %v131_v51  ;;  %v289_v55 = vadd.f32 %v288_v53, %v131_v51 }
  0xfb   :  { %v213_v56 = vpop.f32.mrf.mxu0  ;;  %v290_v57 = vpop.f32.mrf.mxu1 }
  0xfc   :  { %299 = vst [vmem:[%s711_s3] sm:$0xff] %v212_v54  ;;  %301 = vst [vmem:[%s711_s3 + $0x10] sm:$0xff] %v289_v55  ;;  %v214_v59 = vadd.f32 %v213_v56, %v131_v51  ;;  %v291_v60 = vadd.f32 %v290_v57, %v131_v51 }
  0xfd   :  { %v217_v61 = vpop.f32.mrf.mxu0  ;;  %v294_v62 = vpop.f32.mrf.mxu1 }
  0xfe   :  { %300 = vst [vmem:[%s711_s3 + $0x8] sm:$0xff] %v214_v59  ;;  %302 = vst [vmem:[%s711_s3 + $0x18] sm:$0xff] %v291_v60  ;;  %v218_v63 = vadd.f32 %v217_v61, %v136_v58  ;;  %v295_v0 = vadd.f32 %v294_v62, %v136_v58 }
  0xff   :  { %v219_v1 = vpop.f32.mrf.mxu0  ;;  %v296_v2 = vpop.f32.mrf.mxu1 }
 0x100   :  { %303 = vst [vmem:[%s711_s3 + $0x20] sm:$0xf] %v218_v63  ;;  %305 = vst [vmem:[%s711_s3 + $0x30] sm:$0xf] %v295_v0  ;;  %v220_v3 = vadd.f32 %v219_v1, %v136_v58  ;;  %v297_v4 = vadd.f32 %v296_v2, %v136_v58 }
 0x102   :  { %304 = vst [vmem:[%s711_s3 + $0x28] sm:$0xf] %v220_v3  ;;  %306 = vst [vmem:[%s711_s3 + $0x38] sm:$0xf] %v297_v4 }

// kernel: forward.21
= control target key start
LH: loop header
LB: loop body
LE: loop exit
PB: predicated region body
PF: predicated region fallthrough
CT: control target
= control target key end

     0   :  { %s1465_s0 = inlined_call_operand.vmem [shape: f32[12,216], index: 0, kind: input, shape index: {}]   ;;  %s1466_s1 = inlined_call_operand.vmem [shape: f32[216,512], index: 1, kind: input, shape index: {}]   ;;  %s1467_s2 = inlined_call_operand.vmem [shape: f32[12,1], index: 2, kind: input, shape index: {}]   ;;  %s1468_s3 = inlined_call_operand.vmem [shape: f32[1,12], index: 3, kind: input, shape index: {}]   ;;  %s1469_s4 = inlined_call_operand.<no memory space> [shape: f32[1,1], index: 4, kind: input, shape index: {}]   ;;  %s1470_s5 = inlined_call_operand.vmem [shape: f32[1,512], index: 5, kind: input, shape index: {}]   ;;  %s1471_s6 = inlined_call_operand.vmem [shape: f32[512,2], index: 6, kind: input, shape index: {}]   ;;  %s1472_s8 = inlined_call_operand.hbm [shape: f32[1,2], index: 8, kind: output, shape index: {}]   ;;  %s1473_s7 = inlined_call_operand.<no memory space> [shape: f32[1,1], index: 7, kind: input, shape index: {}]  }
   0x1   :  { %v13_v0 = vstv %s1469_s4  ;;  %v15_v1 = vstv %s1473_s7 }
   0x2   :  { %14 = vst [vmem:[#allocation2] sm:$0x1] %v13_v0  ;;  %16 = vst [vmem:[#allocation3] sm:$0x1] %v15_v1 }
   0x3   :  { %v99_v2 = vld [vmem:[%s1466_s1 + $0x1e8] sm:$0xff]  ;;  %v101_v3 = vld [vmem:[%s1466_s1 + $0x1f8] sm:$0xff]  ;;  %v98_v4 = vld [vmem:[%s1466_s1 + $0x1e0] sm:$0xff] }
   0x4   :  { %165 = vmatprep.subr.mxu0 %v99_v2  ;;  %242 = vmatprep.subr.mxu1 %v101_v3  ;;  %v100_v5 = vld [vmem:[%s1466_s1 + $0x1f0] sm:$0xff]  ;;  %v95_v6 = vld [vmem:[%s1466_s1 + $0x1c8] sm:$0xff]  ;;  %v97_v7 = vld [vmem:[%s1466_s1 + $0x1d8] sm:$0xff] }
   0x5   :  { %166 = vmatpush1.msra.mxu0 %v98_v4  ;;  %243 = vmatpush1.msra.mxu1 %v100_v5  ;;  %v94_v8 = vld [vmem:[%s1466_s1 + $0x1c0] sm:$0xff]  ;;  %v96_v9 = vld [vmem:[%s1466_s1 + $0x1d0] sm:$0xff]  ;;  %v91_v10 = vld [vmem:[%s1466_s1 + $0x1a8] sm:$0xff] }
   0x6   :  { %167 = vmatprep.subr.mxu0 %v95_v6  ;;  %244 = vmatprep.subr.mxu1 %v97_v7  ;;  %v93_v11 = vld [vmem:[%s1466_s1 + $0x1b8] sm:$0xff]  ;;  %v90_v12 = vld [vmem:[%s1466_s1 + $0x1a0] sm:$0xff]  ;;  %v92_v13 = vld [vmem:[%s1466_s1 + $0x1b0] sm:$0xff] }
   0x7   :  { %168 = vmatpush1.msra.mxu0 %v94_v8  ;;  %245 = vmatpush1.msra.mxu1 %v96_v9  ;;  %v87_v14 = vld [vmem:[%s1466_s1 + $0x188] sm:$0xff]  ;;  %v89_v15 = vld [vmem:[%s1466_s1 + $0x198] sm:$0xff]  ;;  %v86_v16 = vld [vmem:[%s1466_s1 + $0x180] sm:$0xff] }
   0x8   :  { %169 = vmatprep.subr.mxu0 %v91_v10  ;;  %246 = vmatprep.subr.mxu1 %v93_v11  ;;  %v88_v17 = vld [vmem:[%s1466_s1 + $0x190] sm:$0xff]  ;;  %v83_v18 = vld [vmem:[%s1466_s1 + $0x168] sm:$0xff]  ;;  %v85_v19 = vld [vmem:[%s1466_s1 + $0x178] sm:$0xff] }
   0x9   :  { %170 = vmatpush1.msra.mxu0 %v90_v12  ;;  %247 = vmatpush1.msra.mxu1 %v92_v13  ;;  %v82_v20 = vld [vmem:[%s1466_s1 + $0x160] sm:$0xff]  ;;  %v84_v21 = vld [vmem:[%s1466_s1 + $0x170] sm:$0xff]  ;;  %v79_v22 = vld [vmem:[%s1466_s1 + $0x148] sm:$0xff] }
   0xa   :  { %171 = vmatprep.subr.mxu0 %v87_v14  ;;  %248 = vmatprep.subr.mxu1 %v89_v15  ;;  %v81_v23 = vld [vmem:[%s1466_s1 + $0x158] sm:$0xff]  ;;  %v78_v24 = vld [vmem:[%s1466_s1 + $0x140] sm:$0xff]  ;;  %v80_v25 = vld [vmem:[%s1466_s1 + $0x150] sm:$0xff] }
   0xb   :  { %172 = vmatpush1.msra.mxu0 %v86_v16  ;;  %249 = vmatpush1.msra.mxu1 %v88_v17  ;;  %v75_v26 = vld [vmem:[%s1466_s1 + $0x128] sm:$0xff]  ;;  %v77_v27 = vld [vmem:[%s1466_s1 + $0x138] sm:$0xff]  ;;  %v74_v28 = vld [vmem:[%s1466_s1 + $0x120] sm:$0xff] }
   0xc   :  { %173 = vmatprep.subr.mxu0 %v83_v18  ;;  %250 = vmatprep.subr.mxu1 %v85_v19  ;;  %v76_v29 = vld [vmem:[%s1466_s1 + $0x130] sm:$0xff]  ;;  %v71_v30 = vld [vmem:[%s1466_s1 + $0x108] sm:$0xff]  ;;  %v73_v31 = vld [vmem:[%s1466_s1 + $0x118] sm:$0xff] }
   0xd   :  { %174 = vmatpush1.msra.mxu0 %v82_v20  ;;  %251 = vmatpush1.msra.mxu1 %v84_v21  ;;  %v70_v32 = vld [vmem:[%s1466_s1 + $0x100] sm:$0xff]  ;;  %v72_v33 = vld [vmem:[%s1466_s1 + $0x110] sm:$0xff]  ;;  %v67_v34 = vld [vmem:[%s1466_s1 + $0xe8] sm:$0xff] }
   0xe   :  { %175 = vmatprep.subr.mxu0 %v79_v22  ;;  %252 = vmatprep.subr.mxu1 %v81_v23  ;;  %v69_v35 = vld [vmem:[%s1466_s1 + $0xf8] sm:$0xff]  ;;  %v66_v36 = vld [vmem:[%s1466_s1 + $0xe0] sm:$0xff]  ;;  %v68_v37 = vld [vmem:[%s1466_s1 + $0xf0] sm:$0xff] }
   0xf   :  { %176 = vmatpush1.msra.mxu0 %v78_v24  ;;  %253 = vmatpush1.msra.mxu1 %v80_v25  ;;  %v63_v38 = vld [vmem:[%s1466_s1 + $0xc8] sm:$0xff]  ;;  %v65_v39 = vld [vmem:[%s1466_s1 + $0xd8] sm:$0xff]  ;;  %v62_v40 = vld [vmem:[%s1466_s1 + $0xc0] sm:$0xff] }
  0x10   :  { %177 = vmatprep.subr.mxu0 %v75_v26  ;;  %254 = vmatprep.subr.mxu1 %v77_v27  ;;  %v64_v41 = vld [vmem:[%s1466_s1 + $0xd0] sm:$0xff]  ;;  %v59_v42 = vld [vmem:[%s1466_s1 + $0xa8] sm:$0xff]  ;;  %v61_v43 = vld [vmem:[%s1466_s1 + $0xb8] sm:$0xff] }
  0x11   :  { %178 = vmatpush1.msra.mxu0 %v74_v28  ;;  %255 = vmatpush1.msra.mxu1 %v76_v29  ;;  %v58_v44 = vld [vmem:[%s1466_s1 + $0xa0] sm:$0xff]  ;;  %v60_v45 = vld [vmem:[%s1466_s1 + $0xb0] sm:$0xff]  ;;  %v55_v46 = vld [vmem:[%s1466_s1 + $0x88] sm:$0xff] }
  0x12   :  { %179 = vmatprep.subr.mxu0 %v71_v30  ;;  %256 = vmatprep.subr.mxu1 %v73_v31  ;;  %v57_v47 = vld [vmem:[%s1466_s1 + $0x98] sm:$0xff]  ;;  %v54_v48 = vld [vmem:[%s1466_s1 + $0x80] sm:$0xff]  ;;  %v56_v49 = vld [vmem:[%s1466_s1 + $0x90] sm:$0xff] }
  0x13   :  { %180 = vmatpush1.msra.mxu0 %v70_v32  ;;  %257 = vmatpush1.msra.mxu1 %v72_v33  ;;  %v51_v50 = vld [vmem:[%s1466_s1 + $0x68] sm:$0xff]  ;;  %v53_v51 = vld [vmem:[%s1466_s1 + $0x78] sm:$0xff]  ;;  %v50_v52 = vld [vmem:[%s1466_s1 + $0x60] sm:$0xff] }
  0x14   :  { %181 = vmatprep.subr.mxu0 %v67_v34  ;;  %258 = vmatprep.subr.mxu1 %v69_v35  ;;  %v52_v53 = vld [vmem:[%s1466_s1 + $0x70] sm:$0xff]  ;;  %v47_v54 = vld [vmem:[%s1466_s1 + $0x48] sm:$0xff]  ;;  %v49_v55 = vld [vmem:[%s1466_s1 + $0x58] sm:$0xff] }
  0x15   :  { %182 = vmatpush1.msra.mxu0 %v66_v36  ;;  %259 = vmatpush1.msra.mxu1 %v68_v37  ;;  %v46_v56 = vld [vmem:[%s1466_s1 + $0x40] sm:$0xff]  ;;  %v48_v57 = vld [vmem:[%s1466_s1 + $0x50] sm:$0xff]  ;;  %v43_v58 = vld [vmem:[%s1466_s1 + $0x28] sm:$0xff] }
  0x16   :  { %183 = vmatprep.subr.mxu0 %v63_v38  ;;  %260 = vmatprep.subr.mxu1 %v65_v39  ;;  %v45_v59 = vld [vmem:[%s1466_s1 + $0x38] sm:$0xff]  ;;  %v42_v60 = vld [vmem:[%s1466_s1 + $0x20] sm:$0xff]  ;;  %v44_v61 = vld [vmem:[%s1466_s1 + $0x30] sm:$0xff] }
  0x17   :  { %184 = vmatpush1.msra.mxu0 %v62_v40  ;;  %261 = vmatpush1.msra.mxu1 %v64_v41  ;;  %v39_v62 = vld [vmem:[%s1466_s1 + $0x8] sm:$0xff]  ;;  %v41_v63 = vld [vmem:[%s1466_s1 + $0x18] sm:$0xff]  ;;  %v38_v0 = vld [vmem:[%s1466_s1] sm:$0xff] }
  0x18   :  { %185 = vmatprep.subr.mxu0 %v59_v42  ;;  %262 = vmatprep.subr.mxu1 %v61_v43  ;;  %v40_v1 = vld [vmem:[%s1466_s1 + $0x10] sm:$0xff]  ;;  %v143_v2 = vld [vmem:[%s1466_s1 + $0x348] sm:$0xff]  ;;  %v145_v3 = vld [vmem:[%s1466_s1 + $0x358] sm:$0xff] }
  0x19   :  { %186 = vmatpush1.msra.mxu0 %v58_v44  ;;  %263 = vmatpush1.msra.mxu1 %v60_v45  ;;  %v142_v4 = vld [vmem:[%s1466_s1 + $0x340] sm:$0xff]  ;;  %v144_v5 = vld [vmem:[%s1466_s1 + $0x350] sm:$0xff]  ;;  %v139_v6 = vld [vmem:[%s1466_s1 + $0x328] sm:$0xff] }
  0x1a   :  { %187 = vmatprep.subr.mxu0 %v55_v46  ;;  %264 = vmatprep.subr.mxu1 %v57_v47  ;;  %v141_v7 = vld [vmem:[%s1466_s1 + $0x338] sm:$0xff]  ;;  %v138_v8 = vld [vmem:[%s1466_s1 + $0x320] sm:$0xff]  ;;  %v140_v9 = vld [vmem:[%s1466_s1 + $0x330] sm:$0xff] }
  0x1b   :  { %188 = vmatpush1.msra.mxu0 %v54_v48  ;;  %265 = vmatpush1.msra.mxu1 %v56_v49  ;;  %v135_v10 = vld [vmem:[%s1466_s1 + $0x308] sm:$0xff]  ;;  %v137_v11 = vld [vmem:[%s1466_s1 + $0x318] sm:$0xff]  ;;  %v134_v12 = vld [vmem:[%s1466_s1 + $0x300] sm:$0xff] }
  0x1c   :  { %189 = vmatprep.subr.mxu0 %v51_v50  ;;  %266 = vmatprep.subr.mxu1 %v53_v51  ;;  %v136_v13 = vld [vmem:[%s1466_s1 + $0x310] sm:$0xff]  ;;  %v131_v14 = vld [vmem:[%s1466_s1 + $0x2e8] sm:$0xff]  ;;  %v133_v15 = vld [vmem:[%s1466_s1 + $0x2f8] sm:$0xff] }
  0x1d   :  { %190 = vmatpush1.msra.mxu0 %v50_v52  ;;  %267 = vmatpush1.msra.mxu1 %v52_v53  ;;  %v130_v16 = vld [vmem:[%s1466_s1 + $0x2e0] sm:$0xff]  ;;  %v132_v17 = vld [vmem:[%s1466_s1 + $0x2f0] sm:$0xff]  ;;  %v127_v18 = vld [vmem:[%s1466_s1 + $0x2c8] sm:$0xff] }
  0x1e   :  { %191 = vmatprep.subr.mxu0 %v47_v54  ;;  %268 = vmatprep.subr.mxu1 %v49_v55  ;;  %v129_v19 = vld [vmem:[%s1466_s1 + $0x2d8] sm:$0xff] }
  0x1f   :  { %192 = vmatpush1.msra.mxu0 %v46_v56  ;;  %269 = vmatpush1.msra.mxu1 %v48_v57 }
  0x20   :  { %193 = vmatprep.subr.mxu0 %v43_v58  ;;  %270 = vmatprep.subr.mxu1 %v45_v59 }
  0x21   :  { %194 = vmatpush1.msra.mxu0 %v42_v60  ;;  %271 = vmatpush1.msra.mxu1 %v44_v61 }
  0x22   :  { %195 = vmatprep.subr.mxu0 %v39_v62  ;;  %272 = vmatprep.subr.mxu1 %v41_v63 }
  0x23   :  { %196 = vmatpush1.msra.mxu0 %v38_v0  ;;  %273 = vmatpush1.msra.mxu1 %v40_v1 }
  0x24   :  { %207 = vmatprep.subr.mxu0 %v143_v2  ;;  %284 = vmatprep.subr.mxu1 %v145_v3 }
  0x25   :  { %208 = vmatpush2.msra.mxu0 %v142_v4  ;;  %285 = vmatpush2.msra.mxu1 %v144_v5 }
  0x26   :  { %209 = vmatprep.subr.mxu0 %v139_v6  ;;  %286 = vmatprep.subr.mxu1 %v141_v7 }
  0x27   :  { %210 = vmatpush2.msra.mxu0 %v138_v8  ;;  %287 = vmatpush2.msra.mxu1 %v140_v9 }
  0x28   :  { %211 = vmatprep.subr.mxu0 %v135_v10  ;;  %288 = vmatprep.subr.mxu1 %v137_v11 }
  0x29   :  { %212 = vmatpush2.msra.mxu0 %v134_v12  ;;  %289 = vmatpush2.msra.mxu1 %v136_v13 }
  0x2a   :  { %17 = vsyncpa [#allocation5], 0  ;;  %213 = vmatprep.subr.mxu0 %v131_v14  ;;  %290 = vmatprep.subr.mxu1 %v133_v15  ;;  %v126_v20 = vld [vmem:[%s1466_s1 + $0x2c0] sm:$0xff]  ;;  %v128_v21 = vld [vmem:[%s1466_s1 + $0x2d0] sm:$0xff]  ;;  %vm158_vm0 = vcmask 719872   ;;  %v864_v51 = vmov 0  }
  0x2b   :  { %214 = vmatpush2.msra.mxu0 %v130_v16  ;;  %291 = vmatpush2.msra.mxu1 %v132_v17  ;;  %v123_v22 = vld [vmem:[%s1466_s1 + $0x2a8] sm:$0xff]  ;;  %v125_v23 = vld [vmem:[%s1466_s1 + $0x2b8] sm:$0xff]  ;;  %v122_v24 = vld [vmem:[%s1466_s1 + $0x2a0] sm:$0xff]  ;;  %v865_v53 = vmov 0.0   ;;  %vm342_vm1 = vcmask 1043456   ;;  %vm338_vm2 = vcmask 97280  }
  0x2c   :  { %215 = vmatprep.subr.mxu0 %v127_v18  ;;  %292 = vmatprep.subr.mxu1 %v129_v19  ;;  %v124_v25 = vld [vmem:[%s1466_s1 + $0x2b0] sm:$0xff]  ;;  %v119_v26 = vld [vmem:[%s1466_s1 + $0x288] sm:$0xff]  ;;  %v121_v27 = vld [vmem:[%s1466_s1 + $0x298] sm:$0xff]  ;;  %vm741_vm3 = vcmask 8192  }
  0x2d   :  { %216 = vmatpush2.msra.mxu0 %v126_v20  ;;  %293 = vmatpush2.msra.mxu1 %v128_v21  ;;  %v118_v28 = vld [vmem:[%s1466_s1 + $0x280] sm:$0xff]  ;;  %v120_v29 = vld [vmem:[%s1466_s1 + $0x290] sm:$0xff]  ;;  %v115_v30 = vld [vmem:[%s1466_s1 + $0x268] sm:$0xff] }
  0x2e   :  { %217 = vmatprep.subr.mxu0 %v123_v22  ;;  %294 = vmatprep.subr.mxu1 %v125_v23  ;;  %v117_v31 = vld [vmem:[%s1466_s1 + $0x278] sm:$0xff]  ;;  %v114_v32 = vld [vmem:[%s1466_s1 + $0x260] sm:$0xff]  ;;  %v116_v33 = vld [vmem:[%s1466_s1 + $0x270] sm:$0xff] }
  0x2f   :  { %218 = vmatpush2.msra.mxu0 %v122_v24  ;;  %295 = vmatpush2.msra.mxu1 %v124_v25  ;;  %v111_v34 = vld [vmem:[%s1466_s1 + $0x248] sm:$0xff]  ;;  %v113_v35 = vld [vmem:[%s1466_s1 + $0x258] sm:$0xff]  ;;  %v110_v36 = vld [vmem:[%s1466_s1 + $0x240] sm:$0xff] }
  0x30   :  { %219 = vmatprep.subr.mxu0 %v119_v26  ;;  %296 = vmatprep.subr.mxu1 %v121_v27  ;;  %v112_v37 = vld [vmem:[%s1466_s1 + $0x250] sm:$0xff]  ;;  %v107_v38 = vld [vmem:[%s1466_s1 + $0x228] sm:$0xff]  ;;  %v109_v39 = vld [vmem:[%s1466_s1 + $0x238] sm:$0xff] }
  0x31   :  { %220 = vmatpush2.msra.mxu0 %v118_v28  ;;  %297 = vmatpush2.msra.mxu1 %v120_v29  ;;  %v106_v40 = vld [vmem:[%s1466_s1 + $0x220] sm:$0xff]  ;;  %v108_v41 = vld [vmem:[%s1466_s1 + $0x230] sm:$0xff]  ;;  %v103_v42 = vld [vmem:[%s1466_s1 + $0x208] sm:$0xff] }
  0x32   :  { %221 = vmatprep.subr.mxu0 %v115_v30  ;;  %298 = vmatprep.subr.mxu1 %v117_v31  ;;  %v105_v43 = vld [vmem:[%s1466_s1 + $0x218] sm:$0xff]  ;;  %v102_v44 = vld [vmem:[%s1466_s1 + $0x200] sm:$0xff]  ;;  %v35_v45 = vld [vmem:[%s1465_s0 + $0x8] sm:$0xff] }
  0x33   :  { %222 = vmatpush2.msra.mxu0 %v114_v32  ;;  %299 = vmatpush2.msra.mxu1 %v116_v33  ;;  %v104_v46 = vld [vmem:[%s1466_s1 + $0x210] sm:$0xff]  ;;  %v34_v47 = vld [vmem:[%s1465_s0] sm:$0xff]  ;;  %v37_v48 = vld [vmem:[%s1465_s0 + $0x18] sm:$0xf] }
  0x34   :  { %223 = vmatprep.subr.mxu0 %v111_v34  ;;  %300 = vmatprep.subr.mxu1 %v113_v35  ;;  %v147_v49 = vld [vmem:[%s1467_s2 + $0x8] sm:$0xf]  ;;  %v36_v50 = vld [vmem:[%s1465_s0 + $0x10] sm:$0xf]  ;;  %v146_v52 = vld [vmem:[%s1467_s2] sm:$0xff] }
  0x35   :  { %224 = vmatpush2.msra.mxu0 %v110_v36  ;;  %301 = vmatpush2.msra.mxu1 %v112_v37  ;;  %v328_v54 = vld [vmem:[#allocation2] sm:$0x1]  ;;  %v591_v55 = vld [vmem:[#allocation3] sm:$0x1]  ;;  %v558_v19 = vld [vmem:[%s1471_s6 + $0xf8] sm:$0xff] }
  0x36   :  { %225 = vmatprep.subr.mxu0 %v107_v38  ;;  %302 = vmatprep.subr.mxu1 %v109_v39  ;;  %v327_v18 = vld [vmem:[%s1468_s3] sm:$0x1]  ;;  %v590_v20 = vld [vmem:[%s1471_s6 + $0x1f8] sm:$0xff]  ;;  %v557_v23 = vld [vmem:[%s1471_s6 + $0xf0] sm:$0xff] }
  0x37   :  { %226 = vmatpush2.msra.mxu0 %v106_v40  ;;  %303 = vmatpush2.msra.mxu1 %v108_v41  ;;  %v542_v21 = vld [vmem:[%s1471_s6 + $0x78] sm:$0xff]  ;;  %v589_v24 = vld [vmem:[%s1471_s6 + $0x1f0] sm:$0xff]  ;;  %v556_v27 = vld [vmem:[%s1471_s6 + $0xe8] sm:$0xff] }
  0x38   :  { %227 = vmatprep.subr.mxu0 %v103_v42  ;;  %304 = vmatprep.subr.mxu1 %v105_v43  ;;  %v574_v22 = vld [vmem:[%s1471_s6 + $0x178] sm:$0xff]  ;;  %v541_v25 = vld [vmem:[%s1471_s6 + $0x70] sm:$0xff]  ;;  %v588_v28 = vld [vmem:[%s1471_s6 + $0x1e8] sm:$0xff] }
  0x39   :  { %228 = vmatpush2.msra.mxu0 %v102_v44  ;;  %757 = vmatprep.mubr.msk.f32.mxu0 %vm158_vm0, %v35_v45  ;;  %v573_v26 = vld [vmem:[%s1471_s6 + $0x170] sm:$0xff]  ;;  %v540_v29 = vld [vmem:[%s1471_s6 + $0x68] sm:$0xff]  ;;  %v555_v31 = vld [vmem:[%s1471_s6 + $0xe0] sm:$0xff] }
  0x3a   :  { %305 = vmatpush2.msra.mxu1 %v104_v46  ;;  %759 = vmatprep.mubr.msk.f32.mxu1 %vm158_vm0, %v35_v45  ;;  %v572_v30 = vld [vmem:[%s1471_s6 + $0x168] sm:$0xff]  ;;  %v587_v32 = vld [vmem:[%s1471_s6 + $0x1e0] sm:$0xff]  ;;  %v554_v35 = vld [vmem:[%s1471_s6 + $0xd8] sm:$0xff] }
  0x3b   :  { %230 = vmatmul.mubr.f32.vlgmr.msra.gmra.mxu0 %v34_v47  ;;  %307 = vmatmul.mubr.f32.vlgmr.msra.gmra.mxu1 %v34_v47  ;;  %v539_v33 = vld [vmem:[%s1471_s6 + $0x60] sm:$0xff]  ;;  %v586_v36 = vld [vmem:[%s1471_s6 + $0x1d8] sm:$0xff]  ;;  %v553_v39 = vld [vmem:[%s1471_s6 + $0xd0] sm:$0xff] }
  0x3c   :  { %758 = vmatprep.mubr.msk.f32.mxu0 %vm158_vm0, %v37_v48  ;;  %760 = vmatprep.mubr.msk.f32.mxu1 %vm158_vm0, %v37_v48  ;;  %v571_v34 = vld [vmem:[%s1471_s6 + $0x160] sm:$0xff]  ;;  %v538_v37 = vld [vmem:[%s1471_s6 + $0x58] sm:$0xff]  ;;  %v585_v40 = vld [vmem:[%s1471_s6 + $0x1d0] sm:$0xff] }
  0x3d   :  { %840 = vset.pattern.permute.xlu0 %v864_v51  ;;  %841 = vset.pattern.permute.xlu1 %v864_v51  ;;  %v570_v38 = vld [vmem:[%s1471_s6 + $0x158] sm:$0xff]  ;;  %v537_v41 = vld [vmem:[%s1471_s6 + $0x50] sm:$0xff]  ;;  %v552_v43 = vld [vmem:[%s1471_s6 + $0xc8] sm:$0xff] }
  0x3e   :  { %155 = vperm.xlu0 %840, %v147_v49   ;;  %331 = vperm.xlu1 %841, %v328_v54   ;;  %v569_v42 = vld [vmem:[%s1471_s6 + $0x150] sm:$0xff]  ;;  %v584_v44 = vld [vmem:[%s1471_s6 + $0x1c8] sm:$0xff]  ;;  %v551_v47 = vld [vmem:[%s1471_s6 + $0xc0] sm:$0xff] }
  0x3f   :  { %236 = vmatmul.mubr.f32.gmra.mxu0 %v36_v50  ;;  %313 = vmatmul.mubr.f32.gmra.mxu1 %v36_v50  ;;  %v536_v45 = vld [vmem:[%s1471_s6 + $0x48] sm:$0xff]  ;;  %v583_v48 = vld [vmem:[%s1471_s6 + $0x1c0] sm:$0xff]  ;;  %v550_v51 = vld [vmem:[%s1471_s6 + $0xb8] sm:$0xff] }
  0x40   :  { %419 = vmatprep.mubr.f32.mxu0 %v865_v53  ;;  %490 = vmatprep.mubr.f32.mxu1 %v865_v53  ;;  %v568_v46 = vld [vmem:[%s1471_s6 + $0x148] sm:$0xff]  ;;  %v535_v49 = vld [vmem:[%s1471_s6 + $0x40] sm:$0xff]  ;;  %v534_v53 = vld [vmem:[%s1471_s6 + $0x38] sm:$0xff] }
  0x41   :  { %v567_v50 = vld [vmem:[%s1471_s6 + $0x140] sm:$0xff]  ;;  %v566_v54 = vld [vmem:[%s1471_s6 + $0x138] sm:$0xff] }
  0x42   :  { %150 = vperm.xlu0 %840, %v146_v52   ;;  %594 = vperm.xlu1 %841, %v591_v55   ;;  %v582_v52 = vld [vmem:[%s1471_s6 + $0x1b8] sm:$0xff]  ;;  %v549_v55 = vld [vmem:[%s1471_s6 + $0xb0] sm:$0xff] }
  0xb9   :  { %v156_v56 = vpop.permute.xlu0 %155 }
  0xbd   :  { %v151_v63 = vpop.permute.xlu0 %150 }
  0xfb   :  { %v231_v57 = vpop.f32.mrf.mxu0  ;;  %v308_v58 = vpop.f32.mrf.mxu1 }
  0xfc   :  { %v232_v8 = vadd.f32 %v231_v57, %v151_v63  ;;  %v309_v9 = vadd.f32 %v308_v58, %v151_v63  ;;  %v533_v57 = vld [vmem:[%s1471_s6 + $0x30] sm:$0xff] }
  0xfd   :  { %v233_v59 = vpop.f32.mrf.mxu0  ;;  %v310_v60 = vpop.f32.mrf.mxu1  ;;  %v565_v58 = vld [vmem:[%s1471_s6 + $0x130] sm:$0xff] }
  0xfe   :  { %v234_v4 = vadd.f32 %v233_v59, %v151_v63  ;;  %v311_v5 = vadd.f32 %v310_v60, %v151_v63  ;;  %v319_v16 = vmax.f32 %v232_v8, 0.0  ;;  %v321_v17 = vmax.f32 %v309_v9, 0.0  ;;  %v548_v59 = vld [vmem:[%s1471_s6 + $0xa8] sm:$0xff]  ;;  %v547_v63 = vld [vmem:[%s1471_s6 + $0xa0] sm:$0xff]  ;;  %v577_v8 = vld [vmem:[%s1471_s6 + $0x190] sm:$0xff] }
  0xff   :  { %v237_v61 = vpop.f32.mrf.mxu0  ;;  %v314_v62 = vpop.f32.mrf.mxu1  ;;  %v532_v60 = vld [vmem:[%s1471_s6 + $0x28] sm:$0xff]  ;;  %v529_v9 = vld [vmem:[%s1471_s6 + $0x10] sm:$0xff] }
 0x100   :  { %v238_v0 = vadd.f32 %v237_v61, %v156_v56  ;;  %v315_v1 = vadd.f32 %v314_v62, %v156_v56  ;;  %v320_v14 = vmax.f32 %v234_v4, 0.0  ;;  %v322_v15 = vmax.f32 %v311_v5, 0.0  ;;  %v580_v61 = vld [vmem:[%s1471_s6 + $0x1a8] sm:$0xff]  ;;  %v578_v4 = vld [vmem:[%s1471_s6 + $0x198] sm:$0xff] }
 0x101   :  { %v239_v2 = vpop.f32.mrf.mxu0  ;;  %v316_v3 = vpop.f32.mrf.mxu1  ;;  %v564_v62 = vld [vmem:[%s1471_s6 + $0x128] sm:$0xff]  ;;  %v530_v5 = vld [vmem:[%s1471_s6 + $0x18] sm:$0xff] }
 0x102   :  { %v240_v6 = vadd.f32 %v239_v2, %v156_v56  ;;  %v317_v7 = vadd.f32 %v316_v3, %v156_v56  ;;  %v323_v12 = vmax.f32 %v238_v0, 0.0  ;;  %v325_v13 = vmax.f32 %v315_v1, 0.0  ;;  %v581_v56 = vld [vmem:[%s1471_s6 + $0x1b0] sm:$0xff]  ;;  %v579_v0 = vld [vmem:[%s1471_s6 + $0x1a0] sm:$0xff]  ;;  %v546_v3 = vld [vmem:[%s1471_s6 + $0x98] sm:$0xff] }
 0x103   :  { %v531_v1 = vld [vmem:[%s1471_s6 + $0x20] sm:$0xff] }
 0x104   :  { %v324_v10 = vmax.f32 %v240_v6, 0.0  ;;  %v326_v11 = vmax.f32 %v317_v7, 0.0  ;;  %v563_v2 = vld [vmem:[%s1471_s6 + $0x120] sm:$0xff]  ;;  %v562_v6 = vld [vmem:[%s1471_s6 + $0x118] sm:$0xff]  ;;  %v545_v7 = vld [vmem:[%s1471_s6 + $0x90] sm:$0xff] }
 0x106   :  { %761 = vmatprep.subr.msk.mxu0 %vm342_vm1, %v324_v10  ;;  %764 = vmatprep.subr.msk.mxu1 %vm342_vm1, %v326_v11  ;;  %v561_v10 = vld [vmem:[%s1471_s6 + $0x110] sm:$0xff]  ;;  %v544_v11 = vld [vmem:[%s1471_s6 + $0x88] sm:$0xff] }
 0x107   :  { %762 = vmatpush1.msk.msra.mxu0 %vm342_vm1, %v323_v12  ;;  %765 = vmatpush1.msk.msra.mxu1 %vm342_vm1, %v325_v13  ;;  %v576_v12 = vld [vmem:[%s1471_s6 + $0x188] sm:$0xff] }
 0x108   :  { %385 = vmatprep.subr.mxu0 %v320_v14  ;;  %456 = vmatprep.subr.mxu1 %v322_v15  ;;  %v528_v13 = vld [vmem:[%s1471_s6 + $0x8] sm:$0xff]  ;;  %v543_v15 = vld [vmem:[%s1471_s6 + $0x80] sm:$0xff] }
 0x109   :  { %386 = vmatpush1.msra.mxu0 %v319_v16  ;;  %457 = vmatpush1.msra.mxu1 %v321_v17  ;;  %v560_v14 = vld [vmem:[%s1471_s6 + $0x108] sm:$0xff]  ;;  %v527_v16 = vld [vmem:[%s1471_s6] sm:$0xff] }
 0x10a   :  { %763 = vmatmul.mubr.msk.f32.vlgmr.msra.gmra.mxu0 %vm338_vm2, %v327_v18  ;;  %766 = vmatmul.mubr.msk.f32.vlgmr.msra.gmra.mxu1 %vm338_vm2, %v327_v18  ;;  %v575_v17 = vld [vmem:[%s1471_s6 + $0x180] sm:$0xff] }
 0x10b   :  { %767 = vmatprep.subr.mxu0 %v558_v19  ;;  %802 = vmatprep.subr.mxu1 %v590_v20  ;;  %v559_v18 = vld [vmem:[%s1471_s6 + $0x100] sm:$0xff]  ;;  %v334_v19 = vlaneseq }
 0x10c   :  { %768 = vmatpush3.msra.mxu0 %v542_v21  ;;  %803 = vmatpush3.msra.mxu1 %v574_v22  ;;  %v332_v22 = vpop.permute.xlu1 %331 }
 0x10d   :  { %769 = vmatprep.subr.mxu0 %v557_v23  ;;  %804 = vmatprep.subr.mxu1 %v589_v24  ;;  %v335_v20 = vshrl.u32 %v334_v19, 7 }
 0x10e   :  { %770 = vmatpush3.msra.mxu0 %v541_v25  ;;  %805 = vmatpush3.msra.mxu1 %v573_v26 }
 0x10f   :  { %771 = vmatprep.subr.mxu0 %v556_v27  ;;  %806 = vmatprep.subr.mxu1 %v588_v28  ;;  %v336_v21 = vsub.s32 0, %v335_v20  ;;  %v509_v24 = vsub.s32 1, %v335_v20  ;;  %v513_v25 = vsub.s32 2, %v335_v20  ;;  %v517_v26 = vsub.s32 3, %v335_v20 }
 0x110   :  { %772 = vmatpush3.msra.mxu0 %v540_v29  ;;  %807 = vmatpush3.msra.mxu1 %v572_v30  ;;  %v501_v30 = vld [vmem:[%s1470_s5] sm:$0xf]  ;;  %s866_s5 = smov [#allocation4]  }
 0x111   :  { %773 = vmatprep.subr.mxu0 %v555_v31  ;;  %808 = vmatprep.subr.mxu1 %v587_v32  ;;  %v337_v23 = vrot.slane %v332_v22, %v336_v21  ;;  %s749_s6 = sshll.u32 %s866_s5, 4  ;;  %s750_s6 = int_to_ptr.vmem [resolvable:$true] %s749_s6 }
 0x112   :  { %774 = vmatpush3.msra.mxu0 %v539_v33  ;;  %809 = vmatpush3.msra.mxu1 %v571_v34  ;;  %v510_v33 = vrot.slane %v501_v30, %v509_v24  ;;  %v514_v34 = vrot.slane %v501_v30, %v513_v25  ;;  %s842_s13 = scalar_lea.vmem %s750_s6, 16  ;;  %s846_s14 = scalar_lea.vmem %s750_s6, 32 }
 0x113   :  { %775 = vmatprep.subr.mxu0 %v554_v35  ;;  %810 = vmatprep.subr.mxu1 %v586_v36  ;;  %p843_p0 = scmp.ne.s32.totalorder %s750_s6, %s842_s13  ;;  %p847_p1 = scmp.lt.s32.totalorder %s750_s6, %s750_s6 }
 0x114   :  { %776 = vmatpush3.msra.mxu0 %v538_v37  ;;  %811 = vmatpush3.msra.mxu1 %v570_v38  ;;  %p848_p2 = scmp.lt.s32.totalorder %s846_s14, %s842_s13 }
 0x115   :  { %777 = vmatprep.subr.mxu0 %v553_v39  ;;  %812 = vmatprep.subr.mxu1 %v585_v40  ;;  %v518_v39 = vrot.slane %v501_v30, %v517_v26 }
 0x116   :  { %778 = vmatpush3.msra.mxu0 %v537_v41  ;;  %813 = vmatpush3.msra.mxu1 %v569_v42  ;;  %v506_v41 = vrot.slane %v501_v30, %v336_v21  ;;  %p849_p3 = por %p848_p2, %p847_p1 }
 0x117   :  { %779 = vmatprep.subr.mxu0 %v552_v43  ;;  %814 = vmatprep.subr.mxu1 %v584_v44 }
 0x118   :  { %780 = vmatpush3.msra.mxu0 %v536_v45  ;;  %815 = vmatpush3.msra.mxu1 %v568_v46  ;;  %p850_p4 = pnand %p849_p3, %p843_p0 }
 0x119   :  { %781 = vmatprep.subr.mxu0 %v551_v47  ;;  %816 = vmatprep.subr.mxu1 %v583_v48  ;;  %v595_v48 = vpop.permute.xlu1 %594 }
 0x11a   :  { %782 = vmatpush3.msra.mxu0 %v535_v49  ;;  %817 = vmatpush3.msra.mxu1 %v567_v50 }
 0x11b   :  { %783 = vmatprep.subr.mxu0 %v550_v51  ;;  %818 = vmatprep.subr.mxu1 %v582_v52 }
 0x11c   :  { %784 = vmatpush3.msra.mxu0 %v534_v53  ;;  %819 = vmatpush3.msra.mxu1 %v566_v54  ;;  %v600_v53 = vrot.slane %v595_v48, %v336_v21 }
 0x11d   :  { %785 = vmatprep.subr.mxu0 %v549_v55  ;;  %820 = vmatprep.subr.mxu1 %v581_v56 }
 0x11e   :  { %786 = vmatpush3.msra.mxu0 %v533_v57  ;;  %821 = vmatpush3.msra.mxu1 %v565_v58 }
 0x11f   :  { %787 = vmatprep.subr.mxu0 %v548_v59  ;;  %822 = vmatprep.subr.mxu1 %v580_v61 }
 0x120   :  { %788 = vmatpush3.msra.mxu0 %v532_v60  ;;  %823 = vmatpush3.msra.mxu1 %v564_v62 }
 0x121   :  { %789 = vmatprep.subr.mxu0 %v547_v63  ;;  %824 = vmatprep.subr.mxu1 %v579_v0 }
 0x122   :  { %790 = vmatpush3.msra.mxu0 %v531_v1  ;;  %825 = vmatpush3.msra.mxu1 %v563_v2 }
 0x123   :  { %791 = vmatprep.subr.mxu0 %v546_v3  ;;  %826 = vmatprep.subr.mxu1 %v578_v4 }
 0x124   :  { %792 = vmatpush3.msra.mxu0 %v530_v5  ;;  %827 = vmatpush3.msra.mxu1 %v562_v6 }
 0x125   :  { %793 = vmatprep.subr.mxu0 %v545_v7  ;;  %828 = vmatprep.subr.mxu1 %v577_v8 }
 0x126   :  { %794 = vmatpush3.msra.mxu0 %v529_v9  ;;  %829 = vmatpush3.msra.mxu1 %v561_v10 }
 0x127   :  { %795 = vmatprep.subr.mxu0 %v544_v11  ;;  %830 = vmatprep.subr.mxu1 %v576_v12 }
 0x128   :  { %796 = vmatpush3.msra.mxu0 %v528_v13  ;;  %831 = vmatpush3.msra.mxu1 %v560_v14 }
 0x129   :  { %797 = vmatprep.subr.mxu0 %v543_v15  ;;  %832 = vmatprep.subr.mxu1 %v575_v17 }
 0x12a   :  { %798 = vmatpush3.msra.mxu0 %v527_v16  ;;  %833 = vmatpush3.msra.mxu1 %v559_v18 }
 0x1ca   :  { %v421_v27 = vpop.f32.mrf.mxu0  ;;  %v492_v28 = vpop.f32.mrf.mxu1 }
 0x1cb   :  { %v422_v29 = vadd.f32 %v421_v27, %v337_v23  ;;  %v493_v31 = vadd.f32 %v492_v28, %v337_v23 }
 0x1cc   :  { %v423_v32 = vpop.f32.mrf.mxu0  ;;  %v494_v35 = vpop.f32.mrf.mxu1 }
 0x1cd   :  { %v424_v36 = vadd.f32 %v423_v32, %v337_v23  ;;  %v499_v37 = vmax.f32 %v493_v31, 0.0  ;;  %v495_v38 = vadd.f32 %v494_v35, %v337_v23  ;;  %v497_v40 = vmax.f32 %v422_v29, 0.0 }
 0x1cf   :  { %v498_v42 = vmax.f32 %v424_v36, 0.0  ;;  %v500_v43 = vmax.f32 %v495_v38, 0.0  ;;  %v525_v44 = vmul.f32 %v514_v34, %v499_v37  ;;  %v523_v47 = vmul.f32 %v506_v41, %v497_v40 }
 0x1d1   :  { %v524_v45 = vmul.f32 %v510_v33, %v498_v42  ;;  %v526_v46 = vmul.f32 %v518_v39, %v500_v43 }
 0x1d3   :  { %665 = vmatprep.mubr.f32.mxu0 %v524_v45  ;;  %735 = vmatprep.mubr.f32.mxu1 %v526_v46 }
 0x1d4   :  { %666 = vmatmul.mubr.f32.vlgmr.msra.gmra.mxu0 %v523_v47  ;;  %736 = vmatmul.mubr.f32.vlgmr.msra.gmra.mxu1 %v525_v44 }
 0x294   :  { %v799_v49 = vpop.f32.mrf.mxu0  ;;  %v834_v50 = vpop.f32.mrf.mxu1 }
 0x296   :  { %v800_v51 = vpop.f32.mrf.mxu0  ;;  %v835_v52 = vpop.f32.mrf.mxu1 }
 0x297   :  { %v801_v54 = vadd.f32 %v800_v51, %v799_v49  ;;  %v836_v56 = vadd.f32 %v835_v52, %v834_v50 }
 0x299   :  { %v668_v55 = vadd.f32 %v801_v54, %v600_v53 }
 0x29b   :  { %v738_v57 = vadd.f32 %v836_v56, %v668_v55 }
 0x29d   :  { %742 = vst.msk [vmem:[#allocation4] sm:$0x1] %vm741_vm3, %v738_v57 }
 0x29e   :  { %853 = shalt.err (!%p850_p4)
}
 0x29f   :  { %752 = dma.vmem_to_hbm [thread:$0]  %s750_s6, 16, %s1472_s8, [#allocation5]  }
 0x2a0   :  { %862 = dma.done.wait [#allocation5], 16  }
 0x2a1   :  { %863 = vsyncadd [#allocation5], 4294967280 }
 0x2a2   :  { %756 = vsyncpa [#allocation5], 1 }

</bundles_post_ra>
